<compile_context>
chip_gen: v6e
topology: v6e:2x2x1
jax: 0.10.0
libtpu: 0.0.40
codegen_flags: <defaults>
</compile_context>

<pallas_src>
import jax
import jax.numpy as jnp
from jax.experimental import pallas as pl
from jax.experimental.pallas import tpu as pltpu

FEATURE_DIM = 32
K = 8


# --------------------------------------------------------------------------- #
# Kernel: per-row PointNet MLP (2x ResnetBlockFC) + k-neighbour max, entirely
# on a 4-query lane-packed (rows, 128) layout.
# --------------------------------------------------------------------------- #
def _pointnet_max_kernel(x_ref, w0a_ref, ws_ref, w1a_ref, w0b_ref, w1b_ref,
                         b0a_ref, b1a_ref, b0b_ref, b1b_ref, o_ref):
    k, rp, w_in = x_ref.shape          # (K, tq//pack, pack*cin_p)
    cdt = x_ref.dtype                  # bf16 matmul-input dtype

    # (K, tq//pack, pack*cin_p) -> (K*tq//pack, pack*cin_p): leading-dim merge
    # only, sublane aligned, free.
    xp = x_ref[...].reshape(k * rp, w_in)

    # ---- ResnetBlockFC #1 (F+3 -> F): fc_0 and the linear shortcut as two
    # lane-packed matmuls with block-diagonal-replicated weights.
    # (bf16 relu is emulated on v5e's f32-only VPU; minor vs. the MXU work.)
    net = jnp.dot(jnp.maximum(xp, 0), w0a_ref[...],
                  preferred_element_type=jnp.float32) + b0a_ref[...]
    sc = jnp.dot(xp, ws_ref[...], preferred_element_type=jnp.float32)
    dx = jnp.dot(jnp.maximum(net, 0.0).astype(cdt), w1a_ref[...],
                 preferred_element_type=jnp.float32) + b1a_ref[...]
    y1 = sc + dx                                         # (rows_p, 128) f32

    # ---- ResnetBlockFC #2 (F -> F): identity shortcut, still lane-packed.
    net2 = jnp.dot(jnp.maximum(y1, 0.0).astype(cdt), w0b_ref[...],
                   preferred_element_type=jnp.float32) + b0b_ref[...]
    dx2 = jnp.dot(jnp.maximum(net2, 0.0).astype(cdt), w1b_ref[...],
                  preferred_element_type=jnp.float32) + b1b_ref[...]
    y2 = y1 + dx2                                        # (rows_p, 128) f32

    # scatter(..., reduce='max') over the K neighbours of each query point:
    # K-1 elementwise maxima over contiguous lane-dense slabs (pure VPU).
    y2 = y2.reshape(k, rp, y2.shape[-1])
    acc = y2[0]
    for i in range(1, k):
        acc = jnp.maximum(acc, y2[i])
    o_ref[...] = acc                                     # already lane-packed


# --------------------------------------------------------------------------- #
# Wrapper
# --------------------------------------------------------------------------- #
def _round_up(x, m):
    return ((x + m - 1) // m) * m


def _block_diag(w, n):
    """n-fold block-diagonal replication of a 2-D weight (for lane packing)."""
    a, b = w.shape
    out = jnp.zeros((n * a, n * b), w.dtype)
    for i in range(n):
        out = out.at[i * a:(i + 1) * a, i * b:(i + 1) * b].set(w)
    return out


def _tpu_generation():
    try:
        kind = jax.devices()[0].device_kind.lower()
    except Exception:
        return None
    for g in ("v7", "v6", "v5"):
        if g in kind:
            return g
    return None


def _tile_plan(m, align):
    """Per-generation query-tile / grid / VMEM-budget choice."""
    gen = _tpu_generation()
    if gen == "v7":
        # Dual TensorCore, 64 MiB physical VMEM: balanced even grid, tight budget.
        tq_max, min_steps, even_steps, vmem = 512, 4, True, 48 << 20
    elif gen in ("v5", "v6"):
        # Single TC: the grid is a serial loop -> one big tile; 128 MiB physical
        # VMEM but small default scoped limit, so raise it explicitly.
        tq_max, min_steps, even_steps, vmem = 1024, 1, False, 64 << 20
    else:
        tq_max, min_steps, even_steps, vmem = 512, 2, False, 48 << 20

    m_al = _round_up(m, align)
    tq = min(_round_up(tq_max, align), m_al)
    while tq > align and pl.cdiv(m_al, tq) < min_steps:
        tq = max(align, _round_up(tq // 2, align))
    m_pad = _round_up(m, tq)
    if even_steps and (m_pad // tq) % 2 == 1:
        m_pad += tq                     # keep both v7x TensorCores busy
    return tq, m_pad, vmem


def _run_pointnet_max(stacked, params):
    """stacked: (K, M, F+3) neighbour-major pre-gathered features + coord diffs."""
    k, m, cin = stacked.shape
    f = params["w1b"].shape[1]

    # Lane-packing factor: how many query points share one 128-lane row.
    pack = 128 // f if (f <= 128 and 128 % f == 0) else 1
    align = 8 * pack
    cin_p = _round_up(cin, 64)          # lane-align per-query input slots

    tq, m_pad, vmem_limit = _tile_plan(m, align)

    # Pad query count and input channels, cast matmul inputs to bf16, and
    # pre-pack `pack` consecutive queries per row (pure metadata reshape).
    stacked = jnp.pad(stacked, ((0, 0), (0, m_pad - m), (0, cin_p - cin)))
    stacked = stacked.astype(jnp.bfloat16)
    stacked = stacked.reshape(k, m_pad // pack, pack * cin_p)

    # Zero-pad cin rows, then replicate every weight block-diagonally `pack`
    # times so one (rows, 256|128) @ (256|128, 128) matmul handles `pack`
    # queries at once; tile the biases along lanes to match.
    def pad_rows(w):
        return jnp.pad(w, ((0, cin_p - w.shape[0]), (0, 0)))

    bf16 = jnp.bfloat16
    w0a_rep = _block_diag(pad_rows(params["w0a"]), pack).astype(bf16)  # (p*cin_p, p*F)
    ws_rep = _block_diag(pad_rows(params["ws"]), pack).astype(bf16)    # (p*cin_p, p*F)
    w1a_rep = _block_diag(params["w1a"], pack).astype(bf16)            # (p*F, p*F)
    w0b_rep = _block_diag(params["w0b"], pack).astype(bf16)
    w1b_rep = _block_diag(params["w1b"], pack).astype(bf16)
    b0a_rep = jnp.tile(params["b0a"], (1, pack)).astype(jnp.float32)   # (1, p*F)
    b1a_rep = jnp.tile(params["b1a"], (1, pack)).astype(jnp.float32)
    b0b_rep = jnp.tile(params["b0b"], (1, pack)).astype(jnp.float32)
    b1b_rep = jnp.tile(params["b1b"], (1, pack)).astype(jnp.float32)
    weights = [w0a_rep, ws_rep, w1a_rep, w0b_rep, w1b_rep,
               b0a_rep, b1a_rep, b0b_rep, b1b_rep]

    def full_spec(arr):
        nd = arr.ndim
        return pl.BlockSpec(arr.shape, lambda i, _nd=nd: (0,) * _nd)

    out = pl.pallas_call(
        _pointnet_max_kernel,
        out_shape=jax.ShapeDtypeStruct((m_pad // pack, pack * f), jnp.float32),
        grid_spec=pltpu.PrefetchScalarGridSpec(
            num_scalar_prefetch=0,
            grid=(m_pad // tq,),
            in_specs=[pl.BlockSpec((k, tq // pack, pack * cin_p),
                                   lambda i: (0, i, 0))]
                     + [full_spec(w) for w in weights],
            out_specs=pl.BlockSpec((tq // pack, pack * f), lambda i: (i, 0)),
        ),
        compiler_params=pltpu.CompilerParams(
            dimension_semantics=("parallel",),
            vmem_limit_bytes=vmem_limit,
        ),
    )(stacked, *weights)

    # (m_pad//pack, pack*F) -> (m_pad, F) is a pure row-major reshape (free).
    return out.reshape(m_pad, f)[:m]


def _build_stacked(feats, coords, batch_idx, pts, k):
    """Batch-aware kNN + neighbour-major gather: returns (k, M, F+3) float32."""
    pts_batch = pts[:, 0].astype(jnp.int32)
    pts_coords = pts[:, 1:].astype(jnp.float32)
    coords = coords.astype(jnp.float32)

    # TODO(synk): knn neighbour search kept in plain JAX (no-grad preprocessing
    # in the reference); brute-force O(M*N) distances only suit small N, M.
    d2 = jnp.sum((pts_coords[:, None, :] - coords[None, :, :]) ** 2, axis=-1)
    same_batch = pts_batch[:, None] == batch_idx[None, :].astype(jnp.int32)
    d2 = jnp.where(same_batch, d2, jnp.inf)
    neg_vals, nbr_idx = jax.lax.top_k(-d2, k)             # (M, k), nearest first

    # Batches with fewer than k candidates: duplicate the nearest valid
    # neighbour so the in-kernel max equals scatter_max over valid kNN pairs.
    # TODO(synk): a batch with zero sparse points has no valid neighbour at all.
    valid = jnp.isfinite(neg_vals)
    nbr_idx = jnp.where(valid, nbr_idx, nbr_idx[:, :1])

    # Neighbour-major so the kernel's k-reduction is K-1 elementwise maxima.
    nbr_t = nbr_idx.T                                      # (k, M)
    x_nb = feats[nbr_t]                                    # (k, M, F)
    diff = coords[nbr_t] - pts_coords[None, :, :]          # (k, M, 3)
    # TODO(synk): `stacked` is still materialized in HBM; fusing the gather into
    # the kernel (scalar-prefetch nbr_idx + per-row DMA) would remove one full
    # write+read of the dominant tensor (biggest relative win on v5e).
    return jnp.concatenate([x_nb, diff], axis=-1).astype(jnp.float32)


def pointnet_knn_interpolator(params, feats, coords, batch_idx, pts, k=K):
    """feats: (N, F), coords: (N, 3), batch_idx: (N,) ints,
       pts: (M, 4) with column 0 = batch index, columns 1:4 = xyz."""
    stacked = _build_stacked(feats, coords, batch_idx, pts, k)   # (k, M, F+3)
    return _run_pointnet_max(stacked, params)                    # (M, F)


def _reference_pointnet_max(params, stacked):
    """Pure-JAX f32 reference of MLP + max (for the sanity check)."""
    k, m, cin = stacked.shape
    x = stacked.reshape(k * m, cin)
    relu = lambda v: jnp.maximum(v, 0.0)
    net = relu(x) @ params["w0a"] + params["b0a"]
    dx = relu(net) @ params["w1a"] + params["b1a"]
    y1 = x @ params["ws"] + dx
    net2 = relu(y1) @ params["w0b"] + params["b0b"]
    dx2 = relu(net2) @ params["w1b"] + params["b1b"]
    y2 = (y1 + dx2).reshape(k, m, -1)
    return jnp.max(y2, axis=0)


def init_params(key, feature_dim):
    """Deterministic synthetic weights (nn.Linear shapes from __init__).
    Note: the reference zero-inits fc_1 weights; we use random values so the
    kernel actually exercises all matmuls."""
    cin = feature_dim + 3
    ks = jax.random.split(key, 9)

    def lin(k, fin, fout):
        scale = 1.0 / jnp.sqrt(jnp.float32(fin))
        return jax.random.uniform(k, (fin, fout), jnp.float32, -scale, scale)

    return {
        # ResnetBlockFC(F+3 -> F)
        "w0a": lin(ks[0], cin, feature_dim),
        "b0a": lin(ks[1], 1, feature_dim),
        "w1a": lin(ks[2], feature_dim, feature_dim),
        "b1a": lin(ks[3], 1, feature_dim),
        "ws":  lin(ks[4], cin, feature_dim),          # shortcut, bias=False
        # ResnetBlockFC(F -> F)
        "w0b": lin(ks[5], feature_dim, feature_dim),
        "b0b": lin(ks[6], 1, feature_dim),
        "w1b": lin(ks[7], feature_dim, feature_dim),
        "b1b": lin(ks[8], 1, feature_dim),
    }


if __name__ == "__main__":
    key = jax.random.PRNGKey(0)
    kp, kf, kc, kq = jax.random.split(key, 4)

    N, M, B = 256, 512, 2                     # sparse points, query points, batch
    params = init_params(kp, FEATURE_DIM)

    feats = jax.random.normal(kf, (N, FEATURE_DIM), jnp.float32)
    coords = jnp.floor(jax.random.uniform(kc, (N, 3), jnp.float32, 0.0, 10.0))
    batch_idx = jnp.repeat(jnp.arange(B, dtype=jnp.int32), N // B)

    q_coords = jax.random.uniform(kq, (M, 3), jnp.float32, 0.0, 10.0)
    q_batch = jnp.repeat(jnp.arange(B, dtype=jnp.float32), M // B)
    pts = jnp.concatenate([q_batch[:, None], q_coords], axis=1)   # (M, 4)

    out = pointnet_knn_interpolator(params, feats, coords, batch_idx, pts)
    jax.block_until_ready(out)
    assert out.shape == (M, FEATURE_DIM) and out.dtype == jnp.float32

    # Loose sanity check against a pure-JAX f32 reference (kernel uses bf16
    # matmul inputs with f32 accumulation, so allow a generous tolerance).
    stacked_f32 = _build_stacked(feats, coords, batch_idx, pts, K)
    ref = _reference_pointnet_max(params, stacked_f32)
    err = float(jnp.max(jnp.abs(out - ref)))
    scale = float(jnp.max(jnp.abs(ref))) + 1e-6
    assert err <= 0.05 * scale + 0.3, (err, scale)

    print("KERNEL_OK")
</pallas_src>

<mosaic_0001>
module attributes {stable_mosaic.version = 11 : i64} {
  func.func @_pointnet_max_kernel(%arg0: i32, %arg1: memref<8x64x256xbf16, #tpu.memory_space<vmem>>, %arg2: memref<256x128xbf16, #tpu.memory_space<vmem>>, %arg3: memref<256x128xbf16, #tpu.memory_space<vmem>>, %arg4: memref<128x128xbf16, #tpu.memory_space<vmem>>, %arg5: memref<128x128xbf16, #tpu.memory_space<vmem>>, %arg6: memref<128x128xbf16, #tpu.memory_space<vmem>>, %arg7: memref<1x128xf32, #tpu.memory_space<vmem>>, %arg8: memref<1x128xf32, #tpu.memory_space<vmem>>, %arg9: memref<1x128xf32, #tpu.memory_space<vmem>>, %arg10: memref<1x128xf32, #tpu.memory_space<vmem>>, %arg11: memref<64x128xf32, #tpu.memory_space<vmem>>) attributes {dimension_semantics = [#tpu.dimension_semantics<parallel>], iteration_bounds = array<i64: 2>, scalar_prefetch = 0 : i64, scratch_operands = 0 : i64, tpu.core_type = #tpu.core_type<tc>, window_params = [{transform_indices = @transform_0, window_bounds = array<i64: 8, 64, 256>}, {pipeline_mode = #tpu.pipeline_mode<synchronous>, transform_indices = @transform_1, window_bounds = array<i64: 256, 128>}, {pipeline_mode = #tpu.pipeline_mode<synchronous>, transform_indices = @transform_2, window_bounds = array<i64: 256, 128>}, {pipeline_mode = #tpu.pipeline_mode<synchronous>, transform_indices = @transform_3, window_bounds = array<i64: 128, 128>}, {pipeline_mode = #tpu.pipeline_mode<synchronous>, transform_indices = @transform_4, window_bounds = array<i64: 128, 128>}, {pipeline_mode = #tpu.pipeline_mode<synchronous>, transform_indices = @transform_5, window_bounds = array<i64: 128, 128>}, {pipeline_mode = #tpu.pipeline_mode<synchronous>, transform_indices = @transform_6, window_bounds = array<i64: 1, 128>}, {pipeline_mode = #tpu.pipeline_mode<synchronous>, transform_indices = @transform_7, window_bounds = array<i64: 1, 128>}, {pipeline_mode = #tpu.pipeline_mode<synchronous>, transform_indices = @transform_8, window_bounds = array<i64: 1, 128>}, {pipeline_mode = #tpu.pipeline_mode<synchronous>, transform_indices = @transform_9, window_bounds = array<i64: 1, 128>}, {transform_indices = @transform_10, window_bounds = array<i64: 64, 128>}]} {
    %c0 = arith.constant 0 : index
    %c0_0 = arith.constant 0 : index
    %c0_1 = arith.constant 0 : index
    %0 = vector.load %arg1[%c0, %c0_0, %c0_1] : memref<8x64x256xbf16, #tpu.memory_space<vmem>>, vector<8x64x256xbf16>
    %1 = vector.shape_cast %0 : vector<8x64x256xbf16> to vector<512x256xbf16>
    %cst = arith.constant 0.000000e+00 : bf16
    %2 = vector.broadcast %cst : bf16 to vector<512x256xbf16>
    %3 = arith.maximumf %1, %2 : vector<512x256xbf16>
    %c0_2 = arith.constant 0 : index
    %c0_3 = arith.constant 0 : index
    %4 = vector.load %arg2[%c0_2, %c0_3] : memref<256x128xbf16, #tpu.memory_space<vmem>>, vector<256x128xbf16>
    %cst_4 = arith.constant dense<0.000000e+00> : vector<512x128xf32>
    %5 = tpu.matmul %3, %4, %cst_4 {dimension_numbers = #tpu.dot_dimension_numbers<[1], [0], [0], [1], [0, 0, 1, 1], [], []>} : vector<512x256xbf16>, vector<256x128xbf16>, vector<512x128xf32> -> vector<512x128xf32>
    %c0_5 = arith.constant 0 : index
    %c0_6 = arith.constant 0 : index
    %6 = vector.load %arg7[%c0_5, %c0_6] : memref<1x128xf32, #tpu.memory_space<vmem>>, vector<1x128xf32>
    %7 = vector.broadcast %6 : vector<1x128xf32> to vector<512x128xf32>
    %8 = arith.addf %5, %7 : vector<512x128xf32>
    %c0_7 = arith.constant 0 : index
    %c0_8 = arith.constant 0 : index
    %9 = vector.load %arg3[%c0_7, %c0_8] : memref<256x128xbf16, #tpu.memory_space<vmem>>, vector<256x128xbf16>
    %cst_9 = arith.constant dense<0.000000e+00> : vector<512x128xf32>
    %10 = tpu.matmul %1, %9, %cst_9 {dimension_numbers = #tpu.dot_dimension_numbers<[1], [0], [0], [1], [0, 0, 1, 1], [], []>} : vector<512x256xbf16>, vector<256x128xbf16>, vector<512x128xf32> -> vector<512x128xf32>
    %cst_10 = arith.constant 0.000000e+00 : f32
    %11 = vector.broadcast %cst_10 : f32 to vector<512x128xf32>
    %12 = arith.maximumf %8, %11 : vector<512x128xf32>
    %13 = arith.truncf %12 : vector<512x128xf32> to vector<512x128xbf16>
    %c0_11 = arith.constant 0 : index
    %c0_12 = arith.constant 0 : index
    %14 = vector.load %arg4[%c0_11, %c0_12] : memref<128x128xbf16, #tpu.memory_space<vmem>>, vector<128x128xbf16>
    %cst_13 = arith.constant dense<0.000000e+00> : vector<512x128xf32>
    %15 = tpu.matmul %13, %14, %cst_13 {dimension_numbers = #tpu.dot_dimension_numbers<[1], [0], [0], [1], [0, 0, 1, 1], [], []>} : vector<512x128xbf16>, vector<128x128xbf16>, vector<512x128xf32> -> vector<512x128xf32>
    %c0_14 = arith.constant 0 : index
    %c0_15 = arith.constant 0 : index
    %16 = vector.load %arg8[%c0_14, %c0_15] : memref<1x128xf32, #tpu.memory_space<vmem>>, vector<1x128xf32>
    %17 = vector.broadcast %16 : vector<1x128xf32> to vector<512x128xf32>
    %18 = arith.addf %15, %17 : vector<512x128xf32>
    %19 = arith.addf %10, %18 : vector<512x128xf32>
    %cst_16 = arith.constant 0.000000e+00 : f32
    %20 = vector.broadcast %cst_16 : f32 to vector<512x128xf32>
    %21 = arith.maximumf %19, %20 : vector<512x128xf32>
    %22 = arith.truncf %21 : vector<512x128xf32> to vector<512x128xbf16>
    %c0_17 = arith.constant 0 : index
    %c0_18 = arith.constant 0 : index
    %23 = vector.load %arg5[%c0_17, %c0_18] : memref<128x128xbf16, #tpu.memory_space<vmem>>, vector<128x128xbf16>
    %cst_19 = arith.constant dense<0.000000e+00> : vector<512x128xf32>
    %24 = tpu.matmul %22, %23, %cst_19 {dimension_numbers = #tpu.dot_dimension_numbers<[1], [0], [0], [1], [0, 0, 1, 1], [], []>} : vector<512x128xbf16>, vector<128x128xbf16>, vector<512x128xf32> -> vector<512x128xf32>
    %c0_20 = arith.constant 0 : index
    %c0_21 = arith.constant 0 : index
    %25 = vector.load %arg9[%c0_20, %c0_21] : memref<1x128xf32, #tpu.memory_space<vmem>>, vector<1x128xf32>
    %26 = vector.broadcast %25 : vector<1x128xf32> to vector<512x128xf32>
    %27 = arith.addf %24, %26 : vector<512x128xf32>
    %cst_22 = arith.constant 0.000000e+00 : f32
    %28 = vector.broadcast %cst_22 : f32 to vector<512x128xf32>
    %29 = arith.maximumf %27, %28 : vector<512x128xf32>
    %30 = arith.truncf %29 : vector<512x128xf32> to vector<512x128xbf16>
    %c0_23 = arith.constant 0 : index
    %c0_24 = arith.constant 0 : index
    %31 = vector.load %arg6[%c0_23, %c0_24] : memref<128x128xbf16, #tpu.memory_space<vmem>>, vector<128x128xbf16>
    %cst_25 = arith.constant dense<0.000000e+00> : vector<512x128xf32>
    %32 = tpu.matmul %30, %31, %cst_25 {dimension_numbers = #tpu.dot_dimension_numbers<[1], [0], [0], [1], [0, 0, 1, 1], [], []>} : vector<512x128xbf16>, vector<128x128xbf16>, vector<512x128xf32> -> vector<512x128xf32>
    %c0_26 = arith.constant 0 : index
    %c0_27 = arith.constant 0 : index
    %33 = vector.load %arg10[%c0_26, %c0_27] : memref<1x128xf32, #tpu.memory_space<vmem>>, vector<1x128xf32>
    %34 = vector.broadcast %33 : vector<1x128xf32> to vector<512x128xf32>
    %35 = arith.addf %32, %34 : vector<512x128xf32>
    %36 = arith.addf %19, %35 : vector<512x128xf32>
    %37 = vector.shape_cast %36 : vector<512x128xf32> to vector<8x64x128xf32>
    %38 = vector.extract_strided_slice %37 {offsets = [0, 0, 0], sizes = [1, 64, 128], strides = [1, 1, 1]} : vector<8x64x128xf32> to vector<1x64x128xf32>
    %39 = vector.shape_cast %38 : vector<1x64x128xf32> to vector<64x128xf32>
    %40 = vector.extract_strided_slice %37 {offsets = [1, 0, 0], sizes = [1, 64, 128], strides = [1, 1, 1]} : vector<8x64x128xf32> to vector<1x64x128xf32>
    %41 = vector.shape_cast %40 : vector<1x64x128xf32> to vector<64x128xf32>
    %42 = arith.maximumf %39, %41 : vector<64x128xf32>
    %43 = vector.extract_strided_slice %37 {offsets = [2, 0, 0], sizes = [1, 64, 128], strides = [1, 1, 1]} : vector<8x64x128xf32> to vector<1x64x128xf32>
    %44 = vector.shape_cast %43 : vector<1x64x128xf32> to vector<64x128xf32>
    %45 = arith.maximumf %42, %44 : vector<64x128xf32>
    %46 = vector.extract_strided_slice %37 {offsets = [3, 0, 0], sizes = [1, 64, 128], strides = [1, 1, 1]} : vector<8x64x128xf32> to vector<1x64x128xf32>
    %47 = vector.shape_cast %46 : vector<1x64x128xf32> to vector<64x128xf32>
    %48 = arith.maximumf %45, %47 : vector<64x128xf32>
    %49 = vector.extract_strided_slice %37 {offsets = [4, 0, 0], sizes = [1, 64, 128], strides = [1, 1, 1]} : vector<8x64x128xf32> to vector<1x64x128xf32>
    %50 = vector.shape_cast %49 : vector<1x64x128xf32> to vector<64x128xf32>
    %51 = arith.maximumf %48, %50 : vector<64x128xf32>
    %52 = vector.extract_strided_slice %37 {offsets = [5, 0, 0], sizes = [1, 64, 128], strides = [1, 1, 1]} : vector<8x64x128xf32> to vector<1x64x128xf32>
    %53 = vector.shape_cast %52 : vector<1x64x128xf32> to vector<64x128xf32>
    %54 = arith.maximumf %51, %53 : vector<64x128xf32>
    %55 = vector.extract_strided_slice %37 {offsets = [6, 0, 0], sizes = [1, 64, 128], strides = [1, 1, 1]} : vector<8x64x128xf32> to vector<1x64x128xf32>
    %56 = vector.shape_cast %55 : vector<1x64x128xf32> to vector<64x128xf32>
    %57 = arith.maximumf %54, %56 : vector<64x128xf32>
    %58 = vector.extract_strided_slice %37 {offsets = [7, 0, 0], sizes = [1, 64, 128], strides = [1, 1, 1]} : vector<8x64x128xf32> to vector<1x64x128xf32>
    %59 = vector.shape_cast %58 : vector<1x64x128xf32> to vector<64x128xf32>
    %60 = arith.maximumf %57, %59 : vector<64x128xf32>
    %c0_28 = arith.constant 0 : index
    %c0_29 = arith.constant 0 : index
    %61 = vector.load %arg11[%c0_28, %c0_29] : memref<64x128xf32, #tpu.memory_space<vmem>>, vector<64x128xf32>
    tpu.vector_store %arg11[%c0_28, %c0_29], %60 {strides = array<i32>} : memref<64x128xf32, #tpu.memory_space<vmem>>, vector<64x128xf32>,
    return
  }
  func.func @transform_0(%arg0: i32) -> (i32, i32, i32) {
    %c0_i32 = arith.constant 0 : i32
    %c0_i32_0 = arith.constant 0 : i32
    %c0_i32_1 = arith.constant 0 : i32
    return %c0_i32, %arg0, %c0_i32_0 : i32, i32, i32
  }
  func.func @transform_1(%arg0: i32) -> (i32, i32) {
    %c0_i32 = arith.constant 0 : i32
    %c0_i32_0 = arith.constant 0 : i32
    %c0_i32_1 = arith.constant 0 : i32
    return %c0_i32, %c0_i32_0 : i32, i32
  }
  func.func @transform_2(%arg0: i32) -> (i32, i32) {
    %c0_i32 = arith.constant 0 : i32
    %c0_i32_0 = arith.constant 0 : i32
    %c0_i32_1 = arith.constant 0 : i32
    return %c0_i32, %c0_i32_0 : i32, i32
  }
  func.func @transform_3(%arg0: i32) -> (i32, i32) {
    %c0_i32 = arith.constant 0 : i32
    %c0_i32_0 = arith.constant 0 : i32
    %c0_i32_1 = arith.constant 0 : i32
    return %c0_i32, %c0_i32_0 : i32, i32
  }
  func.func @transform_4(%arg0: i32) -> (i32, i32) {
    %c0_i32 = arith.constant 0 : i32
    %c0_i32_0 = arith.constant 0 : i32
    %c0_i32_1 = arith.constant 0 : i32
    return %c0_i32, %c0_i32_0 : i32, i32
  }
  func.func @transform_5(%arg0: i32) -> (i32, i32) {
    %c0_i32 = arith.constant 0 : i32
    %c0_i32_0 = arith.constant 0 : i32
    %c0_i32_1 = arith.constant 0 : i32
    return %c0_i32, %c0_i32_0 : i32, i32
  }
  func.func @transform_6(%arg0: i32) -> (i32, i32) {
    %c0_i32 = arith.constant 0 : i32
    %c0_i32_0 = arith.constant 0 : i32
    %c0_i32_1 = arith.constant 0 : i32
    return %c0_i32, %c0_i32_0 : i32, i32
  }
  func.func @transform_7(%arg0: i32) -> (i32, i32) {
    %c0_i32 = arith.constant 0 : i32
    %c0_i32_0 = arith.constant 0 : i32
    %c0_i32_1 = arith.constant 0 : i32
    return %c0_i32, %c0_i32_0 : i32, i32
  }
  func.func @transform_8(%arg0: i32) -> (i32, i32) {
    %c0_i32 = arith.constant 0 : i32
    %c0_i32_0 = arith.constant 0 : i32
    %c0_i32_1 = arith.constant 0 : i32
    return %c0_i32, %c0_i32_0 : i32, i32
  }
  func.func @transform_9(%arg0: i32) -> (i32, i32) {
    %c0_i32 = arith.constant 0 : i32
    %c0_i32_0 = arith.constant 0 : i32
    %c0_i32_1 = arith.constant 0 : i32
    return %c0_i32, %c0_i32_0 : i32, i32
  }
  func.func @transform_10(%arg0: i32) -> (i32, i32) {
    %c0_i32 = arith.constant 0 : i32
    %c0_i32_0 = arith.constant 0 : i32
    return %arg0, %c0_i32 : i32, i32
  }
}

</mosaic_0001>

<bundles_post_ra>
// kernel: tpu_custom_call.1
= control target key start
LH: loop header
LB: loop body
LE: loop exit
PB: predicated region body
PF: predicated region fallthrough
CT: control target
= control target key end

     0   :  { %s6111_s0 = inlined_call_operand.hbm [shape: bf16[8,128,256], index: 0, kind: input, shape index: {}]   ;;  %s6112_s1 = inlined_call_operand.hbm [shape: bf16[256,128], index: 1, kind: input, shape index: {}]   ;;  %s6113_s2 = inlined_call_operand.hbm [shape: bf16[256,128], index: 2, kind: input, shape index: {}]   ;;  %s6114_s3 = inlined_call_operand.hbm [shape: bf16[128,128], index: 3, kind: input, shape index: {}]   ;;  %s6115_s4 = inlined_call_operand.hbm [shape: bf16[128,128], index: 4, kind: input, shape index: {}]   ;;  %s6116_s5 = inlined_call_operand.hbm [shape: bf16[128,128], index: 5, kind: input, shape index: {}]   ;;  %s6117_s6 = inlined_call_operand.vmem [shape: f32[1,128], index: 6, kind: input, shape index: {}]   ;;  %s6118_s7 = inlined_call_operand.vmem [shape: f32[1,128], index: 7, kind: input, shape index: {}]   ;;  %s6119_s8 = inlined_call_operand.vmem [shape: f32[1,128], index: 8, kind: input, shape index: {}]   ;;  %s6120_s9 = inlined_call_operand.vmem [shape: f32[1,128], index: 9, kind: input, shape index: {}]   ;;  %s6121_s10 = inlined_call_operand.hbm [shape: f32[128,128], index: 10, kind: output, shape index: {}]  }
   0x1   :  { %6164 = sst [smem:[#allocation59_spill]] %s6112_s1 }
   0x2   :  { %6165 = sst [smem:[#allocation60_spill]] %s6113_s2 }
   0x3   :  { %15 = vsyncpa [#allocation3], 0 }
   0x4   :  { %17 = vsyncpa [#allocation3 + $0x1], 0 }
   0x5   :  { %18 = vsyncpa [#allocation6], 0 }
   0x6   :  { %19 = vsyncpa [#allocation9], 0 }
   0x7   :  { %20 = vsyncpa [#allocation12], 0 }
   0x8   :  { %21 = vsyncpa [#allocation4], 0 }
   0x9   :  { %23 = vsyncpa [#allocation4 + $0x1], 0  ;;  %s4886_s13 = smov 0   ;;  %s4888_s14 = smov 0  }
   0xa   :  { %s4890_s15 = smov 0   ;;  %s4892_s16 = smov 0  }
   0xb LB: > { %6166 = sst [smem:[#allocation22_spill]] %s4801_s13  ;;  %s4907_s17 = sadd.s32 4294967295, %s4813_s16   ;;  %s4813_s16 = sphi %s4892_s16, %s6267_s16   ;;  %s4809_s15 = sphi %s4890_s15, %s6271_s15   ;;  %s4805_s14 = sphi %s4888_s14, %s6270_s14   ;;  %s4801_s13 = sphi %s4886_s13, %s6269_s13  }
   0xc   : > { %s3720_s18 = sadd.s32 4294967294, %s4813_s16   ;;  %s4911_s19 = sadd.s32 1, %s4813_s16  }
   0xd   : > { %6167 = sst [smem:[#allocation23_spill]] %s4911_s19  ;;  %s36_s20 = sadd.s32 1, %s4809_s15 }
   0xe   : > { %s33_s21 = ssub.s32 %s4813_s16, %s4911_s19  ;;  %p43_p0 = scmp.ne.s32.totalorder %s4809_s15, %s4805_s14 }
   0xf   : > { %p34_p1 = scmp.eq.s32.totalorder %s33_s21, 0  ;;  %p44_p2 = scmp.eq.s32.totalorder %s4813_s16, 0 }
  0x10   : > { %p49_p3 = scmp.ne.s32.totalorder %s4805_s14, %s4801_s13  ;;  %p6122_p4 = scmp.eq.s32.totalorder %s4907_s17, 0 }
  0x11   : > { %s4923_s22 = scalar_select %p34_p1, %s4809_s15, %s36_s20  }
  0x12   : > { %p4925_p5 = por %p44_p2, %p43_p0  ;;  %p4931_p6 = por %p6122_p4, %p49_p3 }
  0x13   : > { %6168 = sst [smem:[#allocation24_spill]] %s4923_s22  ;;  %p262_p7 = scmp.eq.s32.totalorder %s4907_s17, 1 }
  0x14   : > { %p268_p8 = scmp.eq.s32.totalorder %s3720_s18, 1  ;;  %p3721_p9 = scmp.ge.s32.totalorder %s4813_s16, 1 }
  0x15   : > { %p275_p10 = scmp.lt.s32.totalorder %s4813_s16, 3  ;;  %p4938_p11 = por %p262_p7, %p43_p0 }
  0x16   : > { %p4942_p12 = por %p268_p8, %p49_p3  ;;  %s4815_s28 = smov [#allocation5]  }
  0x17   : > { %s6171_s25 = scalar_select %p4938_p11, 1, 0 }
  0x18   : > { %s6172_s26 = scalar_select %p4942_p12, 1, 0 }
  0x19   : > { %p4946_p13 = pnand %p3721_p9, %p275_p10  ;;  %s287_s29 = sshll.u32 %s4815_s28, 4  ;;  %s288_s29 = int_to_ptr.vmem [resolvable:$true] %s287_s29 }
  0x1a   : > { %6173 = sst [smem:[#allocation25_spill]] %s6172_s26  ;;  %s4816_s11 = smov [#allocation8]  }
  0x1b   : > { %p4345_p1 = pneg %p4946_p13  ;;  %s313_s12 = sshll.u32 %s4816_s11, 4  ;;  %s314_s12 = int_to_ptr.vmem [resolvable:$true] %s313_s12 }
  0x1c   : > { %s4618_s20 = scalar_lea.vmem %s288_s29, 2048  ;;  %p4626_p9 = scmp.lt.s32.totalorder %s288_s29, %s288_s29 }
  0x1d   : > { %p4954_p2 = pnand %p4345_p1, %p6122_p4  ;;  %p4619_p3 = scmp.ne.s32.totalorder %s288_s29, %s4618_s20 }
  0x1e   : > { %p4627_p10 = scmp.lt.s32.totalorder %s4618_s20, %s4618_s20 }
  0x1f   : > { %p4960_p0 = pneg %p4954_p2 }
  0x20   : > { %p4628_p1 = por %p4627_p10, %p4626_p9 }
  0x21   : > { %p4621_p7 = pnand %p4619_p3, %p4960_p0 }
  0x23   : > { %p4622_p8 = pneg %p4621_p7 }
  0x25   : > { %p4629_p4 = pnand %p4628_p1, %p4622_p8 }
  0x27   : > { %4632 = shalt.err (!%p4629_p4)
}
  0x28   : > { %s4817_s21 = smov 64   ;;  %s4818_s28 = smov 4  }
  0x29   : > { %s6177_s1 = sld [smem:[#allocation59_spill]]  ;;  %s4644_s19 = scalar_lea.vmem %s314_s12, 1024 }
  0x2a   : > { %p4645_p3 = scmp.ne.s32.totalorder %s314_s12, %s4644_s19  ;;  %p4652_p9 = scmp.lt.s32.totalorder %s314_s12, %s314_s12 }
  0x2b   : > { %p4653_p8 = scmp.lt.s32.totalorder %s4644_s19, %s4644_s19 }
  0x2c   : > { %p4647_p7 = pnand %p4645_p3, %p4960_p0 }
  0x2d   : > { %p4654_p4 = por %p4653_p8, %p4652_p9 }
  0x2e   : > { %p4648_p12 = pneg %p4647_p7 }
  0x2f   : > { %4348 = dma.hbm_to_vmem [thread:$0]  (!%p4954_p2), %s6177_s1, 2048, %s288_s29, [#allocation6], %s4817_s21, %s4817_s21, %s4818_s28  }
  0x30   : > { %p4655_p10 = pnand %p4654_p4, %p4648_p12 }
  0x32   : > { %4658 = shalt.err (!%p4655_p10)
}
  0x33   : > { %4354 = dma.hbm_to_vmem [thread:$0]  (!%p4954_p2), %s6114_s3, 1024, %s314_s12, [#allocation9], %s4817_s21, %s4817_s21, %s4818_s28  }
  0x34   : > { %s4819_s22 = smov [#allocation7]   ;;  %s4820_s11 = smov [#allocation10]  }
  0x35   : > { %s300_s29 = sshll.u32 %s4819_s22, 4  ;;  %s326_s1 = sshll.u32 %s4820_s11, 4  ;;  %s301_s29 = int_to_ptr.vmem [resolvable:$true] %s300_s29  ;;  %s327_s1 = int_to_ptr.vmem [resolvable:$true] %s326_s1 }
  0x36   : > { %s4670_s13 = scalar_lea.vmem %s301_s29, 2048  ;;  %p4678_p7 = scmp.lt.s32.totalorder %s301_s29, %s301_s29 }
  0x37   : > { %p4671_p1 = scmp.ne.s32.totalorder %s301_s29, %s4670_s13  ;;  %p4679_p9 = scmp.lt.s32.totalorder %s4670_s13, %s4670_s13 }
  0x39   : > { %p4673_p12 = pnand %p4671_p1, %p4960_p0  ;;  %p4680_p8 = por %p4679_p9, %p4678_p7 }
  0x3b   : > { %p4674_p3 = pneg %p4673_p12 }
  0x3d   : > { %p4681_p4 = pnand %p4680_p8, %p4674_p3 }
  0x3f   : > { %4684 = shalt.err (!%p4681_p4)
}
  0x40   : > { %s6178_s2 = sld [smem:[#allocation60_spill]]  ;;  %s4696_s12 = scalar_lea.vmem %s327_s1, 1024 }
  0x41   : > { %p4697_p10 = scmp.ne.s32.totalorder %s327_s1, %s4696_s12  ;;  %p4704_p11 = scmp.lt.s32.totalorder %s327_s1, %s327_s1 }
  0x42   : > { %p4705_p7 = scmp.lt.s32.totalorder %s4696_s12, %s4696_s12 }
  0x43   : > { %p4699_p1 = pnand %p4697_p10, %p4960_p0 }
  0x44   : > { %p4706_p3 = por %p4705_p7, %p4704_p11 }
  0x45   : > { %p4700_p12 = pneg %p4699_p1 }
  0x46   : > { %4351 = dma.hbm_to_vmem [thread:$0]  (!%p4954_p2), %s6178_s2, 2048, %s301_s29, [#allocation6], %s4817_s21, %s4817_s21, %s4818_s28  }
  0x47   : > { %p4707_p9 = pnand %p4706_p3, %p4700_p12 }
  0x49   : > { %4710 = shalt.err (!%p4707_p9)
}
  0x4a   : > { %4357 = dma.hbm_to_vmem [thread:$0]  (!%p4954_p2), %s6115_s4, 1024, %s327_s1, [#allocation9], %s4817_s21, %s4817_s21, %s4818_s28  }
  0x4b   : > { %s4821_s22 = smov [#allocation11]  }
  0x4c   : > { %s339_s29 = sshll.u32 %s4821_s22, 4  ;;  %s340_s29 = int_to_ptr.vmem [resolvable:$true] %s339_s29 }
  0x4d   : > { %s4722_s11 = scalar_lea.vmem %s340_s29, 1024  ;;  %p4730_p10 = scmp.lt.s32.totalorder %s340_s29, %s340_s29 }
  0x4e   : > { %p4723_p8 = scmp.ne.s32.totalorder %s340_s29, %s4722_s11  ;;  %p4731_p1 = scmp.lt.s32.totalorder %s4722_s11, %s4722_s11 }
  0x50   : > { %p4725_p4 = pnand %p4723_p8, %p4960_p0  ;;  %p4732_p12 = por %p4731_p1, %p4730_p10 }
  0x52   : > { %p4726_p11 = pneg %p4725_p4 }
  0x54   : > { %p4733_p7 = pnand %p4732_p12, %p4726_p11 }
  0x56   : > { %4736 = shalt.err (!%p4733_p7)
}
  0x57   : > { %4360 = dma.hbm_to_vmem [thread:$0]  (!%p4954_p2), %s6116_s5, 1024, %s340_s29, [#allocation12], %s4817_s21, %s4817_s21, %s4818_s28  }
  0x58   : > { %p3727_p3 = scmp.ge.s32.totalorder %s4813_s16, 2 }
  0x5a   : > { %361 = sbr.rel (%p3727_p3) target bundleno = 108 (0x6c), region = 52 }
  0x5f   : > { %s365_s18 = sand.u32 1, %s4809_s15   ;;  %s3936_s26 = sshll.u32 %s4813_s16, 10 }
  0x60   : > { %s3728_s30 = sshll.u32 %s365_s18, 9  ;;  %s376_s28 = scalar_lea.hbm %s6111_s0, %s3936_s26 }
  0x61   : > { %s4324_s12 = scalar_select %p4925_p5, [#allocation0], [#allocation16] }
  0x62   : > { %s369_s22 = scalar_lea.vmem [#allocation2], %s3728_s30  ;;  %s4822_s11 = smov 2048  }
  0x63   : > { %s381_s20 = sld [smem:[%s4324_s12]]   ;;  %s389_s29 = sshll.u32 %s369_s22, 4  ;;  %s390_s29 = int_to_ptr.vmem [resolvable:$true] %s389_s29 }
  0x64   : > { %4325 = sst [smem:[#allocation15]] (%p4925_p5), %s4822_s11  ;;  %s4823_s19 = smov 1024  }
  0x65   : > { %4326 = sst [smem:[#allocation15 + $0x1]] (%p4925_p5), %s4823_s19  ;;  %s4824_s1 = smov 8  }
  0x66   : > { %4327 = sst [smem:[#allocation15 + $0x2]] (%p4925_p5), %s4824_s1  ;;  %s4825_s2 = smov 128  }
  0x67   : > { %4328 = sst [smem:[#allocation15 + $0x3]] (%p4925_p5), %s4825_s2  ;;  %s366_s12 = scalar_lea.sflag [#allocation3], %s365_s18 }
  0x68   : > { %4329 = sst [smem:[#allocation15 + $0x4]] (%p4925_p5), %s4825_s2  ;;  %s4826_s13 = smov 131072  }
  0x69   : > { %s3732_s26 = sshll.u32 %s381_s20, 26  ;;  %4330 = sst [smem:[#allocation15 + $0x5]] (%p4925_p5), %s4824_s1 }
  0x6a   : > { %s3733_s30 = sadd.s32 134217728, %s3732_s26 }
  0x6b   : > { %4331 = dma.general (%p4925_p5), %s376_s28, 8192, %s390_s29, %s366_s12, %s4826_s13, [#allocation15], %s3733_s30, 0  }
  0x6c PF: > { %414 = sbr.rel (%p4946_p13) target bundleno = 1527 (0x5f7), region = 60 }
  0x71   : > { %s5041_s21 = sand.u32 1, %s4805_s14  }
  0x72   : > { %s3735_s22 = sshll.u32 %s5041_s21, 9  ;;  %s417_s2 = scalar_lea.sflag [#allocation3], %s5041_s21 }
  0x73   : > { %s5045_s20 = scalar_lea.vmem [#allocation2], %s3735_s22 }
  0x74   : > { %4780 = dma.done.wait (%p4931_p6), %s417_s2, 8192  }
  0x75   : > { %4782 = vsyncadd (%p4931_p6), %s417_s2, 4294959104  ;;  %p6179_p5 = scmp.eq.s32.totalorder %s4907_s17, 0 }
  0x77   : > { %4784 = dma.done.wait (%p6179_p5), [#allocation6], 4096   ;;  %p6180_p13 = pmov %p6179_p5 }
  0x78   : > { %p6181_p2 = pmov %p6179_p5 }
  0x79   : > { %4786 = vsyncadd (%p6180_p13), [#allocation6], 4294963200 }
  0x7a   : > { %4788 = dma.done.wait (%p6181_p2), [#allocation9], 2048   ;;  %p6182_p0 = pmov %p6181_p2 }
  0x7c   : > { %4790 = vsyncadd (%p6182_p0), [#allocation9], 4294965248  ;;  %p6183_p9 = pmov %p6182_p0 }
  0x7d   : > { %p6184_p8 = pmov %p6182_p0 }
  0x7e   : > { %4792 = dma.done.wait (%p6183_p9), [#allocation12], 1024  }
  0x7f   : > { %4794 = vsyncadd (%p6184_p8), [#allocation12], 4294966272  ;;  %v4827_v0 = vmov 0   ;;  %v4423_v1 = vld [vmem:[#allocation5 + $0x38] sm:$0xff]   ;;  %v4424_v2 = vld [vmem:[#allocation5 + $0x30] sm:$0xff]   ;;  %s3741_s1 = sshll.u32 %s5041_s21, 6 }
  0x80   : > { %1063 = vmatprep.subr.bf16.mxu0 %v4827_v0  ;;  %v4425_v3 = vld [vmem:[#allocation5 + $0x28] sm:$0xff]   ;;  %v4426_v4 = vld [vmem:[#allocation5 + $0x20] sm:$0xff]   ;;  %v4427_v5 = vld [vmem:[#allocation5 + $0x18] sm:$0xff]   ;;  %s5994_s26 = scalar_lea.vmem [#allocation13], %s3741_s1  ;;  %s3937_s30 = sshll.u32 %s4907_s17, 10 }
  0x81   : > { %1064 = vmatpush1.bf16.msra.mxu0 %v4423_v1  ;;  %v480_v6 = vld [vmem:[%s5045_s20] sm:$0xff]  ;;  %v481_v7 = vld [vmem:[%s5045_s20 + $0x8] sm:$0xff]  ;;  %v4428_v10 = vld [vmem:[#allocation5 + $0x10] sm:$0xff]   ;;  %s3599_s12 = sshll.u32 %s5994_s26, 4  ;;  %s6064_s2 = scalar_lea.hbm %s6121_s10, %s3937_s30  ;;  %s6066_s12 = int_to_ptr.vmem [resolvable:$true] %s3599_s12 }
  0x82   : > { %1065 = vmatprep.subr.bf16.mxu0 %v4827_v0  ;;  %v544_v8 = vmax.bf16 %v4827_v0, %v480_v6  ;;  %v545_v9 = vmax.bf16 %v4827_v0, %v481_v7  ;;  %v4429_v12 = vld [vmem:[#allocation5 + $0x8] sm:$0xff]   ;;  %v4430_v13 = vld [vmem:[#allocation5] sm:$0xff]   ;;  %v4431_v14 = vld [vmem:[#allocation5 + $0x78] sm:$0xff]   ;;  %s3586_s17 = scalar_lea.sflag [#allocation4], %s5041_s21  ;;  %p6263_p4 = scmp.ne.s32.totalorder %s6171_s25, 0 }
  0x83   : > { %v4432_v15 = vld [vmem:[#allocation5 + $0x70] sm:$0xff]   ;;  %v4433_v16 = vld [vmem:[#allocation5 + $0x68] sm:$0xff]   ;;  %v4434_v17 = vld [vmem:[#allocation5 + $0x60] sm:$0xff]   ;;  %s4828_s23 = smov [#allocation13]  }
  0x84   : > { %v3744_v11 = vcombine.high %v544_v8, %v545_v9  ;;  %v4435_v18 = vld [vmem:[#allocation5 + $0x58] sm:$0xff]   ;;  %v4436_v19 = vld [vmem:[#allocation5 + $0x50] sm:$0xff]   ;;  %v4437_v20 = vld [vmem:[#allocation5 + $0x48] sm:$0xff]   ;;  %v3743_v26 = vcombine.low %v544_v8, %v545_v9  ;;  %s4741_s24 = sshll.u32 %s4828_s23, 4  ;;  %s4742_s24 = int_to_ptr.vmem [resolvable:$false] %s4741_s24 }
  0x85   : > { %1066 = vmatpush1.bf16.msra.mxu0 %v4424_v2  ;;  %v482_v21 = vld [vmem:[%s5045_s20 + $0x10] sm:$0xff]  ;;  %v483_v22 = vld [vmem:[%s5045_s20 + $0x18] sm:$0xff]  ;;  %v4438_v23 = vld [vmem:[#allocation5 + $0x40] sm:$0xff]   ;;  %s4743_s27 = scalar_lea.vmem %s4742_s24, 2048  ;;  %p4744_p1 = scmp.lt.s32.totalorder %s6066_s12, %s4742_s24 }
  0x86   : > { %1067 = vmatprep.subr.bf16.mxu0 %v4827_v0  ;;  %1095 = vmatprep.mubr.bf16.mxu0 %v3744_v11  ;;  %v546_v24 = vmax.bf16 %v4827_v0, %v482_v21  ;;  %v547_v25 = vmax.bf16 %v4827_v0, %v483_v22  ;;  %v484_v28 = vld [vmem:[%s5045_s20 + $0x20] sm:$0xff]  ;;  %v485_v29 = vld [vmem:[%s5045_s20 + $0x28] sm:$0xff]  ;;  %v486_v34 = vld [vmem:[%s5045_s20 + $0x30] sm:$0xff] }
  0x87   : > { %v548_v30 = vmax.bf16 %v4827_v0, %v484_v28  ;;  %v549_v31 = vmax.bf16 %v4827_v0, %v485_v29  ;;  %v487_v35 = vld [vmem:[%s5045_s20 + $0x38] sm:$0xff]  ;;  %v550_v36 = vmax.bf16 %v4827_v0, %v486_v34  ;;  %v488_v40 = vld [vmem:[%s5045_s20 + $0x40] sm:$0xff]  ;;  %v489_v41 = vld [vmem:[%s5045_s20 + $0x48] sm:$0xff] }
  0x88   : > { %v3746_v27 = vcombine.high %v546_v24, %v547_v25  ;;  %v3745_v32 = vcombine.low %v546_v24, %v547_v25  ;;  %v551_v37 = vmax.bf16 %v4827_v0, %v487_v35  ;;  %v552_v42 = vmax.bf16 %v4827_v0, %v488_v40  ;;  %v490_v46 = vld [vmem:[%s5045_s20 + $0x50] sm:$0xff]  ;;  %v491_v47 = vld [vmem:[%s5045_s20 + $0x58] sm:$0xff]  ;;  %v492_v52 = vld [vmem:[%s5045_s20 + $0x60] sm:$0xff] }
  0x89   : > { %1068 = vmatpush1.bf16.msra.mxu0 %v4425_v3  ;;  %v3748_v33 = vcombine.high %v548_v30, %v549_v31  ;;  %v3747_v38 = vcombine.low %v548_v30, %v549_v31  ;;  %v553_v43 = vmax.bf16 %v4827_v0, %v489_v41  ;;  %v554_v48 = vmax.bf16 %v4827_v0, %v490_v46  ;;  %v493_v53 = vld [vmem:[%s5045_s20 + $0x68] sm:$0xff]  ;;  %v494_v58 = vld [vmem:[%s5045_s20 + $0x70] sm:$0xff]  ;;  %v495_v59 = vld [vmem:[%s5045_s20 + $0x78] sm:$0xff] }
  0x8a   : > { %1069 = vmatprep.subr.bf16.mxu0 %v4827_v0  ;;  %v3750_v39 = vcombine.high %v550_v36, %v551_v37  ;;  %v3749_v44 = vcombine.low %v550_v36, %v551_v37  ;;  %v555_v49 = vmax.bf16 %v4827_v0, %v491_v47  ;;  %v556_v54 = vmax.bf16 %v4827_v0, %v492_v52  ;;  %v496_v1 = vld [vmem:[%s5045_s20 + $0x80] sm:$0xff]  ;;  %v497_v2 = vld [vmem:[%s5045_s20 + $0x88] sm:$0xff]  ;;  %v498_v7 = vld [vmem:[%s5045_s20 + $0x90] sm:$0xff] }
  0x8b   : > { %v3752_v45 = vcombine.high %v552_v42, %v553_v43  ;;  %v3751_v50 = vcombine.low %v552_v42, %v553_v43  ;;  %v557_v55 = vmax.bf16 %v4827_v0, %v493_v53  ;;  %v558_v60 = vmax.bf16 %v4827_v0, %v494_v58  ;;  %v499_v8 = vld [vmem:[%s5045_s20 + $0x98] sm:$0xff]  ;;  %v504_v25 = vld [vmem:[%s5045_s20 + $0xc0] sm:$0xff]  ;;  %v506_v31 = vld [vmem:[%s5045_s20 + $0xd0] sm:$0xff] }
  0x8c   : > { %v3754_v51 = vcombine.high %v554_v48, %v555_v49  ;;  %v3753_v56 = vcombine.low %v554_v48, %v555_v49  ;;  %v559_v61 = vmax.bf16 %v4827_v0, %v495_v59  ;;  %v560_v3 = vmax.bf16 %v4827_v0, %v496_v1  ;;  %v508_v37 = vld [vmem:[%s5045_s20 + $0xe0] sm:$0xff]  ;;  %v4441_v42 = vld [vmem:[#allocation8 + $0x30] sm:$0xff]   ;;  %v511_v46 = vld [vmem:[%s5045_s20 + $0xf8] sm:$0xff] }
  0x8d   : > { %1070 = vmatpush1.bf16.msra.mxu0 %v4426_v4  ;;  %v3756_v57 = vcombine.high %v556_v54, %v557_v55  ;;  %v3755_v62 = vcombine.low %v556_v54, %v557_v55  ;;  %v561_v4 = vmax.bf16 %v4827_v0, %v497_v2  ;;  %v562_v9 = vmax.bf16 %v4827_v0, %v498_v7  ;;  %v4442_v47 = vld [vmem:[#allocation8 + $0x28] sm:$0xff]   ;;  %v512_v53 = vld [vmem:[%s5045_s20 + $0x100] sm:$0xff]  ;;  %v4444_v55 = vld [vmem:[#allocation8 + $0x18] sm:$0xff]  }
  0x8e   : > { %1071 = vmatprep.subr.bf16.mxu0 %v4827_v0  ;;  %v3758_v63 = vcombine.high %v558_v60, %v559_v61  ;;  %v572_v40 = vmax.bf16 %v4827_v0, %v508_v37  ;;  %v575_v49 = vmax.bf16 %v4827_v0, %v511_v46  ;;  %v513_v54 = vld [vmem:[%s5045_s20 + $0x108] sm:$0xff]  ;;  %v4445_v58 = vld [vmem:[#allocation8 + $0x10] sm:$0xff]   ;;  %v527_v37 = vld [vmem:[%s5045_s20 + $0x178] sm:$0xff] }
  0x8f   : > { %v3760_v6 = vcombine.high %v560_v3, %v561_v4  ;;  %v3759_v11 = vcombine.low %v560_v3, %v561_v4  ;;  %v4447_v3 = vld [vmem:[#allocation8] sm:$0xff]   ;;  %v517_v7 = vld [vmem:[%s5045_s20 + $0x128] sm:$0xff] }
  0x91   : > { %1072 = vmatpush1.bf16.msra.mxu0 %v4427_v5  ;;  %v3757_v5 = vcombine.low %v558_v60, %v559_v61  ;;  %v514_v61 = vld [vmem:[%s5045_s20 + $0x110] sm:$0xff] }
  0x92   : > { %1073 = vmatprep.subr.bf16.mxu0 %v4827_v0  ;;  %v578_v1 = vmax.bf16 %v4827_v0, %v514_v61 }
  0x95   : > { %1074 = vmatpush1.bf16.msra.mxu0 %v4428_v10  ;;  %v563_v10 = vmax.bf16 %v4827_v0, %v499_v8 }
  0x96   : > { %1075 = vmatprep.subr.bf16.mxu0 %v4827_v0 }
  0x99   : > { %1076 = vmatpush1.bf16.msra.mxu0 %v4429_v12  ;;  %v3762_v12 = vcombine.high %v562_v9, %v563_v10 }
  0x9a   : > { %1077 = vmatprep.subr.bf16.mxu0 %v4827_v0 }
  0x9d   : > { %1078 = vmatpush1.bf16.msra.mxu0 %v4430_v13  ;;  %v500_v13 = vld [vmem:[%s5045_s20 + $0xa0] sm:$0xff] }
  0x9e   : > { %1079 = vmatprep.subr.bf16.mxu0 %v4827_v0 }
  0xa1   : > { %1080 = vmatpush2.bf16.msra.mxu0 %v4431_v14  ;;  %v501_v14 = vld [vmem:[%s5045_s20 + $0xa8] sm:$0xff] }
  0xa2   : > { %1081 = vmatprep.subr.bf16.mxu0 %v4827_v0 }
  0xa5   : > { %1082 = vmatpush2.bf16.msra.mxu0 %v4432_v15  ;;  %v564_v15 = vmax.bf16 %v4827_v0, %v500_v13  ;;  %v519_v13 = vld [vmem:[%s5045_s20 + $0x138] sm:$0xff] }
  0xa6   : > { %1083 = vmatprep.subr.bf16.mxu0 %v4827_v0 }
  0xa9   : > { %1084 = vmatpush2.bf16.msra.mxu0 %v4433_v16  ;;  %v565_v16 = vmax.bf16 %v4827_v0, %v501_v14 }
  0xaa   : > { %1085 = vmatprep.subr.bf16.mxu0 %v4827_v0 }
  0xad   : > { %1086 = vmatpush2.bf16.msra.mxu0 %v4434_v17  ;;  %v3761_v17 = vcombine.low %v562_v9, %v563_v10  ;;  %v581_v9 = vmax.bf16 %v4827_v0, %v517_v7 }
  0xae   : > { %1087 = vmatprep.subr.bf16.mxu0 %v4827_v0 }
  0xb1   : > { %1088 = vmatpush2.bf16.msra.mxu0 %v4435_v18  ;;  %v3764_v18 = vcombine.high %v564_v15, %v565_v16 }
  0xb2   : > { %1089 = vmatprep.subr.bf16.mxu0 %v4827_v0 }
  0xb5   : > { %1090 = vmatpush2.bf16.msra.mxu0 %v4436_v19  ;;  %v502_v19 = vld [vmem:[%s5045_s20 + $0xb0] sm:$0xff] }
  0xb6   : > { %1091 = vmatprep.subr.bf16.mxu0 %v4827_v0  ;;  %v566_v21 = vmax.bf16 %v4827_v0, %v502_v19  ;;  %v521_v19 = vld [vmem:[%s5045_s20 + $0x148] sm:$0xff] }
  0xb9   : > { %1092 = vmatpush2.bf16.msra.mxu0 %v4437_v20  ;;  %v503_v20 = vld [vmem:[%s5045_s20 + $0xb8] sm:$0xff] }
  0xba   : > { %1093 = vmatprep.subr.bf16.mxu0 %v4827_v0  ;;  %v567_v22 = vmax.bf16 %v4827_v0, %v503_v20 }
  0xbc   : > { %v3766_v24 = vcombine.high %v566_v21, %v567_v22  ;;  %v3765_v29 = vcombine.low %v566_v21, %v567_v22  ;;  %v585_v21 = vmax.bf16 %v4827_v0, %v521_v19 }
  0xbd   : > { %1094 = vmatpush2.bf16.msra.mxu0 %v4438_v23  ;;  %v3763_v23 = vcombine.low %v564_v15, %v565_v16  ;;  %v583_v15 = vmax.bf16 %v4827_v0, %v519_v13 }
  0xc0   : > { %1096 = vmatmul.mubr.bf16.vlgmr.msra.gmra.mxu0 %v3743_v26  ;;  %v505_v26 = vld [vmem:[%s5045_s20 + $0xc8] sm:$0xff] }
  0xc1   : > { %1103 = vmatprep.mubr.bf16.mxu0 %v3746_v27  ;;  %v568_v27 = vmax.bf16 %v4827_v0, %v504_v25  ;;  %v569_v28 = vmax.bf16 %v4827_v0, %v505_v26  ;;  %v523_v25 = vld [vmem:[%s5045_s20 + $0x158] sm:$0xff] }
  0xc3   : > { %v3768_v30 = vcombine.high %v568_v27, %v569_v28  ;;  %v3767_v35 = vcombine.low %v568_v27, %v569_v28  ;;  %v587_v27 = vmax.bf16 %v4827_v0, %v523_v25 }
  0xc8   : > { %1104 = vmatmul.mubr.bf16.gmra.mxu0 %v3745_v32  ;;  %v507_v32 = vld [vmem:[%s5045_s20 + $0xd8] sm:$0xff] }
  0xc9   : > { %1111 = vmatprep.mubr.bf16.mxu0 %v3748_v33  ;;  %v570_v33 = vmax.bf16 %v4827_v0, %v506_v31  ;;  %v571_v34 = vmax.bf16 %v4827_v0, %v507_v32  ;;  %v525_v31 = vld [vmem:[%s5045_s20 + $0x168] sm:$0xff] }
  0xcb   : > { %v3770_v36 = vcombine.high %v570_v33, %v571_v34  ;;  %v3769_v43 = vcombine.low %v570_v33, %v571_v34  ;;  %v589_v33 = vmax.bf16 %v4827_v0, %v525_v31  ;;  %v540_v31 = vld [vmem:[%s5045_s20 + $0x1e0] sm:$0xff] }
  0xd0   : > { %1112 = vmatmul.mubr.bf16.gmra.mxu0 %v3747_v38  ;;  %v509_v38 = vld [vmem:[%s5045_s20 + $0xe8] sm:$0xff] }
  0xd1   : > { %1119 = vmatprep.mubr.bf16.mxu0 %v3750_v39  ;;  %v4440_v39 = vld [vmem:[#allocation8 + $0x38] sm:$0xff]   ;;  %v573_v41 = vmax.bf16 %v4827_v0, %v509_v38 }
  0xd2   : > { %4058 = vmatprep.subr.bf16.mxu0 %v4440_v39  ;;  %4298 = vmatprep.subr.bf16.mxu1 %v4440_v39 }
  0xd3   : > { %4059 = vmatpush3.bf16.msra.mxu0 %v4440_v39  ;;  %4306 = vmatpush3.bf16.msra.mxu1 %v4440_v39  ;;  %v591_v39 = vmax.bf16 %v4827_v0, %v527_v37 }
  0xd4   : > { %4060 = vmatprep.subr.bf16.mxu0 %v4441_v42  ;;  %4299 = vmatprep.subr.bf16.mxu1 %v4441_v42 }
  0xd7   : > { %4061 = vmatpush3.bf16.msra.mxu0 %v4441_v42  ;;  %4307 = vmatpush3.bf16.msra.mxu1 %v4441_v42  ;;  %v528_v42 = vld [vmem:[%s5045_s20 + $0x180] sm:$0xff] }
  0xd8   : > { %1120 = vmatmul.mubr.bf16.gmra.mxu0 %v3749_v44  ;;  %v3772_v44 = vcombine.high %v572_v40, %v573_v41  ;;  %4062 = vmatprep.subr.bf16.mxu0 %v4442_v47 }
  0xd9   : > { %1127 = vmatprep.mubr.bf16.mxu0 %v3752_v45  ;;  %v510_v45 = vld [vmem:[%s5045_s20 + $0xf0] sm:$0xff]  ;;  %4300 = vmatprep.subr.bf16.mxu1 %v4442_v47 }
  0xda   : > { %v574_v48 = vmax.bf16 %v4827_v0, %v510_v45 }
  0xdb   : > { %4063 = vmatpush3.bf16.msra.mxu0 %v4442_v47  ;;  %4308 = vmatpush3.bf16.msra.mxu1 %v4442_v47 }
  0xdc   : > { %v3774_v52 = vcombine.high %v574_v48, %v575_v49  ;;  %v3773_v59 = vcombine.low %v574_v48, %v575_v49  ;;  %v530_v48 = vld [vmem:[%s5045_s20 + $0x190] sm:$0xff]  ;;  %v531_v49 = vld [vmem:[%s5045_s20 + $0x198] sm:$0xff] }
  0xe0   : > { %1128 = vmatmul.mubr.bf16.gmra.mxu0 %v3751_v50  ;;  %v4443_v50 = vld [vmem:[#allocation8 + $0x20] sm:$0xff]  }
  0xe1   : > { %1135 = vmatprep.mubr.bf16.mxu0 %v3754_v51  ;;  %v3771_v51 = vcombine.low %v572_v40, %v573_v41  ;;  %4064 = vmatprep.subr.bf16.mxu0 %v4443_v50 }
  0xe2   : > { %4301 = vmatprep.subr.bf16.mxu1 %v4443_v50  ;;  %4065 = vmatpush3.bf16.msra.mxu0 %v4443_v50 }
  0xe3   : > { %4309 = vmatpush3.bf16.msra.mxu1 %v4443_v50  ;;  %4066 = vmatprep.subr.bf16.mxu0 %v4444_v55  ;;  %v594_v50 = vmax.bf16 %v4827_v0, %v530_v48 }
  0xe4   : > { %4302 = vmatprep.subr.bf16.mxu1 %v4444_v55 }
  0xe6   : > { %4067 = vmatpush3.bf16.msra.mxu0 %v4444_v55 }
  0xe7   : > { %4310 = vmatpush3.bf16.msra.mxu1 %v4444_v55  ;;  %4068 = vmatprep.subr.bf16.mxu0 %v4445_v58  ;;  %v533_v55 = vld [vmem:[%s5045_s20 + $0x1a8] sm:$0xff] }
  0xe8   : > { %1136 = vmatmul.mubr.bf16.gmra.mxu0 %v3753_v56  ;;  %v576_v56 = vmax.bf16 %v4827_v0, %v512_v53  ;;  %4303 = vmatprep.subr.bf16.mxu1 %v4445_v58 }
  0xe9   : > { %1143 = vmatprep.mubr.bf16.mxu0 %v3756_v57  ;;  %v577_v57 = vmax.bf16 %v4827_v0, %v513_v54  ;;  %v532_v54 = vld [vmem:[%s5045_s20 + $0x1a0] sm:$0xff] }
  0xea   : > { %4069 = vmatpush3.bf16.msra.mxu0 %v4445_v58 }
  0xeb   : > { %v3776_v60 = vcombine.high %v576_v56, %v577_v57  ;;  %4311 = vmatpush3.bf16.msra.mxu1 %v4445_v58  ;;  %v3775_v4 = vcombine.low %v576_v56, %v577_v57  ;;  %v596_v57 = vmax.bf16 %v4827_v0, %v532_v54  ;;  %v597_v58 = vmax.bf16 %v4827_v0, %v533_v55 }
  0xf0   : > { %1144 = vmatmul.mubr.bf16.gmra.mxu0 %v3755_v62  ;;  %v515_v62 = vld [vmem:[%s5045_s20 + $0x118] sm:$0xff] }
  0xf1   : > { %1151 = vmatprep.mubr.bf16.mxu0 %v3758_v63  ;;  %v4446_v63 = vld [vmem:[#allocation8 + $0x8] sm:$0xff]   ;;  %v579_v2 = vmax.bf16 %v4827_v0, %v515_v62  ;;  %v3796_v62 = vcombine.high %v596_v57, %v597_v58 }
  0xf2   : > { %4070 = vmatprep.subr.bf16.mxu0 %v4446_v63  ;;  %4304 = vmatprep.subr.bf16.mxu1 %v4446_v63 }
  0xf3   : > { %4071 = vmatpush3.bf16.msra.mxu0 %v4446_v63  ;;  %4312 = vmatpush3.bf16.msra.mxu1 %v4446_v63  ;;  %v3777_v10 = vcombine.low %v578_v1, %v579_v2 }
  0xf4   : > { %4072 = vmatprep.subr.bf16.mxu0 %v4447_v3  ;;  %4305 = vmatprep.subr.bf16.mxu1 %v4447_v3 }
  0xf7   : > { %4073 = vmatpush3.bf16.msra.mxu0 %v4447_v3  ;;  %4313 = vmatpush3.bf16.msra.mxu1 %v4447_v3 }
  0xf8   : > { %1152 = vmatmul.mubr.bf16.gmra.mxu0 %v3757_v5  ;;  %v3778_v5 = vcombine.high %v578_v1, %v579_v2  ;;  %2256 = vmatprep.subr.bf16.mxu1 %v4827_v0  ;;  %v534_v1 = vld [vmem:[%s5045_s20 + $0x1b0] sm:$0xff]  ;;  %v535_v2 = vld [vmem:[%s5045_s20 + $0x1b8] sm:$0xff] }
  0xf9   : > { %1159 = vmatprep.mubr.bf16.mxu0 %v3760_v6  ;;  %v516_v6 = vld [vmem:[%s5045_s20 + $0x120] sm:$0xff] }
  0xfa   : > { %v580_v8 = vmax.bf16 %v4827_v0, %v516_v6 }
  0xfc   : > { %v3779_v16 = vcombine.low %v580_v8, %v581_v9 }
 0x100   : > { %1160 = vmatmul.mubr.bf16.gmra.mxu0 %v3759_v11  ;;  %v3780_v11 = vcombine.high %v580_v8, %v581_v9  ;;  %v3795_v8 = vcombine.low %v596_v57, %v597_v58 }
 0x101   : > { %1167 = vmatprep.mubr.bf16.mxu0 %v3762_v12  ;;  %v518_v12 = vld [vmem:[%s5045_s20 + $0x130] sm:$0xff] }
 0x102   : > { %v582_v14 = vmax.bf16 %v4827_v0, %v518_v12  ;;  %v537_v12 = vld [vmem:[%s5045_s20 + $0x1c8] sm:$0xff] }
 0x104   : > { %v3781_v22 = vcombine.low %v582_v14, %v583_v15 }
 0x108   : > { %1168 = vmatmul.mubr.bf16.gmra.mxu0 %v3761_v17  ;;  %v3782_v17 = vcombine.high %v582_v14, %v583_v15  ;;  %v601_v15 = vmax.bf16 %v4827_v0, %v537_v12 }
 0x109   : > { %1175 = vmatprep.mubr.bf16.mxu0 %v3764_v18  ;;  %v520_v18 = vld [vmem:[%s5045_s20 + $0x140] sm:$0xff] }
 0x10a   : > { %v584_v20 = vmax.bf16 %v4827_v0, %v520_v18 }
 0x10c   : > { %v3783_v28 = vcombine.low %v584_v20, %v585_v21 }
 0x110   : > { %1176 = vmatmul.mubr.bf16.gmra.mxu0 %v3763_v23  ;;  %v3784_v23 = vcombine.high %v584_v20, %v585_v21  ;;  %v538_v21 = vld [vmem:[%s5045_s20 + $0x1d0] sm:$0xff] }
 0x111   : > { %1183 = vmatprep.mubr.bf16.mxu0 %v3766_v24  ;;  %v522_v24 = vld [vmem:[%s5045_s20 + $0x150] sm:$0xff] }
 0x112   : > { %v586_v26 = vmax.bf16 %v4827_v0, %v522_v24  ;;  %v602_v24 = vmax.bf16 %v4827_v0, %v538_v21 }
 0x114   : > { %v3785_v34 = vcombine.low %v586_v26, %v587_v27 }
 0x118   : > { %1184 = vmatmul.mubr.bf16.gmra.mxu0 %v3765_v29  ;;  %v3786_v29 = vcombine.high %v586_v26, %v587_v27 }
 0x119   : > { %1191 = vmatprep.mubr.bf16.mxu0 %v3768_v30  ;;  %v524_v30 = vld [vmem:[%s5045_s20 + $0x160] sm:$0xff] }
 0x11a   : > { %v588_v32 = vmax.bf16 %v4827_v0, %v524_v30 }
 0x11c   : > { %v3787_v40 = vcombine.low %v588_v32, %v589_v33 }
 0x120   : > { %1192 = vmatmul.mubr.bf16.gmra.mxu0 %v3767_v35  ;;  %v3788_v35 = vcombine.high %v588_v32, %v589_v33  ;;  %v541_v32 = vld [vmem:[%s5045_s20 + $0x1e8] sm:$0xff] }
 0x121   : > { %1199 = vmatprep.mubr.bf16.mxu0 %v3770_v36  ;;  %v526_v36 = vld [vmem:[%s5045_s20 + $0x170] sm:$0xff] }
 0x122   : > { %v590_v38 = vmax.bf16 %v4827_v0, %v526_v36 }
 0x124   : > { %v3790_v41 = vcombine.high %v590_v38, %v591_v39  ;;  %v3789_v46 = vcombine.low %v590_v38, %v591_v39 }
 0x128   : > { %1200 = vmatmul.mubr.bf16.gmra.mxu0 %v3769_v43  ;;  %v529_v43 = vld [vmem:[%s5045_s20 + $0x188] sm:$0xff] }
 0x129   : > { %1207 = vmatprep.mubr.bf16.mxu0 %v3772_v44  ;;  %v592_v44 = vmax.bf16 %v4827_v0, %v528_v42  ;;  %v593_v45 = vmax.bf16 %v4827_v0, %v529_v43  ;;  %v543_v42 = vld [vmem:[%s5045_s20 + $0x1f8] sm:$0xff] }
 0x12b   : > { %v3792_v47 = vcombine.high %v592_v44, %v593_v45 }
 0x130   : > { %1208 = vmatmul.mubr.bf16.gmra.mxu0 %v3771_v51  ;;  %v595_v51 = vmax.bf16 %v4827_v0, %v531_v49 }
 0x131   : > { %1215 = vmatprep.mubr.bf16.mxu0 %v3774_v52  ;;  %v3791_v52 = vcombine.low %v592_v44, %v593_v45  ;;  %v607_v45 = vmax.bf16 %v4827_v0, %v543_v42 }
 0x132   : > { %v3794_v53 = vcombine.high %v594_v50, %v595_v51  ;;  %v3793_v61 = vcombine.low %v594_v50, %v595_v51  ;;  %v5223_v50 = vld [vmem:[%s6117_s6] ss:$0 sm:$0xff] }
 0x138   : > { %1216 = vmatmul.mubr.bf16.gmra.mxu0 %v3773_v59 }
 0x139   : > { %1223 = vmatprep.mubr.bf16.mxu0 %v3776_v60 }
 0x140   : > { %1224 = vmatmul.mubr.bf16.gmra.mxu0 %v3775_v4  ;;  %v598_v4 = vmax.bf16 %v4827_v0, %v534_v1 }
 0x141   : > { %1231 = vmatprep.mubr.bf16.mxu0 %v3778_v5  ;;  %v599_v5 = vmax.bf16 %v4827_v0, %v535_v2 }
 0x143   : > { %v3798_v9 = vcombine.high %v598_v4, %v599_v5  ;;  %v3797_v18 = vcombine.low %v598_v4, %v599_v5 }
 0x148   : > { %1232 = vmatmul.mubr.bf16.gmra.mxu0 %v3777_v10 }
 0x149   : > { %1239 = vmatprep.mubr.bf16.mxu0 %v3780_v11  ;;  %v536_v11 = vld [vmem:[%s5045_s20 + $0x1c0] sm:$0xff] }
 0x14a   : > { %v600_v14 = vmax.bf16 %v4827_v0, %v536_v11 }
 0x14c   : > { %v3800_v19 = vcombine.high %v600_v14, %v601_v15 }
 0x150   : > { %1240 = vmatmul.mubr.bf16.gmra.mxu0 %v3779_v16 }
 0x151   : > { %1247 = vmatprep.mubr.bf16.mxu0 %v3782_v17 }
 0x158   : > { %1248 = vmatmul.mubr.bf16.gmra.mxu0 %v3781_v22  ;;  %v539_v22 = vld [vmem:[%s5045_s20 + $0x1d8] sm:$0xff] }
 0x159   : > { %1255 = vmatprep.mubr.bf16.mxu0 %v3784_v23  ;;  %v603_v25 = vmax.bf16 %v4827_v0, %v539_v22 }
 0x15b   : > { %v3801_v38 = vcombine.low %v602_v24, %v603_v25 }
 0x160   : > { %1256 = vmatmul.mubr.bf16.gmra.mxu0 %v3783_v28  ;;  %v3799_v28 = vcombine.low %v600_v14, %v601_v15 }
 0x161   : > { %1263 = vmatprep.mubr.bf16.mxu0 %v3786_v29  ;;  %v3802_v29 = vcombine.high %v602_v24, %v603_v25 }
 0x168   : > { %1264 = vmatmul.mubr.bf16.gmra.mxu0 %v3785_v34  ;;  %v604_v34 = vmax.bf16 %v4827_v0, %v540_v31 }
 0x169   : > { %1271 = vmatprep.mubr.bf16.mxu0 %v3788_v35  ;;  %v605_v35 = vmax.bf16 %v4827_v0, %v541_v32 }
 0x16b   : > { %v3804_v39 = vcombine.high %v604_v34, %v605_v35  ;;  %v3803_v48 = vcombine.low %v604_v34, %v605_v35 }
 0x170   : > { %1272 = vmatmul.mubr.bf16.gmra.mxu0 %v3787_v40 }
 0x171   : > { %1279 = vmatprep.mubr.bf16.mxu0 %v3790_v41  ;;  %v542_v41 = vld [vmem:[%s5045_s20 + $0x1f0] sm:$0xff] }
 0x172   : > { %v606_v44 = vmax.bf16 %v4827_v0, %v542_v41 }
 0x174   : > { %v3806_v49 = vcombine.high %v606_v44, %v607_v45 }
 0x178   : > { %1280 = vmatmul.mubr.bf16.gmra.mxu0 %v3789_v46 }
 0x179   : > { %1287 = vmatprep.mubr.bf16.mxu0 %v3792_v47 }
 0x180   : > { %v5186_v56 = vpop.f32.mrf.mxu0  ;;  %1288 = vmatmul.mubr.bf16.gmra.mxu0 %v3791_v52 }
 0x181   : > { %1295 = vmatprep.mubr.bf16.mxu0 %v3794_v53  ;;  %v1098_v54 = vadd.f32 %v5223_v50, %v5186_v56 }
 0x182   : > { %v1099_v59 = vpop.f32.mrf.mxu0 }
 0x183   : > { %v3805_v59 = vcombine.low %v606_v44, %v607_v45 }
 0x184   : > { %v5190_v60 = vpop.f32.mrf.mxu0 }
 0x185   : > { %v1101_v52 = vadd.f32 %v5223_v50, %v5190_v60 }
 0x186   : > { %v1102_v63 = vpop.f32.mrf.mxu0 }
 0x187   : > { %v1385_v57 = vmax.f32 %v1101_v52, 0.0 }
 0x188   : > { %v5194_v3 = vpop.f32.mrf.mxu0  ;;  %1296 = vmatmul.mubr.bf16.gmra.mxu0 %v3793_v61  ;;  %v1384_v61 = vmax.f32 %v1098_v54, 0.0 }
 0x189   : > { %1303 = vmatprep.mubr.bf16.mxu0 %v3796_v62  ;;  %v1106_v60 = vadd.f32 %v5223_v50, %v5194_v3 }
 0x18a   : > { %v1107_v6 = vpop.f32.mrf.mxu0  ;;  %v1448_v1 = vpack.c.bf16 %v1385_v57, %v1384_v61 }
 0x18c   : > { %v5198_v7 = vpop.f32.mrf.mxu0 }
 0x18d   : > { %v1109_v62 = vadd.f32 %v5223_v50, %v5198_v7 }
 0x18e   : > { %v1110_v10 = vpop.f32.mrf.mxu0 }
 0x18f   : > { %v1387_v5 = vmax.f32 %v1109_v62, 0.0 }
 0x190   : > { %v5202_v13 = vpop.f32.mrf.mxu0  ;;  %1304 = vmatmul.mubr.bf16.gmra.mxu0 %v3795_v8 }
 0x191   : > { %1311 = vmatprep.mubr.bf16.mxu0 %v3798_v9  ;;  %v1114_v56 = vadd.f32 %v5223_v50, %v5202_v13  ;;  %v1386_v9 = vmax.f32 %v1106_v60, 0.0 }
 0x192   : > { %v1115_v16 = vpop.f32.mrf.mxu0 }
 0x193   : > { %v1388_v11 = vmax.f32 %v1114_v56, 0.0  ;;  %v1449_v7 = vpack.c.bf16 %v1387_v5, %v1386_v9 }
 0x194   : > { %v1116_v17 = vpop.f32.mrf.mxu0 }
 0x195   : > { %v1117_v2 = vadd.f32 %v5223_v50, %v1116_v17 }
 0x196   : > { %v1118_v20 = vpop.f32.mrf.mxu0 }
 0x197   : > { %v1389_v8 = vmax.f32 %v1117_v2, 0.0 }
 0x198   : > { %v5208_v23 = vpop.f32.mrf.mxu0  ;;  %1312 = vmatmul.mubr.bf16.gmra.mxu0 %v3797_v18 }
 0x199   : > { %1319 = vmatprep.mubr.bf16.mxu0 %v3800_v19  ;;  %v1450_v15 = vpack.c.bf16 %v1389_v8, %v1388_v11  ;;  %v1122_v3 = vadd.f32 %v5223_v50, %v5208_v23 }
 0x19a   : > { %v1123_v26 = vpop.f32.mrf.mxu0 }
 0x19b   : > { %v1390_v21 = vmax.f32 %v1122_v3, 0.0 }
 0x19c   : > { %v1124_v27 = vpop.f32.mrf.mxu0 }
 0x19d   : > { %v1125_v12 = vadd.f32 %v5223_v50, %v1124_v27 }
 0x19e   : > { %v1126_v30 = vpop.f32.mrf.mxu0 }
 0x19f   : > { %v1391_v18 = vmax.f32 %v1125_v12, 0.0 }
 0x1a0   : > { %v1129_v33 = vpop.f32.mrf.mxu0  ;;  %1320 = vmatmul.mubr.bf16.gmra.mxu0 %v3799_v28 }
 0x1a1   : > { %1327 = vmatprep.mubr.bf16.mxu0 %v3802_v29  ;;  %v1130_v13 = vadd.f32 %v5223_v50, %v1129_v33  ;;  %v1451_v25 = vpack.c.bf16 %v1391_v18, %v1390_v21 }
 0x1a2   : > { %v1131_v36 = vpop.f32.mrf.mxu0 }
 0x1a3   : > { %v1392_v24 = vmax.f32 %v1130_v13, 0.0 }
 0x1a4   : > { %v1132_v37 = vpop.f32.mrf.mxu0 }
 0x1a5   : > { %v1133_v16 = vadd.f32 %v5223_v50, %v1132_v37 }
 0x1a6   : > { %v1134_v40 = vpop.f32.mrf.mxu0 }
 0x1a7   : > { %v1393_v20 = vmax.f32 %v1133_v16, 0.0 }
 0x1a8   : > { %v1137_v43 = vpop.f32.mrf.mxu0  ;;  %1328 = vmatmul.mubr.bf16.gmra.mxu0 %v3801_v38 }
 0x1a9   : > { %1335 = vmatprep.mubr.bf16.mxu0 %v3804_v39  ;;  %v1452_v28 = vpack.c.bf16 %v1393_v20, %v1392_v24  ;;  %v1138_v23 = vadd.f32 %v5223_v50, %v1137_v43 }
 0x1aa   : > { %v1139_v46 = vpop.f32.mrf.mxu0 }
 0x1ab   : > { %v1394_v35 = vmax.f32 %v1138_v23, 0.0 }
 0x1ac   : > { %v1140_v47 = vpop.f32.mrf.mxu0 }
 0x1ad   : > { %v1141_v26 = vadd.f32 %v5223_v50, %v1140_v47 }
 0x1ae   : > { %v1142_v51 = vpop.f32.mrf.mxu0 }
 0x1af   : > { %v1395_v32 = vmax.f32 %v1141_v26, 0.0 }
 0x1b0   : > { %v1145_v53 = vpop.f32.mrf.mxu0  ;;  %1336 = vmatmul.mubr.bf16.gmra.mxu0 %v3803_v48 }
 0x1b1   : > { %1343 = vmatprep.mubr.bf16.mxu0 %v3806_v49  ;;  %v1146_v31 = vadd.f32 %v5223_v50, %v1145_v53  ;;  %v1453_v38 = vpack.c.bf16 %v1395_v32, %v1394_v35  ;;  %v4449_v35 = vld [vmem:[#allocation7 + $0x30] sm:$0xff]  }
 0x1b2   : > { %v1147_v55 = vpop.f32.mrf.mxu0 }
 0x1b3   : > { %v1396_v37 = vmax.f32 %v1146_v31, 0.0 }
 0x1b4   : > { %v1148_v58 = vpop.f32.mrf.mxu0 }
 0x1b5   : > { %v1149_v29 = vadd.f32 %v5223_v50, %v1148_v58 }
 0x1b6   : > { %v1150_v63 = vpop.f32.mrf.mxu0 }
 0x1b7   : > { %v1397_v34 = vmax.f32 %v1149_v29, 0.0 }
 0x1b8   : > { %v1153_v4 = vpop.f32.mrf.mxu0  ;;  %1344 = vmatmul.mubr.bf16.gmra.mxu0 %v3805_v59 }
 0x1b9   : > { %4074 = vmatprep.mubr.bf16.mxu0 %v1448_v1  ;;  %v1454_v41 = vpack.c.bf16 %v1397_v34, %v1396_v37  ;;  %v1154_v43 = vadd.f32 %v5223_v50, %v1153_v4 }
 0x1ba   : > { %v1155_v6 = vpop.f32.mrf.mxu0 }
 0x1bb   : > { %v1398_v49 = vmax.f32 %v1154_v43, 0.0 }
 0x1bc   : > { %v1156_v10 = vpop.f32.mrf.mxu0 }
 0x1bd   : > { %v1157_v39 = vadd.f32 %v5223_v50, %v1156_v10 }
 0x1be   : > { %v1158_v14 = vpop.f32.mrf.mxu0 }
 0x1bf   : > { %v1399_v46 = vmax.f32 %v1157_v39, 0.0 }
 0x1c0   : > { %v1161_v17 = vpop.f32.mrf.mxu0  ;;  %4075 = vmatmul.mubr.bf16.vlgmr.msra.gmra.mxu0 %v1449_v7 }
 0x1c1   : > { %4078 = vmatprep.mubr.bf16.mxu0 %v1450_v15  ;;  %v1162_v45 = vadd.f32 %v5223_v50, %v1161_v17  ;;  %v1455_v53 = vpack.c.bf16 %v1399_v46, %v1398_v49  ;;  %v4451_v46 = vld [vmem:[#allocation7 + $0x20] sm:$0xff]  }
 0x1c2   : > { %v1163_v19 = vpop.f32.mrf.mxu0 }
 0x1c3   : > { %v1400_v52 = vmax.f32 %v1162_v45, 0.0 }
 0x1c4   : > { %v1164_v22 = vpop.f32.mrf.mxu0 }
 0x1c5   : > { %v1165_v42 = vadd.f32 %v5223_v50, %v1164_v22 }
 0x1c6   : > { %v1166_v27 = vpop.f32.mrf.mxu0 }
 0x1c7   : > { %v1401_v48 = vmax.f32 %v1165_v42, 0.0 }
 0x1c8   : > { %v1169_v30 = vpop.f32.mrf.mxu0  ;;  %4079 = vmatmul.mubr.bf16.gmra.mxu0 %v1451_v25 }
 0x1c9   : > { %4082 = vmatprep.mubr.bf16.mxu0 %v1452_v28  ;;  %v1456_v57 = vpack.c.bf16 %v1401_v48, %v1400_v52  ;;  %v1170_v59 = vadd.f32 %v5223_v50, %v1169_v30  ;;  %v4448_v30 = vld [vmem:[#allocation7 + $0x38] sm:$0xff]  }
 0x1ca   : > { %v1171_v33 = vpop.f32.mrf.mxu0 }
 0x1cb   : > { %v1402_v60 = vmax.f32 %v1170_v59, 0.0  ;;  %v4453_v59 = vld [vmem:[#allocation7 + $0x10] sm:$0xff]  }
 0x1cc   : > { %v1172_v36 = vpop.f32.mrf.mxu0 }
 0x1cd   : > { %v1173_v54 = vadd.f32 %v5223_v50, %v1172_v36 }
 0x1ce   : > { %v1174_v40 = vpop.f32.mrf.mxu0 }
 0x1cf   : > { %v1403_v63 = vmax.f32 %v1173_v54, 0.0 }
 0x1d0   : > { %v1177_v44 = vpop.f32.mrf.mxu0  ;;  %4083 = vmatmul.mubr.bf16.gmra.mxu0 %v1453_v38 }
 0x1d1   : > { %4086 = vmatprep.mubr.bf16.mxu0 %v1454_v41  ;;  %v1178_v62 = vadd.f32 %v5223_v50, %v1177_v44  ;;  %v1457_v5 = vpack.c.bf16 %v1403_v63, %v1402_v60  ;;  %v4450_v41 = vld [vmem:[#allocation7 + $0x28] sm:$0xff]  }
 0x1d2   : > { %v1179_v47 = vpop.f32.mrf.mxu0  ;;  %v4454_v60 = vld [vmem:[#allocation7 + $0x8] sm:$0xff]  }
 0x1d3   : > { %v1404_v56 = vmax.f32 %v1178_v62, 0.0 }
 0x1d4   : > { %v1180_v51 = vpop.f32.mrf.mxu0 }
 0x1d5   : > { %v1181_v58 = vadd.f32 %v5223_v50, %v1180_v51 }
 0x1d6   : > { %v1182_v55 = vpop.f32.mrf.mxu0 }
 0x1d7   : > { %v1405_v2 = vmax.f32 %v1181_v58, 0.0 }
 0x1d8   : > { %v1185_v61 = vpop.f32.mrf.mxu0  ;;  %4087 = vmatmul.mubr.bf16.gmra.mxu0 %v1455_v53  ;;  %v4452_v53 = vld [vmem:[#allocation7 + $0x18] sm:$0xff]  }
 0x1d9   : > { %4090 = vmatprep.mubr.bf16.mxu0 %v1456_v57  ;;  %v1458_v9 = vpack.c.bf16 %v1405_v2, %v1404_v56  ;;  %v1186_v10 = vadd.f32 %v5223_v50, %v1185_v61 }
 0x1da   : > { %v1187_v1 = vpop.f32.mrf.mxu0 }
 0x1db   : > { %v1406_v15 = vmax.f32 %v1186_v10, 0.0 }
 0x1dc   : > { %v1188_v4 = vpop.f32.mrf.mxu0 }
 0x1dd   : > { %v1189_v6 = vadd.f32 %v5223_v50, %v1188_v4 }
 0x1de   : > { %v1190_v8 = vpop.f32.mrf.mxu0 }
 0x1df   : > { %v1407_v7 = vmax.f32 %v1189_v6, 0.0  ;;  %v4455_v8 = vld [vmem:[#allocation7] sm:$0xff]  }
 0x1e0   : > { %v1193_v11 = vpop.f32.mrf.mxu0  ;;  %4091 = vmatmul.mubr.bf16.gmra.mxu0 %v1457_v5 }
 0x1e1   : > { %4094 = vmatprep.mubr.bf16.mxu0 %v1458_v9  ;;  %v1194_v14 = vadd.f32 %v5223_v50, %v1193_v11  ;;  %v1459_v17 = vpack.c.bf16 %v1407_v7, %v1406_v15 }
 0x1e2   : > { %v1195_v12 = vpop.f32.mrf.mxu0 }
 0x1e3   : > { %v1408_v18 = vmax.f32 %v1194_v14, 0.0  ;;  %v4456_v14 = vld [vmem:[#allocation7 + $0x78] sm:$0xff]  }
 0x1e4   : > { %v1196_v16 = vpop.f32.mrf.mxu0 }
 0x1e5   : > { %v1197_v3 = vadd.f32 %v5223_v50, %v1196_v16 }
 0x1e6   : > { %v1198_v13 = vpop.f32.mrf.mxu0 }
 0x1e7   : > { %v1409_v19 = vmax.f32 %v1197_v3, 0.0  ;;  %v4457_v13 = vld [vmem:[#allocation7 + $0x70] sm:$0xff]  }
 0x1e8   : > { %v1201_v20 = vpop.f32.mrf.mxu0  ;;  %4095 = vmatmul.mubr.bf16.gmra.mxu0 %v1459_v17 }
 0x1e9   : > { %v1460_v21 = vpack.c.bf16 %v1409_v19, %v1408_v18  ;;  %v1202_v24 = vadd.f32 %v5223_v50, %v1201_v20 }
 0x1ea   : > { %v1203_v22 = vpop.f32.mrf.mxu0 }
 0x1eb   : > { %4098 = vmatprep.mubr.bf16.mxu1 %v1460_v21  ;;  %v1410_v28 = vmax.f32 %v1202_v24, 0.0  ;;  %v4458_v24 = vld [vmem:[#allocation7 + $0x68] sm:$0xff]  }
 0x1ec   : > { %v1204_v25 = vpop.f32.mrf.mxu0 }
 0x1ed   : > { %v1205_v26 = vadd.f32 %v5223_v50, %v1204_v25 }
 0x1ee   : > { %v1206_v27 = vpop.f32.mrf.mxu0 }
 0x1ef   : > { %v1411_v29 = vmax.f32 %v1205_v26, 0.0 }
 0x1f0   : > { %v1209_v23 = vpop.f32.mrf.mxu0 }
 0x1f1   : > { %v1461_v31 = vpack.c.bf16 %v1411_v29, %v1410_v28  ;;  %v1210_v33 = vadd.f32 %v5223_v50, %v1209_v23  ;;  %v4459_v29 = vld [vmem:[#allocation7 + $0x60] sm:$0xff]  }
 0x1f2   : > { %v1211_v32 = vpop.f32.mrf.mxu0 }
 0x1f3   : > { %4099 = vmatmul.mubr.bf16.vlgmr.msra.gmra.mxu1 %v1461_v31  ;;  %v1412_v38 = vmax.f32 %v1210_v33, 0.0 }
 0x1f4   : > { %v1212_v34 = vpop.f32.mrf.mxu0  ;;  %2257 = vmatpush1.bf16.msra.mxu1 %v4448_v30 }
 0x1f5   : > { %v1213_v36 = vadd.f32 %v5223_v50, %v1212_v34  ;;  %2258 = vmatprep.subr.bf16.mxu1 %v4827_v0  ;;  %v4460_v34 = vld [vmem:[#allocation7 + $0x58] sm:$0xff]  }
 0x1f6   : > { %v1214_v37 = vpop.f32.mrf.mxu0 }
 0x1f7   : > { %v1413_v39 = vmax.f32 %v1213_v36, 0.0 }
 0x1f8   : > { %v1217_v40 = vpop.f32.mrf.mxu0  ;;  %2259 = vmatpush1.bf16.msra.mxu1 %v4449_v35 }
 0x1f9   : > { %v1462_v42 = vpack.c.bf16 %v1413_v39, %v1412_v38  ;;  %2260 = vmatprep.subr.bf16.mxu1 %v4827_v0  ;;  %v1218_v44 = vadd.f32 %v5223_v50, %v1217_v40  ;;  %v4461_v39 = vld [vmem:[#allocation7 + $0x50] sm:$0xff]  }
 0x1fa   : > { %v1219_v43 = vpop.f32.mrf.mxu0 }
 0x1fb   : > { %4102 = vmatprep.mubr.bf16.mxu1 %v1462_v42  ;;  %v1414_v49 = vmax.f32 %v1218_v44, 0.0 }
 0x1fc   : > { %v1220_v45 = vpop.f32.mrf.mxu0  ;;  %2261 = vmatpush1.bf16.msra.mxu1 %v4450_v41 }
 0x1fd   : > { %v1221_v47 = vadd.f32 %v5223_v50, %v1220_v45  ;;  %2262 = vmatprep.subr.bf16.mxu1 %v4827_v0  ;;  %v4462_v45 = vld [vmem:[#allocation7 + $0x48] sm:$0xff]  }
 0x1fe   : > { %v1222_v48 = vpop.f32.mrf.mxu0 }
 0x1ff   : > { %v1415_v51 = vmax.f32 %v1221_v47, 0.0 }
 0x200   : > { %v1225_v52 = vpop.f32.mrf.mxu0  ;;  %2263 = vmatpush1.bf16.msra.mxu1 %v4451_v46 }
 0x201   : > { %v1463_v54 = vpack.c.bf16 %v1415_v51, %v1414_v49  ;;  %2264 = vmatprep.subr.bf16.mxu1 %v4827_v0  ;;  %v1226_v57 = vadd.f32 %v5223_v50, %v1225_v52  ;;  %v4463_v51 = vld [vmem:[#allocation7 + $0x40] sm:$0xff]  }
 0x202   : > { %v1227_v55 = vpop.f32.mrf.mxu0 }
 0x203   : > { %4103 = vmatmul.mubr.bf16.gmra.mxu1 %v1463_v54  ;;  %v1416_v63 = vmax.f32 %v1226_v57, 0.0 }
 0x204   : > { %v1228_v58 = vpop.f32.mrf.mxu0  ;;  %2265 = vmatpush1.bf16.msra.mxu1 %v4452_v53 }
 0x205   : > { %v1229_v61 = vadd.f32 %v5223_v50, %v1228_v58  ;;  %2266 = vmatprep.subr.bf16.mxu1 %v4827_v0 }
 0x206   : > { %v1230_v62 = vpop.f32.mrf.mxu0 }
 0x207   : > { %v1417_v1 = vmax.f32 %v1229_v61, 0.0 }
 0x208   : > { %v1233_v2 = vpop.f32.mrf.mxu0  ;;  %2267 = vmatpush1.bf16.msra.mxu1 %v4453_v59 }
 0x209   : > { %v1464_v4 = vpack.c.bf16 %v1417_v1, %v1416_v63  ;;  %2268 = vmatprep.subr.bf16.mxu1 %v4827_v0  ;;  %v1234_v5 = vadd.f32 %v5223_v50, %v1233_v2 }
 0x20a   : > { %v1235_v56 = vpop.f32.mrf.mxu0 }
 0x20b   : > { %4106 = vmatprep.mubr.bf16.mxu1 %v1464_v4  ;;  %v1418_v11 = vmax.f32 %v1234_v5, 0.0 }
 0x20c   : > { %v1236_v6 = vpop.f32.mrf.mxu0  ;;  %2269 = vmatpush1.bf16.msra.mxu1 %v4454_v60 }
 0x20d   : > { %v1237_v9 = vadd.f32 %v5223_v50, %v1236_v6  ;;  %2270 = vmatprep.subr.bf16.mxu1 %v4827_v0 }
 0x20e   : > { %v1238_v10 = vpop.f32.mrf.mxu0 }
 0x20f   : > { %v1419_v7 = vmax.f32 %v1237_v9, 0.0 }
 0x210   : > { %v1241_v12 = vpop.f32.mrf.mxu0  ;;  %2271 = vmatpush1.bf16.msra.mxu1 %v4455_v8 }
 0x211   : > { %v1465_v15 = vpack.c.bf16 %v1419_v7, %v1418_v11  ;;  %2272 = vmatprep.subr.bf16.mxu1 %v4827_v0  ;;  %v1242_v3 = vadd.f32 %v5223_v50, %v1241_v12 }
 0x212   : > { %v1243_v16 = vpop.f32.mrf.mxu0 }
 0x213   : > { %4107 = vmatmul.mubr.bf16.gmra.mxu1 %v1465_v15  ;;  %v1420_v20 = vmax.f32 %v1242_v3, 0.0 }
 0x214   : > { %v1244_v17 = vpop.f32.mrf.mxu0  ;;  %2273 = vmatpush2.bf16.msra.mxu1 %v4456_v14 }
 0x215   : > { %v1245_v18 = vadd.f32 %v5223_v50, %v1244_v17  ;;  %2274 = vmatprep.subr.bf16.mxu1 %v4827_v0 }
 0x216   : > { %v1246_v19 = vpop.f32.mrf.mxu0 }
 0x217   : > { %v1421_v21 = vmax.f32 %v1245_v18, 0.0 }
 0x218   : > { %v1249_v22 = vpop.f32.mrf.mxu0  ;;  %2275 = vmatpush2.bf16.msra.mxu1 %v4457_v13 }
 0x219   : > { %v1466_v25 = vpack.c.bf16 %v1421_v21, %v1420_v20  ;;  %2276 = vmatprep.subr.bf16.mxu1 %v4827_v0  ;;  %v1250_v27 = vadd.f32 %v5223_v50, %v1249_v22 }
 0x21a   : > { %v1251_v26 = vpop.f32.mrf.mxu0 }
 0x21b   : > { %4110 = vmatprep.mubr.bf16.mxu1 %v1466_v25  ;;  %v1422_v31 = vmax.f32 %v1250_v27, 0.0 }
 0x21c   : > { %v1252_v28 = vpop.f32.mrf.mxu0  ;;  %2277 = vmatpush2.bf16.msra.mxu1 %v4458_v24 }
 0x21d   : > { %v1253_v23 = vadd.f32 %v5223_v50, %v1252_v28  ;;  %2278 = vmatprep.subr.bf16.mxu1 %v4827_v0 }
 0x21e   : > { %v1254_v30 = vpop.f32.mrf.mxu0 }
 0x21f   : > { %v1423_v32 = vmax.f32 %v1253_v23, 0.0 }
 0x220   : > { %v1257_v33 = vpop.f32.mrf.mxu0  ;;  %2279 = vmatpush2.bf16.msra.mxu1 %v4459_v29 }
 0x221   : > { %v1467_v35 = vpack.c.bf16 %v1423_v32, %v1422_v31  ;;  %2280 = vmatprep.subr.bf16.mxu1 %v4827_v0  ;;  %v1258_v37 = vadd.f32 %v5223_v50, %v1257_v33 }
 0x222   : > { %v1259_v36 = vpop.f32.mrf.mxu0 }
 0x223   : > { %4111 = vmatmul.mubr.bf16.gmra.mxu1 %v1467_v35  ;;  %v1424_v42 = vmax.f32 %v1258_v37, 0.0 }
 0x224   : > { %v1260_v38 = vpop.f32.mrf.mxu0  ;;  %2281 = vmatpush2.bf16.msra.mxu1 %v4460_v34 }
 0x225   : > { %v1261_v40 = vadd.f32 %v5223_v50, %v1260_v38  ;;  %2282 = vmatprep.subr.bf16.mxu1 %v4827_v0 }
 0x226   : > { %v1262_v41 = vpop.f32.mrf.mxu0 }
 0x227   : > { %v1425_v43 = vmax.f32 %v1261_v40, 0.0 }
 0x228   : > { %v1265_v44 = vpop.f32.mrf.mxu0  ;;  %2283 = vmatpush2.bf16.msra.mxu1 %v4461_v39 }
 0x229   : > { %v1468_v46 = vpack.c.bf16 %v1425_v43, %v1424_v42  ;;  %2284 = vmatprep.subr.bf16.mxu1 %v4827_v0  ;;  %v1266_v48 = vadd.f32 %v5223_v50, %v1265_v44 }
 0x22a   : > { %v1267_v47 = vpop.f32.mrf.mxu0 }
 0x22b   : > { %4114 = vmatprep.mubr.bf16.mxu1 %v1468_v46  ;;  %v1426_v54 = vmax.f32 %v1266_v48, 0.0 }
 0x22c   : > { %v1268_v49 = vpop.f32.mrf.mxu0  ;;  %2285 = vmatpush2.bf16.msra.mxu1 %v4462_v45 }
 0x22d   : > { %v1269_v52 = vadd.f32 %v5223_v50, %v1268_v49  ;;  %2286 = vmatprep.subr.bf16.mxu1 %v4827_v0 }
 0x22e   : > { %v1270_v53 = vpop.f32.mrf.mxu0 }
 0x22f   : > { %v1427_v55 = vmax.f32 %v1269_v52, 0.0 }
 0x230   : > { %v1273_v57 = vpop.f32.mrf.mxu0  ;;  %2287 = vmatpush2.bf16.msra.mxu1 %v4463_v51 }
 0x231   : > { %v1469_v58 = vpack.c.bf16 %v1427_v55, %v1426_v54  ;;  %v1274_v61 = vadd.f32 %v5223_v50, %v1273_v57 }
 0x232   : > { %v1275_v59 = vpop.f32.mrf.mxu0 }
 0x233   : > { %4115 = vmatmul.mubr.bf16.gmra.mxu1 %v1469_v58  ;;  %v1428_v2 = vmax.f32 %v1274_v61, 0.0 }
 0x234   : > { %v1276_v62 = vpop.f32.mrf.mxu0 }
 0x235   : > { %v1277_v63 = vadd.f32 %v5223_v50, %v1276_v62 }
 0x236   : > { %v1278_v1 = vpop.f32.mrf.mxu0 }
 0x237   : > { %v1429_v60 = vmax.f32 %v1277_v63, 0.0 }
 0x238   : > { %v1281_v4 = vpop.f32.mrf.mxu0 }
 0x239   : > { %v1470_v56 = vpack.c.bf16 %v1429_v60, %v1428_v2  ;;  %v1282_v0 = vadd.f32 %v5223_v50, %v1281_v4 }
 0x23a   : > { %v1283_v5 = vpop.f32.mrf.mxu0 }
 0x23b   : > { %4118 = vmatprep.mubr.bf16.mxu1 %v1470_v56  ;;  %v1430_v10 = vmax.f32 %v1282_v0, 0.0 }
 0x23c   : > { %v1284_v6 = vpop.f32.mrf.mxu0 }
 0x23d   : > { %v1285_v8 = vadd.f32 %v5223_v50, %v1284_v6 }
 0x23e   : > { %v1286_v9 = vpop.f32.mrf.mxu0 }
 0x23f   : > { %v1431_v11 = vmax.f32 %v1285_v8, 0.0 }
 0x240   : > { %v1289_v7 = vpop.f32.mrf.mxu0 }
 0x241   : > { %v1471_v12 = vpack.c.bf16 %v1431_v11, %v1430_v10  ;;  %v1290_v15 = vadd.f32 %v5223_v50, %v1289_v7 }
 0x242   : > { %v1291_v14 = vpop.f32.mrf.mxu0 }
 0x243   : > { %4119 = vmatmul.mubr.bf16.gmra.mxu1 %v1471_v12  ;;  %v1432_v13 = vmax.f32 %v1290_v15, 0.0 }
 0x244   : > { %v1292_v16 = vpop.f32.mrf.mxu0 }
 0x245   : > { %v1293_v3 = vadd.f32 %v5223_v50, %v1292_v16 }
 0x246   : > { %v1294_v17 = vpop.f32.mrf.mxu0 }
 0x247   : > { %v1433_v18 = vmax.f32 %v1293_v3, 0.0 }
 0x248   : > { %v1297_v19 = vpop.f32.mrf.mxu0 }
 0x249   : > { %v1472_v20 = vpack.c.bf16 %v1433_v18, %v1432_v13  ;;  %v1298_v22 = vadd.f32 %v5223_v50, %v1297_v19  ;;  %v4543_v19 = vld [vmem:[%s5045_s20] sm:$0xff] }
 0x24a   : > { %v1299_v21 = vpop.f32.mrf.mxu0 }
 0x24b   : > { %4122 = vmatprep.mubr.bf16.mxu1 %v1472_v20  ;;  %v1434_v27 = vmax.f32 %v1298_v22, 0.0  ;;  %v4544_v20 = vld [vmem:[%s5045_s20 + $0x8] sm:$0xff] }
 0x24c   : > { %v1300_v24 = vpop.f32.mrf.mxu0  ;;  %v3833_v21 = vcombine.high %v4543_v19, %v4544_v20 }
 0x24d   : > { %v1301_v25 = vadd.f32 %v5223_v50, %v1300_v24  ;;  %v3832_v24 = vcombine.low %v4543_v19, %v4544_v20  ;;  %v4567_v20 = vld [vmem:[%s5045_s20 + $0xc0] sm:$0xff] }
 0x24e   : > { %v1302_v26 = vpop.f32.mrf.mxu0 }
 0x24f   : > { %v1435_v28 = vmax.f32 %v1301_v25, 0.0  ;;  %v4545_v25 = vld [vmem:[%s5045_s20 + $0x10] sm:$0xff]  ;;  %v4546_v26 = vld [vmem:[%s5045_s20 + $0x18] sm:$0xff] }
 0x250   : > { %v1305_v29 = vpop.f32.mrf.mxu0 }
 0x251   : > { %v1473_v23 = vpack.c.bf16 %v1435_v28, %v1434_v27  ;;  %v1306_v31 = vadd.f32 %v5223_v50, %v1305_v29  ;;  %v3835_v27 = vcombine.high %v4545_v25, %v4546_v26  ;;  %v4547_v28 = vld [vmem:[%s5045_s20 + $0x20] sm:$0xff]  ;;  %v4548_v29 = vld [vmem:[%s5045_s20 + $0x28] sm:$0xff] }
 0x252   : > { %v1307_v30 = vpop.f32.mrf.mxu0 }
 0x253   : > { %4123 = vmatmul.mubr.bf16.gmra.mxu1 %v1473_v23  ;;  %v1436_v35 = vmax.f32 %v1306_v31, 0.0  ;;  %v3837_v23 = vcombine.high %v4547_v28, %v4548_v29  ;;  %v3836_v30 = vcombine.low %v4547_v28, %v4548_v29  ;;  %v4549_v31 = vld [vmem:[%s5045_s20 + $0x30] sm:$0xff] }
 0x254   : > { %v1308_v32 = vpop.f32.mrf.mxu0 }
 0x255   : > { %v1309_v33 = vadd.f32 %v5223_v50, %v1308_v32  ;;  %v4550_v32 = vld [vmem:[%s5045_s20 + $0x38] sm:$0xff] }
 0x256   : > { %v1310_v34 = vpop.f32.mrf.mxu0 }
 0x257   : > { %v1437_v36 = vmax.f32 %v1309_v33, 0.0  ;;  %v3839_v33 = vcombine.high %v4549_v31, %v4550_v32  ;;  %v3838_v34 = vcombine.low %v4549_v31, %v4550_v32  ;;  %v4571_v32 = vld [vmem:[%s5045_s20 + $0xe0] sm:$0xff] }
 0x258   : > { %v1313_v37 = vpop.f32.mrf.mxu0 }
 0x259   : > { %v1474_v38 = vpack.c.bf16 %v1437_v36, %v1436_v35  ;;  %v1314_v40 = vadd.f32 %v5223_v50, %v1313_v37  ;;  %v4551_v35 = vld [vmem:[%s5045_s20 + $0x40] sm:$0xff]  ;;  %v4552_v36 = vld [vmem:[%s5045_s20 + $0x48] sm:$0xff] }
 0x25a   : > { %v1315_v39 = vpop.f32.mrf.mxu0  ;;  %v3841_v37 = vcombine.high %v4551_v35, %v4552_v36 }
 0x25b   : > { %4126 = vmatprep.mubr.bf16.mxu1 %v1474_v38  ;;  %v1438_v44 = vmax.f32 %v1314_v40, 0.0  ;;  %v3840_v38 = vcombine.low %v4551_v35, %v4552_v36  ;;  %v4553_v39 = vld [vmem:[%s5045_s20 + $0x50] sm:$0xff]  ;;  %v4554_v40 = vld [vmem:[%s5045_s20 + $0x58] sm:$0xff] }
 0x25c   : > { %v1316_v41 = vpop.f32.mrf.mxu0 }
 0x25d   : > { %v1317_v42 = vadd.f32 %v5223_v50, %v1316_v41  ;;  %v3843_v41 = vcombine.high %v4553_v39, %v4554_v40 }
 0x25e   : > { %v1318_v43 = vpop.f32.mrf.mxu0 }
 0x25f   : > { %v1439_v45 = vmax.f32 %v1317_v42, 0.0  ;;  %v3842_v42 = vcombine.low %v4553_v39, %v4554_v40  ;;  %v4555_v43 = vld [vmem:[%s5045_s20 + $0x60] sm:$0xff]  ;;  %v4574_v39 = vld [vmem:[%s5045_s20 + $0xf8] sm:$0xff] }
 0x260   : > { %v1321_v46 = vpop.f32.mrf.mxu0 }
 0x261   : > { %v1475_v47 = vpack.c.bf16 %v1439_v45, %v1438_v44  ;;  %v1322_v49 = vadd.f32 %v5223_v50, %v1321_v46  ;;  %v4556_v44 = vld [vmem:[%s5045_s20 + $0x68] sm:$0xff] }
 0x262   : > { %v1323_v48 = vpop.f32.mrf.mxu0  ;;  %v3845_v45 = vcombine.high %v4555_v43, %v4556_v44  ;;  %v3844_v46 = vcombine.low %v4555_v43, %v4556_v44  ;;  %v4575_v44 = vld [vmem:[%s5045_s20 + $0x100] sm:$0xff] }
 0x263   : > { %4127 = vmatmul.mubr.bf16.gmra.mxu1 %v1475_v47  ;;  %v1440_v54 = vmax.f32 %v1322_v49, 0.0  ;;  %v4557_v47 = vld [vmem:[%s5045_s20 + $0x70] sm:$0xff]  ;;  %v4558_v48 = vld [vmem:[%s5045_s20 + $0x78] sm:$0xff] }
 0x264   : > { %v1324_v51 = vpop.f32.mrf.mxu0  ;;  %v3847_v49 = vcombine.high %v4557_v47, %v4558_v48 }
 0x265   : > { %v1325_v52 = vadd.f32 %v5223_v50, %v1324_v51  ;;  %v4509_v51 = vld [vmem:[#allocation10 + $0x38] sm:$0xff]  }
 0x266   : > { %v1326_v53 = vpop.f32.mrf.mxu0  ;;  %4138 = vmatprep.subr.bf16.mxu0 %v4509_v51 }
 0x267   : > { %v1441_v55 = vmax.f32 %v1325_v52, 0.0  ;;  %v4511_v52 = vld [vmem:[#allocation10 + $0x30] sm:$0xff]   ;;  %4139 = vmatpush3.bf16.msra.mxu0 %v4509_v51  ;;  %v3846_v53 = vcombine.low %v4557_v47, %v4558_v48 }
 0x268   : > { %v1329_v57 = vpop.f32.mrf.mxu0  ;;  %4140 = vmatprep.subr.bf16.mxu0 %v4511_v52  ;;  %v4577_v51 = vld [vmem:[%s5045_s20 + $0x110] sm:$0xff] }
 0x269   : > { %v1476_v58 = vpack.c.bf16 %v1441_v55, %v1440_v54  ;;  %v1330_v61 = vadd.f32 %v5223_v50, %v1329_v57  ;;  %v4559_v54 = vld [vmem:[%s5045_s20 + $0x80] sm:$0xff]  ;;  %v4560_v55 = vld [vmem:[%s5045_s20 + $0x88] sm:$0xff] }
 0x26a   : > { %v1331_v59 = vpop.f32.mrf.mxu0  ;;  %v3849_v57 = vcombine.high %v4559_v54, %v4560_v55 }
 0x26b   : > { %4130 = vmatprep.mubr.bf16.mxu1 %v1476_v58  ;;  %v1442_v2 = vmax.f32 %v1330_v61, 0.0  ;;  %4141 = vmatpush3.bf16.msra.mxu0 %v4511_v52  ;;  %v4513_v58 = vld [vmem:[#allocation10 + $0x28] sm:$0xff]   ;;  %v3848_v61 = vcombine.low %v4559_v54, %v4560_v55  ;;  %v4578_v52 = vld [vmem:[%s5045_s20 + $0x118] sm:$0xff] }
 0x26c   : > { %v1332_v62 = vpop.f32.mrf.mxu0  ;;  %4142 = vmatprep.subr.bf16.mxu0 %v4513_v58 }
 0x26d   : > { %v1333_v63 = vadd.f32 %v5223_v50, %v1332_v62  ;;  %v4561_v62 = vld [vmem:[%s5045_s20 + $0x90] sm:$0xff] }
 0x26e   : > { %v1334_v1 = vpop.f32.mrf.mxu0 }
 0x26f   : > { %v1443_v60 = vmax.f32 %v1333_v63, 0.0  ;;  %4143 = vmatpush3.bf16.msra.mxu0 %v4513_v58  ;;  %v4562_v63 = vld [vmem:[%s5045_s20 + $0x98] sm:$0xff]  ;;  %v3866_v58 = vcombine.low %v4577_v51, %v4578_v52 }
 0x270   : > { %v1337_v4 = vpop.f32.mrf.mxu0  ;;  %v3851_v1 = vcombine.high %v4561_v62, %v4562_v63 }
 0x271   : > { %v1477_v56 = vpack.c.bf16 %v1443_v60, %v1442_v2  ;;  %v1338_v0 = vadd.f32 %v5223_v50, %v1337_v4  ;;  %v4515_v2 = vld [vmem:[#allocation10 + $0x20] sm:$0xff]   ;;  %v4517_v4 = vld [vmem:[#allocation10 + $0x18] sm:$0xff]  }
 0x272   : > { %v1339_v5 = vpop.f32.mrf.mxu0  ;;  %4144 = vmatprep.subr.bf16.mxu0 %v4515_v2 }
 0x273   : > { %4131 = vmatmul.mubr.bf16.gmra.mxu1 %v1477_v56  ;;  %v1444_v10 = vmax.f32 %v1338_v0, 0.0  ;;  %4145 = vmatpush3.bf16.msra.mxu0 %v4515_v2  ;;  %v3850_v5 = vcombine.low %v4561_v62, %v4562_v63  ;;  %v4563_v0 = vld [vmem:[%s5045_s20 + $0xa0] sm:$0xff]  ;;  %v4580_v62 = vld [vmem:[%s5045_s20 + $0x128] sm:$0xff] }
 0x274   : > { %v1340_v6 = vpop.f32.mrf.mxu0  ;;  %4146 = vmatprep.subr.bf16.mxu0 %v4517_v4 }
 0x275   : > { %v1341_v8 = vadd.f32 %v5223_v50, %v1340_v6  ;;  %v4564_v6 = vld [vmem:[%s5045_s20 + $0xa8] sm:$0xff] }
 0x276   : > { %v1342_v9 = vpop.f32.mrf.mxu0 }
 0x277   : > { %v1445_v11 = vmax.f32 %v1341_v8, 0.0  ;;  %4147 = vmatpush3.bf16.msra.mxu0 %v4517_v4  ;;  %v3853_v8 = vcombine.high %v4563_v0, %v4564_v6  ;;  %v4519_v9 = vld [vmem:[#allocation10 + $0x10] sm:$0xff]  }
 0x278   : > { %v1345_v7 = vpop.f32.mrf.mxu0  ;;  %4148 = vmatprep.subr.bf16.mxu0 %v4519_v9 }
 0x279   : > { %v1478_v12 = vpack.c.bf16 %v1445_v11, %v1444_v10  ;;  %v1346_v15 = vadd.f32 %v5223_v50, %v1345_v7  ;;  %v4521_v7 = vld [vmem:[#allocation10 + $0x8] sm:$0xff]  }
 0x27a   : > { %v1347_v14 = vpop.f32.mrf.mxu0 }
 0x27b   : > { %4134 = vmatprep.mubr.bf16.mxu1 %v1478_v12  ;;  %v1446_v13 = vmax.f32 %v1346_v15, 0.0  ;;  %4149 = vmatpush3.bf16.msra.mxu0 %v4519_v9  ;;  %v3852_v14 = vcombine.low %v4563_v0, %v4564_v6  ;;  %v4565_v15 = vld [vmem:[%s5045_s20 + $0xb0] sm:$0xff]  ;;  %v4582_v0 = vld [vmem:[%s5045_s20 + $0x138] sm:$0xff] }
 0x27c   : > { %v1348_v16 = vpop.f32.mrf.mxu0  ;;  %4150 = vmatprep.subr.bf16.mxu0 %v4521_v7 }
 0x27d   : > { %v1349_v3 = vadd.f32 %v5223_v50, %v1348_v16  ;;  %v3834_v50 = vcombine.low %v4545_v25, %v4546_v26  ;;  %v4566_v16 = vld [vmem:[%s5045_s20 + $0xb8] sm:$0xff] }
 0x27e   : > { %v1350_v17 = vpop.f32.mrf.mxu0  ;;  %v3854_v19 = vcombine.low %v4565_v15, %v4566_v16 }
 0x27f   : > { %v1447_v18 = vmax.f32 %v1349_v3, 0.0  ;;  %4151 = vmatpush3.bf16.msra.mxu0 %v4521_v7  ;;  %v3855_v3 = vcombine.high %v4565_v15, %v4566_v16  ;;  %v4523_v17 = vld [vmem:[#allocation10] sm:$0xff]   ;;  %v4584_v15 = vld [vmem:[%s5045_s20 + $0x148] sm:$0xff] }
 0x280   : > { %4152 = vmatprep.subr.bf16.mxu0 %v4523_v17 }
 0x281   : > { %v1479_v22 = vpack.c.bf16 %v1447_v18, %v1446_v13 }
 0x283   : > { %4135 = vmatmul.mubr.bf16.gmra.mxu1 %v1479_v22  ;;  %4153 = vmatpush3.bf16.msra.mxu0 %v4523_v17 }
 0x284   : > { %2288 = vmatprep.mubr.bf16.mxu1 %v3833_v21  ;;  %v4568_v21 = vld [vmem:[%s5045_s20 + $0xc8] sm:$0xff] }
 0x285   : > { %v3857_v22 = vcombine.high %v4567_v20, %v4568_v21  ;;  %v3856_v26 = vcombine.low %v4567_v20, %v4568_v21 }
 0x28b   : > { %2289 = vmatmul.mubr.bf16.vlgmr.msra.gmra.mxu1 %v3832_v24 }
 0x28c   : > { %2296 = vmatprep.mubr.bf16.mxu1 %v3835_v27  ;;  %v4569_v27 = vld [vmem:[%s5045_s20 + $0xd0] sm:$0xff] }
 0x293   : > { %2297 = vmatmul.mubr.bf16.gmra.mxu1 %v3834_v50  ;;  %v4570_v50 = vld [vmem:[%s5045_s20 + $0xd8] sm:$0xff] }
 0x294   : > { %2304 = vmatprep.mubr.bf16.mxu1 %v3837_v23  ;;  %v3859_v28 = vcombine.high %v4569_v27, %v4570_v50  ;;  %v3858_v31 = vcombine.low %v4569_v27, %v4570_v50 }
 0x29b   : > { %2305 = vmatmul.mubr.bf16.gmra.mxu1 %v3836_v30 }
 0x29c   : > { %2312 = vmatprep.mubr.bf16.mxu1 %v3839_v33  ;;  %v4572_v33 = vld [vmem:[%s5045_s20 + $0xe8] sm:$0xff] }
 0x2a3   : > { %2313 = vmatmul.mubr.bf16.gmra.mxu1 %v3838_v34  ;;  %v3861_v34 = vcombine.high %v4571_v32, %v4572_v33 }
 0x2a4   : > { %2320 = vmatprep.mubr.bf16.mxu1 %v3841_v37  ;;  %v3860_v37 = vcombine.low %v4571_v32, %v4572_v33  ;;  %v4587_v32 = vld [vmem:[%s5045_s20 + $0x160] sm:$0xff]  ;;  %v4588_v33 = vld [vmem:[%s5045_s20 + $0x168] sm:$0xff] }
 0x2ab   : > { %2321 = vmatmul.mubr.bf16.gmra.mxu1 %v3840_v38  ;;  %v4573_v38 = vld [vmem:[%s5045_s20 + $0xf0] sm:$0xff] }
 0x2ac   : > { %2328 = vmatprep.mubr.bf16.mxu1 %v3843_v41  ;;  %v3863_v40 = vcombine.high %v4573_v38, %v4574_v39  ;;  %v3862_v43 = vcombine.low %v4573_v38, %v4574_v39  ;;  %v3876_v39 = vcombine.low %v4587_v32, %v4588_v33 }
 0x2b3   : > { %2329 = vmatmul.mubr.bf16.gmra.mxu1 %v3842_v42  ;;  %v5328_v59 = vpop.f32.mrf.mxu1 }
 0x2b4   : > { %2336 = vmatprep.mubr.bf16.mxu1 %v3845_v45  ;;  %v4576_v45 = vld [vmem:[%s5045_s20 + $0x108] sm:$0xff] }
 0x2b5   : > { %v5332_v60 = vpop.f32.mrf.mxu1 }
 0x2b7   : > { %v5334_v56 = vpop.f32.mrf.mxu1 }
 0x2b9   : > { %v5338_v10 = vpop.f32.mrf.mxu1 }
 0x2bb   : > { %2337 = vmatmul.mubr.bf16.gmra.mxu1 %v3844_v46  ;;  %v3865_v46 = vcombine.high %v4575_v44, %v4576_v45 }
 0x2bc   : > { %2344 = vmatprep.mubr.bf16.mxu1 %v3847_v49  ;;  %v3864_v49 = vcombine.low %v4575_v44, %v4576_v45 }
 0x2c3   : > { %2345 = vmatmul.mubr.bf16.gmra.mxu1 %v3846_v53  ;;  %v5340_v11 = vpop.f32.mrf.mxu1  ;;  %v3867_v53 = vcombine.high %v4577_v51, %v4578_v52  ;;  %v4591_v52 = vld [vmem:[%s5045_s20 + $0x180] sm:$0xff] }
 0x2c4   : > { %2352 = vmatprep.mubr.bf16.mxu1 %v3849_v57 }
 0x2c5   : > { %v5342_v12 = vpop.f32.mrf.mxu1 }
 0x2c7   : > { %v5346_v13 = vpop.f32.mrf.mxu1 }
 0x2c9   : > { %v5348_v18 = vpop.f32.mrf.mxu1 }
 0x2cb   : > { %2353 = vmatmul.mubr.bf16.gmra.mxu1 %v3848_v61  ;;  %v4579_v61 = vld [vmem:[%s5045_s20 + $0x120] sm:$0xff] }
 0x2cc   : > { %2360 = vmatprep.mubr.bf16.mxu1 %v3851_v1  ;;  %v3869_v63 = vcombine.high %v4579_v61, %v4580_v62  ;;  %v3868_v4 = vcombine.low %v4579_v61, %v4580_v62 }
 0x2d3   : > { %2361 = vmatmul.mubr.bf16.gmra.mxu1 %v3850_v5  ;;  %v5352_v24 = vpop.f32.mrf.mxu1  ;;  %v4581_v5 = vld [vmem:[%s5045_s20 + $0x130] sm:$0xff] }
 0x2d4   : > { %2368 = vmatprep.mubr.bf16.mxu1 %v3853_v8  ;;  %v3871_v6 = vcombine.high %v4581_v5, %v4582_v0  ;;  %v3870_v7 = vcombine.low %v4581_v5, %v4582_v0  ;;  %v4536_v5 = vld [vmem:[#allocation11 + $0x30] sm:$0xff]  }
 0x2d5   : > { %v5354_v25 = vpop.f32.mrf.mxu1 }
 0x2d7   : > { %v5358_v29 = vpop.f32.mrf.mxu1 }
 0x2d9   : > { %v5360_v23 = vpop.f32.mrf.mxu1 }
 0x2db   : > { %2369 = vmatmul.mubr.bf16.gmra.mxu1 %v3852_v14  ;;  %v4583_v14 = vld [vmem:[%s5045_s20 + $0x140] sm:$0xff] }
 0x2dc   : > { %2376 = vmatprep.mubr.bf16.mxu1 %v3855_v3  ;;  %v3873_v16 = vcombine.high %v4583_v14, %v4584_v15  ;;  %v3872_v21 = vcombine.low %v4583_v14, %v4584_v15  ;;  %v4593_v14 = vld [vmem:[%s5045_s20 + $0x190] sm:$0xff]  ;;  %v4594_v15 = vld [vmem:[%s5045_s20 + $0x198] sm:$0xff] }
 0x2e3   : > { %2377 = vmatmul.mubr.bf16.gmra.mxu1 %v3854_v19  ;;  %v5362_v30 = vpop.f32.mrf.mxu1  ;;  %v4535_v19 = vld [vmem:[#allocation11 + $0x38] sm:$0xff]  }
 0x2e4   : > { %2384 = vmatprep.mubr.bf16.mxu1 %v3857_v22  ;;  %v4585_v22 = vld [vmem:[%s5045_s20 + $0x150] sm:$0xff]  ;;  %4218 = vmatprep.subr.bf16.mxu1 %v4535_v19 }
 0x2e5   : > { %v5366_v35 = vpop.f32.mrf.mxu1  ;;  %4219 = vmatpush3.bf16.msra.mxu1 %v4535_v19 }
 0x2e6   : > { %4220 = vmatprep.subr.bf16.mxu1 %v4536_v5 }
 0x2e7   : > { %v5368_v36 = vpop.f32.mrf.mxu1 }
 0x2e9   : > { %v5372_v41 = vpop.f32.mrf.mxu1  ;;  %4221 = vmatpush3.bf16.msra.mxu1 %v4536_v5 }
 0x2eb   : > { %2385 = vmatmul.mubr.bf16.gmra.mxu1 %v3856_v26  ;;  %v4586_v26 = vld [vmem:[%s5045_s20 + $0x158] sm:$0xff] }
 0x2ec   : > { %2392 = vmatprep.mubr.bf16.mxu1 %v3859_v28  ;;  %v3875_v27 = vcombine.high %v4585_v22, %v4586_v26 }
 0x2f3   : > { %2393 = vmatmul.mubr.bf16.gmra.mxu1 %v3858_v31  ;;  %v5374_v42 = vpop.f32.mrf.mxu1  ;;  %v3874_v31 = vcombine.low %v4585_v22, %v4586_v26 }
 0x2f4   : > { %2400 = vmatprep.mubr.bf16.mxu1 %v3861_v34  ;;  %v3877_v34 = vcombine.high %v4587_v32, %v4588_v33 }
 0x2f5   : > { %v5378_v47 = vpop.f32.mrf.mxu1 }
 0x2f7   : > { %v5380_v48 = vpop.f32.mrf.mxu1 }
 0x2f9   : > { %v5384_v54 = vpop.f32.mrf.mxu1 }
 0x2fb   : > { %2401 = vmatmul.mubr.bf16.gmra.mxu1 %v3860_v37 }
 0x2fc   : > { %2408 = vmatprep.mubr.bf16.mxu1 %v3863_v40  ;;  %v4589_v40 = vld [vmem:[%s5045_s20 + $0x170] sm:$0xff] }
 0x303   : > { %2409 = vmatmul.mubr.bf16.gmra.mxu1 %v3862_v43  ;;  %v5386_v55 = vpop.f32.mrf.mxu1  ;;  %v4590_v43 = vld [vmem:[%s5045_s20 + $0x178] sm:$0xff] }
 0x304   : > { %2416 = vmatprep.mubr.bf16.mxu1 %v3865_v46  ;;  %v3879_v44 = vcombine.high %v4589_v40, %v4590_v43  ;;  %v3878_v51 = vcombine.low %v4589_v40, %v4590_v43  ;;  %v3882_v40 = vcombine.low %v4593_v14, %v4594_v15 }
 0x305   : > { %v5388_v57 = vpop.f32.mrf.mxu1 }
 0x307   : > { %v5392_v1 = vpop.f32.mrf.mxu1 }
 0x309   : > { %v5394_v2 = vpop.f32.mrf.mxu1 }
 0x30b   : > { %2417 = vmatmul.mubr.bf16.gmra.mxu1 %v3864_v49  ;;  %v4076_v49 = vpop.f32.mrf.mxu0 }
 0x30c   : > { %2424 = vmatprep.mubr.bf16.mxu1 %v3867_v53  ;;  %v4592_v53 = vld [vmem:[%s5045_s20 + $0x188] sm:$0xff] }
 0x30d   : > { %v1585_v62 = vpop.f32.mrf.mxu0 }
 0x30f   : > { %v4077_v0 = vpop.f32.mrf.mxu0 }
 0x311   : > { %v1588_v22 = vpop.f32.mrf.mxu0 }
 0x313   : > { %2425 = vmatmul.mubr.bf16.gmra.mxu1 %v3866_v58  ;;  %v5398_v8 = vpop.f32.mrf.mxu1  ;;  %v3881_v58 = vcombine.high %v4591_v52, %v4592_v53 }
 0x314   : > { %2432 = vmatprep.mubr.bf16.mxu1 %v3869_v63 }
 0x315   : > { %v5400_v9 = vpop.f32.mrf.mxu1 }
 0x317   : > { %v5404_v3 = vpop.f32.mrf.mxu1 }
 0x319   : > { %v5406_v17 = vpop.f32.mrf.mxu1 }
 0x31b   : > { %2433 = vmatmul.mubr.bf16.gmra.mxu1 %v3868_v4 }
 0x31c   : > { %2440 = vmatprep.mubr.bf16.mxu1 %v3871_v6 }
 0x323   : > { %2441 = vmatmul.mubr.bf16.gmra.mxu1 %v3870_v7  ;;  %v5408_v20 = vpop.f32.mrf.mxu1  ;;  %v3880_v7 = vcombine.low %v4591_v52, %v4592_v53 }
 0x324   : > { %2448 = vmatprep.mubr.bf16.mxu1 %v3873_v16  ;;  %v3883_v16 = vcombine.high %v4593_v14, %v4594_v15 }
 0x325   : > { %v5412_v50 = vpop.f32.mrf.mxu1 }
 0x327   : > { %v5414_v28 = vpop.f32.mrf.mxu1 }
 0x329   : > { %v5418_v37 = vpop.f32.mrf.mxu1 }
 0x32b   : > { %2449 = vmatmul.mubr.bf16.gmra.mxu1 %v3872_v21  ;;  %v5445_v21 = vld [vmem:[%s6118_s7] ss:$0 sm:$0xff] }
 0x32c   : > { %2456 = vmatprep.mubr.bf16.mxu1 %v3875_v27  ;;  %v1586_v27 = vadd.f32 %v5445_v21, %v1585_v62  ;;  %v1589_v32 = vadd.f32 %v5445_v21, %v1588_v22  ;;  %v1597_v15 = vadd.f32 %v4077_v0, %v5445_v21 }
 0x333   : > { %2457 = vmatmul.mubr.bf16.gmra.mxu1 %v3874_v31  ;;  %v5420_v38 = vpop.f32.mrf.mxu1 }
 0x334   : > { %2464 = vmatprep.mubr.bf16.mxu1 %v3877_v34  ;;  %v4080_v34 = vpop.f32.mrf.mxu0 }
 0x335   : > { %v5424_v45 = vpop.f32.mrf.mxu1 }
 0x336   : > { %v1601_v5 = vpop.f32.mrf.mxu0 }
 0x337   : > { %v5426_v46 = vpop.f32.mrf.mxu1 }
 0x339   : > { %v5430_v61 = vpop.f32.mrf.mxu1 }
 0x33b   : > { %2465 = vmatmul.mubr.bf16.gmra.mxu1 %v3876_v39 }
 0x33c   : > { %2472 = vmatprep.mubr.bf16.mxu1 %v3879_v44  ;;  %v4595_v44 = vld [vmem:[%s5045_s20 + $0x1a0] sm:$0xff] }
 0x343   : > { %v5432_v63 = vpop.f32.mrf.mxu1  ;;  %2473 = vmatmul.mubr.bf16.gmra.mxu1 %v3878_v51  ;;  %v4596_v51 = vld [vmem:[%s5045_s20 + $0x1a8] sm:$0xff] }
 0x344   : > { %2480 = vmatprep.mubr.bf16.mxu1 %v3881_v58  ;;  %v3885_v52 = vcombine.high %v4595_v44, %v4596_v51 }
 0x345   : > { %v5434_v4 = vpop.f32.mrf.mxu1 }
 0x347   : > { %v5436_v6 = vpop.f32.mrf.mxu1 }
 0x348   : > { %6185 = vst [vmem:[#allocation26_spill] sm:$0xff] %v5436_v6 }
 0x349   : > { %v5440_v19 = vpop.f32.mrf.mxu1 }
 0x34b   : > { %v2290_v26 = vpop.f32.mrf.mxu1  ;;  %2481 = vmatmul.mubr.bf16.gmra.mxu1 %v3880_v7 }
 0x34c   : > { %2488 = vmatprep.mubr.bf16.mxu1 %v3883_v16  ;;  %v5449_v33 = vadd.f32 %v2290_v26, %v1586_v27  ;;  %v1594_v16 = vadd.f32 %v4076_v49, %v5445_v21  ;;  %v4081_v27 = vpop.f32.mrf.mxu0 }
 0x34d   : > { %v2292_v31 = vpop.f32.mrf.mxu1 }
 0x34e   : > { %6186 = vst [vmem:[#allocation27_spill] sm:$0xff] %v5449_v33  ;;  %v2545_v58 = vmax.f32 %v5449_v33, 0.0 }
 0x34f   : > { %v2293_v39 = vpop.f32.mrf.mxu1 }
 0x350   : > { %v5451_v43 = vadd.f32 %v2293_v39, %v1589_v32  ;;  %v3884_v32 = vcombine.low %v4595_v44, %v4596_v51 }
 0x351   : > { %v2295_v53 = vpop.f32.mrf.mxu1 }
 0x352   : > { %6187 = vst [vmem:[#allocation28_spill] sm:$0xff] %v5451_v43  ;;  %v2546_v62 = vmax.f32 %v5451_v43, 0.0  ;;  %v4597_v53 = vld [vmem:[%s5045_s20 + $0x1b0] sm:$0xff]  ;;  %v4598_v43 = vld [vmem:[%s5045_s20 + $0x1b8] sm:$0xff] }
 0x353   : > { %v2298_v7 = vpop.f32.mrf.mxu1  ;;  %2489 = vmatmul.mubr.bf16.gmra.mxu1 %v3882_v40  ;;  %v3887_v33 = vcombine.high %v4597_v53, %v4598_v43 }
 0x354   : > { %v2609_v22 = vpack.c.bf16 %v2546_v62, %v2545_v58  ;;  %2496 = vmatprep.mubr.bf16.mxu1 %v3885_v52  ;;  %v5459_v26 = vadd.f32 %v2298_v7, %v1594_v16  ;;  %v1604_v52 = vpop.f32.mrf.mxu0  ;;  %v1602_v58 = vadd.f32 %v5445_v21, %v1601_v5 }
 0x355   : > { %v2300_v14 = vpop.f32.mrf.mxu1  ;;  %v1605_v51 = vadd.f32 %v5445_v21, %v1604_v52 }
 0x356   : > { %6188 = vst [vmem:[#allocation29_spill] sm:$0xff] %v5459_v26  ;;  %4154 = vmatprep.mubr.bf16.mxu0 %v2609_v22  ;;  %v2547_v40 = vmax.f32 %v5459_v26, 0.0  ;;  %v3886_v22 = vcombine.low %v4597_v53, %v4598_v43  ;;  %v1613_v53 = vadd.f32 %v4081_v27, %v5445_v21 }
 0x357   : > { %v2301_v31 = vpop.f32.mrf.mxu1 }
 0x358   : > { %v5461_v39 = vadd.f32 %v2301_v31, %v1597_v15  ;;  %v4599_v15 = vld [vmem:[%s5045_s20 + $0x1c0] sm:$0xff]  ;;  %v4600_v31 = vld [vmem:[%s5045_s20 + $0x1c8] sm:$0xff] }
 0x359   : > { %v2303_v6 = vpop.f32.mrf.mxu1 }
 0x35a   : > { %6189 = vst [vmem:[#allocation30_spill] sm:$0xff] %v5461_v39  ;;  %v2548_v49 = vmax.f32 %v5461_v39, 0.0  ;;  %v4084_v6 = vpop.f32.mrf.mxu0  ;;  %v3889_v39 = vcombine.high %v4599_v15, %v4600_v31 }
 0x35b   : > { %v2306_v0 = vpop.f32.mrf.mxu1  ;;  %2497 = vmatmul.mubr.bf16.gmra.mxu1 %v3884_v32 }
 0x35c   : > { %v2610_v62 = vpack.c.bf16 %v2548_v49, %v2547_v40  ;;  %2504 = vmatprep.mubr.bf16.mxu1 %v3887_v33  ;;  %v5469_v7 = vadd.f32 %v2306_v0, %v1602_v58  ;;  %v1617_v33 = vpop.f32.mrf.mxu0  ;;  %v1610_v49 = vadd.f32 %v4080_v34, %v5445_v21 }
 0x35d   : > { %v2308_v44 = vpop.f32.mrf.mxu1 }
 0x35e   : > { %6190 = vst [vmem:[#allocation31_spill] sm:$0xff] %v5469_v7  ;;  %4155 = vmatmul.mubr.bf16.vlgmr.msra.gmra.mxu0 %v2610_v62  ;;  %v2549_v32 = vmax.f32 %v5469_v7, 0.0  ;;  %v4085_v58 = vpop.f32.mrf.mxu0  ;;  %v3888_v44 = vcombine.low %v4599_v15, %v4600_v31 }
 0x35f   : > { %v2309_v16 = vpop.f32.mrf.mxu1 }
 0x360   : > { %v5471_v14 = vadd.f32 %v2309_v16, %v1605_v51  ;;  %v4601_v16 = vld [vmem:[%s5045_s20 + $0x1d0] sm:$0xff] }
 0x361   : > { %v2311_v26 = vpop.f32.mrf.mxu1 }
 0x362   : > { %6191 = vst [vmem:[#allocation32_spill] sm:$0xff] %v5471_v14  ;;  %v2550_v5 = vmax.f32 %v5471_v14, 0.0  ;;  %v4537_v26 = vld [vmem:[#allocation11 + $0x28] sm:$0xff]   ;;  %v4602_v14 = vld [vmem:[%s5045_s20 + $0x1d8] sm:$0xff] }
 0x363   : > { %v2314_v40 = vpop.f32.mrf.mxu1  ;;  %2505 = vmatmul.mubr.bf16.gmra.mxu1 %v3886_v22  ;;  %v3891_v7 = vcombine.high %v4601_v16, %v4602_v14  ;;  %4222 = vmatprep.subr.bf16.mxu1 %v4537_v26 }
 0x364   : > { %v2611_v52 = vpack.c.bf16 %v2550_v5, %v2549_v32  ;;  %2512 = vmatprep.mubr.bf16.mxu1 %v3889_v39  ;;  %v5479_v0 = vadd.f32 %v2314_v40, %v1610_v49  ;;  %4223 = vmatpush3.bf16.msra.mxu1 %v4537_v26  ;;  %v1620_v39 = vpop.f32.mrf.mxu0  ;;  %v1618_v5 = vadd.f32 %v5445_v21, %v1617_v33 }
 0x365   : > { %v2316_v43 = vpop.f32.mrf.mxu1  ;;  %v1621_v40 = vadd.f32 %v5445_v21, %v1620_v39 }
 0x366   : > { %6192 = vst [vmem:[#allocation33_spill] sm:$0xff] %v5479_v0  ;;  %4158 = vmatprep.mubr.bf16.mxu0 %v2611_v52  ;;  %v2551_v34 = vmax.f32 %v5479_v0, 0.0  ;;  %v4088_v52 = vpop.f32.mrf.mxu0 }
 0x367   : > { %v2317_v62 = vpop.f32.mrf.mxu1 }
 0x368   : > { %v5481_v51 = vadd.f32 %v2317_v62, %v1613_v53  ;;  %v3890_v53 = vcombine.low %v4601_v16, %v4602_v14  ;;  %v4603_v62 = vld [vmem:[%s5045_s20 + $0x1e0] sm:$0xff]  ;;  %v1633_v33 = vpop.f32.mrf.mxu0  ;;  %v1629_v16 = vadd.f32 %v4085_v58, %v5445_v21 }
 0x369   : > { %v2319_v22 = vpop.f32.mrf.mxu1  ;;  %v1634_v58 = vadd.f32 %v5445_v21, %v1633_v33 }
 0x36a   : > { %6193 = vst [vmem:[#allocation34_spill] sm:$0xff] %v5481_v51  ;;  %v2552_v27 = vmax.f32 %v5481_v51, 0.0  ;;  %v4604_v22 = vld [vmem:[%s5045_s20 + $0x1e8] sm:$0xff] }
 0x36b   : > { %v2322_v32 = vpop.f32.mrf.mxu1  ;;  %2513 = vmatmul.mubr.bf16.gmra.mxu1 %v3888_v44  ;;  %v3893_v51 = vcombine.high %v4603_v62, %v4604_v22 }
 0x36c   : > { %v2612_v15 = vpack.c.bf16 %v2552_v27, %v2551_v34  ;;  %2520 = vmatprep.mubr.bf16.mxu1 %v3891_v7  ;;  %v5489_v49 = vadd.f32 %v2322_v32, %v1618_v5  ;;  %v1626_v27 = vadd.f32 %v4084_v6, %v5445_v21 }
 0x36d   : > { %v2324_v31 = vpop.f32.mrf.mxu1 }
 0x36e   : > { %6194 = vst [vmem:[#allocation35_spill] sm:$0xff] %v5489_v49  ;;  %4159 = vmatmul.mubr.bf16.gmra.mxu0 %v2612_v15  ;;  %v2553_v44 = vmax.f32 %v5489_v49, 0.0  ;;  %v3892_v15 = vcombine.low %v4603_v62, %v4604_v22 }
 0x36f   : > { %v2325_v43 = vpop.f32.mrf.mxu1 }
 0x370   : > { %v5491_v26 = vadd.f32 %v2325_v43, %v1621_v40  ;;  %v4605_v40 = vld [vmem:[%s5045_s20 + $0x1f0] sm:$0xff]  ;;  %v4606_v43 = vld [vmem:[%s5045_s20 + $0x1f8] sm:$0xff]  ;;  %s4737_s20 = scalar_lea.vmem %s6066_s12, 1024 }
 0x371   : > { %v2327_v0 = vpop.f32.mrf.mxu1  ;;  %p4738_p6 = scmp.ne.s32.totalorder %s6066_s12, %s4737_s20  ;;  %p4745_p12 = scmp.lt.s32.totalorder %s4743_s27, %s4737_s20 }
 0x372   : > { %6195 = vst [vmem:[#allocation36_spill] sm:$0xff] %v5491_v26  ;;  %v2554_v7 = vmax.f32 %v5491_v26, 0.0  ;;  %v4089_v0 = vpop.f32.mrf.mxu0  ;;  %v3895_v26 = vcombine.high %v4605_v40, %v4606_v43 }
 0x373   : > { %v2330_v34 = vpop.f32.mrf.mxu1  ;;  %2521 = vmatmul.mubr.bf16.gmra.mxu1 %v3890_v53  ;;  %p4739_p11 = pnand %p4738_p6, %p6263_p4  ;;  %p4746_p7 = por %p4745_p12, %p4744_p1 }
 0x374   : > { %v2613_v39 = vpack.c.bf16 %v2554_v7, %v2553_v44  ;;  %2528 = vmatprep.mubr.bf16.mxu1 %v3893_v51  ;;  %v5499_v32 = vadd.f32 %v2330_v34, %v1626_v27  ;;  %v1636_v51 = vpop.f32.mrf.mxu0 }
 0x375   : > { %v2332_v14 = vpop.f32.mrf.mxu1  ;;  %v1637_v62 = vadd.f32 %v5445_v21, %v1636_v51  ;;  %v1645_v51 = vadd.f32 %v4089_v0, %v5445_v21  ;;  %p4740_p10 = pneg %p4739_p11 }
 0x376   : > { %4162 = vmatprep.mubr.bf16.mxu0 %v2613_v39  ;;  %v2555_v53 = vmax.f32 %v5499_v32, 0.0  ;;  %v4092_v27 = vpop.f32.mrf.mxu0 }
 0x377   : > { %v2333_v5 = vpop.f32.mrf.mxu1  ;;  %p4747_p5 = pnand %p4746_p7, %p4740_p10 }
 0x378   : > { %v5501_v31 = vadd.f32 %v2333_v5, %v1629_v16 }
 0x379   : > { %v2335_v49 = vpop.f32.mrf.mxu1 }
 0x37a   : > { %6196 = vst [vmem:[#allocation37_spill] sm:$0xff] %v5501_v31  ;;  %v2556_v6 = vmax.f32 %v5501_v31, 0.0  ;;  %v3894_v49 = vcombine.low %v4605_v40, %v4606_v43  ;;  %v1649_v31 = vpop.f32.mrf.mxu0  ;;  %v4538_v40 = vld [vmem:[#allocation11 + $0x20] sm:$0xff]  }
 0x37b   : > { %v2338_v44 = vpop.f32.mrf.mxu1  ;;  %2529 = vmatmul.mubr.bf16.gmra.mxu1 %v3892_v15  ;;  %4224 = vmatprep.subr.bf16.mxu1 %v4538_v40 }
 0x37c   : > { %v2614_v7 = vpack.c.bf16 %v2556_v6, %v2555_v53  ;;  %2536 = vmatprep.mubr.bf16.mxu1 %v3895_v26  ;;  %v5509_v22 = vadd.f32 %v2338_v44, %v1634_v58  ;;  %v1642_v26 = vadd.f32 %v4088_v52, %v5445_v21  ;;  %v4093_v43 = vpop.f32.mrf.mxu0  ;;  %4225 = vmatpush3.bf16.msra.mxu1 %v4538_v40 }
 0x37d   : > { %v2340_v34 = vpop.f32.mrf.mxu1 }
 0x37e   : > { %4163 = vmatmul.mubr.bf16.gmra.mxu0 %v2614_v7  ;;  %v2557_v5 = vmax.f32 %v5509_v22, 0.0  ;;  %v1652_v52 = vpop.f32.mrf.mxu0 }
 0x37f   : > { %v2341_v39 = vpop.f32.mrf.mxu1 }
 0x380   : > { %v5511_v14 = vadd.f32 %v2341_v39, %v1637_v62 }
 0x381   : > { %v2343_v16 = vpop.f32.mrf.mxu1 }
 0x382   : > { %6197 = vst [vmem:[#allocation38_spill] sm:$0xff] %v5511_v14  ;;  %v2558_v15 = vmax.f32 %v5511_v14, 0.0  ;;  %v1650_v16 = vadd.f32 %v5445_v21, %v1649_v31  ;;  %v1658_v31 = vadd.f32 %v4092_v27, %v5445_v21 }
 0x383   : > { %v2346_v33 = vpop.f32.mrf.mxu1  ;;  %2537 = vmatmul.mubr.bf16.gmra.mxu1 %v3894_v49 }
 0x384   : > { %v2615_v53 = vpack.c.bf16 %v2558_v15, %v2557_v5  ;;  %v5517_v44 = vadd.f32 %v2346_v33, %v1642_v26  ;;  %v1653_v15 = vadd.f32 %v5445_v21, %v1652_v52  ;;  %v4096_v26 = vpop.f32.mrf.mxu0  ;;  %v1661_v52 = vadd.f32 %v4093_v43, %v5445_v21 }
 0x385   : > { %v2348_v6 = vpop.f32.mrf.mxu1 }
 0x386   : > { %4166 = vmatprep.mubr.bf16.mxu0 %v2615_v53  ;;  %v2559_v62 = vmax.f32 %v5517_v44, 0.0 }
 0x387   : > { %v2349_v58 = vpop.f32.mrf.mxu1 }
 0x388   : > { %v5519_v7 = vadd.f32 %v2349_v58, %v1645_v51 }
 0x389   : > { %v2351_v34 = vpop.f32.mrf.mxu1 }
 0x38a   : > { %6198 = vst [vmem:[#allocation39_spill] sm:$0xff] %v5519_v7  ;;  %v2560_v39 = vmax.f32 %v5519_v7, 0.0  ;;  %v1665_v34 = vpop.f32.mrf.mxu0 }
 0x38b   : > { %v2354_v49 = vpop.f32.mrf.mxu1  ;;  %v1666_v27 = vadd.f32 %v5445_v21, %v1665_v34 }
 0x38c   : > { %v2616_v0 = vpack.c.bf16 %v2560_v39, %v2559_v62  ;;  %v5525_v33 = vadd.f32 %v2354_v49, %v1650_v16  ;;  %v4097_v16 = vpop.f32.mrf.mxu0 }
 0x38d   : > { %v2356_v5 = vpop.f32.mrf.mxu1 }
 0x38e   : > { %6199 = vst [vmem:[#allocation40_spill] sm:$0xff] %v5525_v33  ;;  %4167 = vmatmul.mubr.bf16.gmra.mxu0 %v2616_v0  ;;  %v2561_v40 = vmax.f32 %v5525_v33, 0.0  ;;  %v1668_v33 = vpop.f32.mrf.mxu0 }
 0x38f   : > { %v2357_v53 = vpop.f32.mrf.mxu1 }
 0x390   : > { %v5527_v6 = vadd.f32 %v2357_v53, %v1653_v15 }
 0x391   : > { %v2359_v51 = vpop.f32.mrf.mxu1 }
 0x392   : > { %6200 = vst [vmem:[#allocation41_spill] sm:$0xff] %v5527_v6  ;;  %v2562_v58 = vmax.f32 %v5527_v6, 0.0  ;;  %v4539_v6 = vld [vmem:[#allocation11 + $0x18] sm:$0xff]  }
 0x393   : > { %v2362_v14 = vpop.f32.mrf.mxu1  ;;  %4226 = vmatprep.subr.bf16.mxu1 %v4539_v6 }
 0x394   : > { %v2617_v62 = vpack.c.bf16 %v2562_v58, %v2561_v40  ;;  %v5533_v49 = vadd.f32 %v2362_v14, %v1658_v31  ;;  %4227 = vmatpush3.bf16.msra.mxu1 %v4539_v6  ;;  %v1669_v14 = vadd.f32 %v5445_v21, %v1668_v33  ;;  %v4540_v31 = vld [vmem:[#allocation11 + $0x10] sm:$0xff]   ;;  %v1674_v6 = vadd.f32 %v4096_v26, %v5445_v21 }
 0x395   : > { %v2364_v39 = vpop.f32.mrf.mxu1  ;;  %4228 = vmatprep.subr.bf16.mxu1 %v4540_v31  ;;  %v1677_v33 = vadd.f32 %v4097_v16, %v5445_v21 }
 0x396   : > { %4170 = vmatprep.mubr.bf16.mxu0 %v2617_v62  ;;  %v2563_v53 = vmax.f32 %v5533_v49, 0.0 }
 0x397   : > { %v2365_v0 = vpop.f32.mrf.mxu1 }
 0x398   : > { %v5535_v5 = vadd.f32 %v2365_v0, %v1661_v52  ;;  %4229 = vmatpush3.bf16.msra.mxu1 %v4540_v31 }
 0x399   : > { %v2367_v15 = vpop.f32.mrf.mxu1 }
 0x39a   : > { %v2564_v51 = vmax.f32 %v5535_v5, 0.0  ;;  %v4541_v15 = vld [vmem:[#allocation11 + $0x8] sm:$0xff]  }
 0x39b   : > { %v2370_v7 = vpop.f32.mrf.mxu1  ;;  %4230 = vmatprep.subr.bf16.mxu1 %v4541_v15 }
 0x39c   : > { %v2618_v40 = vpack.c.bf16 %v2564_v51, %v2563_v53  ;;  %v5541_v58 = vadd.f32 %v2370_v7, %v1666_v27  ;;  %4231 = vmatpush3.bf16.msra.mxu1 %v4541_v15  ;;  %v1685_v15 = vadd.f32 %v5445_v21, %v5338_v10  ;;  %v1693_v10 = vadd.f32 %v5334_v56, %v5445_v21 }
 0x39d   : > { %v2372_v43 = vpop.f32.mrf.mxu1  ;;  %v1701_v56 = vadd.f32 %v5445_v21, %v5348_v18  ;;  %v1709_v18 = vadd.f32 %v5346_v13, %v5445_v21  ;;  %v1717_v13 = vadd.f32 %v5445_v21, %v5360_v23  ;;  %v1725_v23 = vadd.f32 %v5358_v29, %v5445_v21 }
 0x39e   : > { %4171 = vmatmul.mubr.bf16.gmra.mxu0 %v2618_v40  ;;  %v2565_v0 = vmax.f32 %v5541_v58, 0.0  ;;  %v4542_v40 = vld [vmem:[#allocation11] sm:$0xff]   ;;  %v1733_v29 = vadd.f32 %v5445_v21, %v5372_v41  ;;  %v1741_v41 = vadd.f32 %v5368_v36, %v5445_v21  ;;  %v1749_v36 = vadd.f32 %v5445_v21, %v5384_v54 }
 0x39f   : > { %v2373_v62 = vpop.f32.mrf.mxu1  ;;  %4232 = vmatprep.subr.bf16.mxu1 %v4542_v40  ;;  %v1757_v54 = vadd.f32 %v5380_v48, %v5445_v21  ;;  %v1765_v48 = vadd.f32 %v5445_v21, %v5394_v2  ;;  %v1773_v2 = vadd.f32 %v5392_v1, %v5445_v21  ;;  %v1781_v1 = vadd.f32 %v5445_v21, %v5406_v17 }
 0x3a0   : > { %v5543_v39 = vadd.f32 %v2373_v62, %v1669_v14  ;;  %4233 = vmatpush3.bf16.msra.mxu1 %v4542_v40  ;;  %v1789_v17 = vadd.f32 %v5404_v3, %v5445_v21  ;;  %v1797_v3 = vadd.f32 %v5445_v21, %v5418_v37 }
 0x3a1   : > { %v2375_v52 = vpop.f32.mrf.mxu1 }
 0x3a2   : > { %v2566_v34 = vmax.f32 %v5543_v39, 0.0 }
 0x3a3   : > { %v2378_v53 = vpop.f32.mrf.mxu1 }
 0x3a4   : > { %v2619_v51 = vpack.c.bf16 %v2566_v34, %v2565_v0  ;;  %v5549_v27 = vadd.f32 %v2378_v53, %v1674_v6  ;;  %v1682_v0 = vadd.f32 %v5445_v21, %v5332_v60  ;;  %v1690_v60 = vadd.f32 %v5328_v59, %v5445_v21 }
 0x3a5   : > { %v2380_v7 = vpop.f32.mrf.mxu1  ;;  %v1698_v59 = vadd.f32 %v5445_v21, %v5342_v12  ;;  %v1706_v12 = vadd.f32 %v5340_v11, %v5445_v21  ;;  %v1714_v11 = vadd.f32 %v5445_v21, %v5354_v25  ;;  %v1722_v25 = vadd.f32 %v5352_v24, %v5445_v21 }
 0x3a6   : > { %4174 = vmatprep.mubr.bf16.mxu0 %v2619_v51  ;;  %v2567_v62 = vmax.f32 %v5549_v27, 0.0  ;;  %v1730_v24 = vadd.f32 %v5445_v21, %v5366_v35  ;;  %v1738_v35 = vadd.f32 %v5362_v30, %v5445_v21  ;;  %v1746_v30 = vadd.f32 %v5445_v21, %v5378_v47 }
 0x3a7   : > { %v2381_v43 = vpop.f32.mrf.mxu1  ;;  %v1754_v47 = vadd.f32 %v5374_v42, %v5445_v21  ;;  %v1762_v42 = vadd.f32 %v5445_v21, %v5388_v57  ;;  %v1770_v57 = vadd.f32 %v5386_v55, %v5445_v21  ;;  %v1778_v55 = vadd.f32 %v5445_v21, %v5400_v9 }
 0x3a8   : > { %v5551_v14 = vadd.f32 %v2381_v43, %v1677_v33  ;;  %v1786_v9 = vadd.f32 %v5398_v8, %v5445_v21  ;;  %v1794_v8 = vadd.f32 %v5445_v21, %v5412_v50 }
 0x3a9   : > { %v2383_v31 = vpop.f32.mrf.mxu1 }
 0x3aa   : > { %v2568_v26 = vmax.f32 %v5551_v14, 0.0 }
 0x3ab   : > { %v2386_v52 = vpop.f32.mrf.mxu1 }
 0x3ac   : > { %v2620_v34 = vpack.c.bf16 %v2568_v26, %v2567_v62  ;;  %v5559_v53 = vadd.f32 %v2386_v52, %v1682_v0 }
 0x3ad   : > { %v2388_v16 = vpop.f32.mrf.mxu1 }
 0x3ae   : > { %4175 = vmatmul.mubr.bf16.gmra.mxu0 %v2620_v34  ;;  %v2569_v33 = vmax.f32 %v5559_v53, 0.0 }
 0x3af   : > { %v2389_v6 = vpop.f32.mrf.mxu1 }
 0x3b0   : > { %v5561_v51 = vadd.f32 %v2389_v6, %v1685_v15 }
 0x3b1   : > { %v2391_v7 = vpop.f32.mrf.mxu1 }
 0x3b2   : > { %v2570_v40 = vmax.f32 %v5561_v51, 0.0 }
 0x3b3   : > { %v2394_v43 = vpop.f32.mrf.mxu1 }
 0x3b4   : > { %v2621_v31 = vpack.c.bf16 %v2570_v40, %v2569_v33  ;;  %v5569_v26 = vadd.f32 %v2394_v43, %v1690_v60 }
 0x3b5   : > { %v2396_v62 = vpop.f32.mrf.mxu1 }
 0x3b6   : > { %4178 = vmatprep.mubr.bf16.mxu0 %v2621_v31  ;;  %v2571_v16 = vmax.f32 %v5569_v26, 0.0 }
 0x3b7   : > { %v2397_v52 = vpop.f32.mrf.mxu1 }
 0x3b8   : > { %v5571_v0 = vadd.f32 %v2397_v52, %v1693_v10 }
 0x3b9   : > { %v2399_v34 = vpop.f32.mrf.mxu1 }
 0x3ba   : > { %v2572_v15 = vmax.f32 %v5571_v0, 0.0 }
 0x3bb   : > { %v2402_v6 = vpop.f32.mrf.mxu1 }
 0x3bc   : > { %v2622_v7 = vpack.c.bf16 %v2572_v15, %v2571_v16  ;;  %v5579_v40 = vadd.f32 %v2402_v6, %v1698_v59 }
 0x3bd   : > { %v2404_v33 = vpop.f32.mrf.mxu1 }
 0x3be   : > { %4179 = vmatmul.mubr.bf16.gmra.mxu0 %v2622_v7  ;;  %v2573_v62 = vmax.f32 %v5579_v40, 0.0 }
 0x3bf   : > { %v2405_v43 = vpop.f32.mrf.mxu1 }
 0x3c0   : > { %v5581_v60 = vadd.f32 %v2405_v43, %v1701_v56 }
 0x3c1   : > { %v2407_v31 = vpop.f32.mrf.mxu1 }
 0x3c2   : > { %v2574_v10 = vmax.f32 %v5581_v60, 0.0 }
 0x3c3   : > { %v2410_v52 = vpop.f32.mrf.mxu1 }
 0x3c4   : > { %v2623_v34 = vpack.c.bf16 %v2574_v10, %v2573_v62  ;;  %v5589_v15 = vadd.f32 %v2410_v52, %v1706_v12 }
 0x3c5   : > { %v2412_v16 = vpop.f32.mrf.mxu1 }
 0x3c6   : > { %4182 = vmatprep.mubr.bf16.mxu0 %v2623_v34  ;;  %v2575_v33 = vmax.f32 %v5589_v15, 0.0 }
 0x3c7   : > { %v2413_v6 = vpop.f32.mrf.mxu1 }
 0x3c8   : > { %v5591_v59 = vadd.f32 %v2413_v6, %v1709_v18 }
 0x3c9   : > { %v2415_v7 = vpop.f32.mrf.mxu1 }
 0x3ca   : > { %v2576_v56 = vmax.f32 %v5591_v59, 0.0 }
 0x3cb   : > { %v2418_v43 = vpop.f32.mrf.mxu1 }
 0x3cc   : > { %v2624_v31 = vpack.c.bf16 %v2576_v56, %v2575_v33  ;;  %v5599_v10 = vadd.f32 %v2418_v43, %v1714_v11 }
 0x3cd   : > { %v2420_v62 = vpop.f32.mrf.mxu1 }
 0x3ce   : > { %4183 = vmatmul.mubr.bf16.gmra.mxu0 %v2624_v31  ;;  %v2577_v16 = vmax.f32 %v5599_v10, 0.0 }
 0x3cf   : > { %v2421_v52 = vpop.f32.mrf.mxu1 }
 0x3d0   : > { %v5601_v12 = vadd.f32 %v2421_v52, %v1717_v13 }
 0x3d1   : > { %v2423_v34 = vpop.f32.mrf.mxu1 }
 0x3d2   : > { %v2578_v18 = vmax.f32 %v5601_v12, 0.0 }
 0x3d3   : > { %v2426_v6 = vpop.f32.mrf.mxu1 }
 0x3d4   : > { %v2625_v7 = vpack.c.bf16 %v2578_v18, %v2577_v16  ;;  %v5609_v56 = vadd.f32 %v2426_v6, %v1722_v25 }
 0x3d5   : > { %v2428_v33 = vpop.f32.mrf.mxu1 }
 0x3d6   : > { %4186 = vmatprep.mubr.bf16.mxu0 %v2625_v7  ;;  %v2579_v62 = vmax.f32 %v5609_v56, 0.0 }
 0x3d7   : > { %v2429_v43 = vpop.f32.mrf.mxu1 }
 0x3d8   : > { %v5611_v11 = vadd.f32 %v2429_v43, %v1725_v23 }
 0x3d9   : > { %v2431_v31 = vpop.f32.mrf.mxu1 }
 0x3da   : > { %v2580_v13 = vmax.f32 %v5611_v11, 0.0 }
 0x3db   : > { %v2434_v52 = vpop.f32.mrf.mxu1 }
 0x3dc   : > { %v2626_v34 = vpack.c.bf16 %v2580_v13, %v2579_v62  ;;  %v5619_v18 = vadd.f32 %v2434_v52, %v1730_v24 }
 0x3dd   : > { %v2436_v16 = vpop.f32.mrf.mxu1 }
 0x3de   : > { %6201 = vst [vmem:[#allocation42_spill] sm:$0xff] %v5619_v18  ;;  %4187 = vmatmul.mubr.bf16.gmra.mxu0 %v2626_v34  ;;  %v2581_v33 = vmax.f32 %v5619_v18, 0.0 }
 0x3df   : > { %v2437_v6 = vpop.f32.mrf.mxu1 }
 0x3e0   : > { %v5621_v25 = vadd.f32 %v2437_v6, %v1733_v29 }
 0x3e1   : > { %v2439_v7 = vpop.f32.mrf.mxu1 }
 0x3e2   : > { %6202 = vst [vmem:[#allocation43_spill] sm:$0xff] %v5621_v25  ;;  %v2582_v23 = vmax.f32 %v5621_v25, 0.0 }
 0x3e3   : > { %v2442_v43 = vpop.f32.mrf.mxu1 }
 0x3e4   : > { %v2627_v31 = vpack.c.bf16 %v2582_v23, %v2581_v33  ;;  %v5629_v13 = vadd.f32 %v2442_v43, %v1738_v35 }
 0x3e5   : > { %v2444_v62 = vpop.f32.mrf.mxu1 }
 0x3e6   : > { %6203 = vst [vmem:[#allocation44_spill] sm:$0xff] %v5629_v13  ;;  %4190 = vmatprep.mubr.bf16.mxu0 %v2627_v31  ;;  %v2583_v16 = vmax.f32 %v5629_v13, 0.0 }
 0x3e7   : > { %v2445_v52 = vpop.f32.mrf.mxu1 }
 0x3e8   : > { %v5631_v24 = vadd.f32 %v2445_v52, %v1741_v41 }
 0x3e9   : > { %v2447_v34 = vpop.f32.mrf.mxu1 }
 0x3ea   : > { %6204 = vst [vmem:[#allocation45_spill] sm:$0xff] %v5631_v24  ;;  %v2584_v29 = vmax.f32 %v5631_v24, 0.0 }
 0x3eb   : > { %v2450_v6 = vpop.f32.mrf.mxu1 }
 0x3ec   : > { %v2628_v7 = vpack.c.bf16 %v2584_v29, %v2583_v16  ;;  %v5639_v23 = vadd.f32 %v2450_v6, %v1746_v30 }
 0x3ed   : > { %v2452_v33 = vpop.f32.mrf.mxu1 }
 0x3ee   : > { %4191 = vmatmul.mubr.bf16.gmra.mxu0 %v2628_v7  ;;  %v2585_v62 = vmax.f32 %v5639_v23, 0.0 }
 0x3ef   : > { %v2453_v43 = vpop.f32.mrf.mxu1 }
 0x3f0   : > { %v5641_v35 = vadd.f32 %v2453_v43, %v1749_v36 }
 0x3f1   : > { %v2455_v31 = vpop.f32.mrf.mxu1 }
 0x3f2   : > { %v2586_v41 = vmax.f32 %v5641_v35, 0.0 }
 0x3f3   : > { %v2458_v52 = vpop.f32.mrf.mxu1 }
 0x3f4   : > { %v2629_v34 = vpack.c.bf16 %v2586_v41, %v2585_v62  ;;  %v5649_v29 = vadd.f32 %v2458_v52, %v1754_v47 }
 0x3f5   : > { %v2460_v16 = vpop.f32.mrf.mxu1 }
 0x3f6   : > { %4194 = vmatprep.mubr.bf16.mxu0 %v2629_v34  ;;  %v2587_v33 = vmax.f32 %v5649_v29, 0.0 }
 0x3f7   : > { %v2461_v6 = vpop.f32.mrf.mxu1 }
 0x3f8   : > { %v5651_v30 = vadd.f32 %v2461_v6, %v1757_v54 }
 0x3f9   : > { %v2463_v7 = vpop.f32.mrf.mxu1 }
 0x3fa   : > { %v2588_v36 = vmax.f32 %v5651_v30, 0.0 }
 0x3fb   : > { %v2466_v43 = vpop.f32.mrf.mxu1 }
 0x3fc   : > { %v2630_v31 = vpack.c.bf16 %v2588_v36, %v2587_v33  ;;  %v5659_v41 = vadd.f32 %v2466_v43, %v1762_v42 }
 0x3fd   : > { %v2468_v62 = vpop.f32.mrf.mxu1 }
 0x3fe   : > { %6205 = vst [vmem:[#allocation46_spill] sm:$0xff] %v5659_v41  ;;  %4195 = vmatmul.mubr.bf16.gmra.mxu0 %v2630_v31  ;;  %v2589_v16 = vmax.f32 %v5659_v41, 0.0 }
 0x3ff   : > { %v2469_v52 = vpop.f32.mrf.mxu1 }
 0x400   : > { %v5661_v47 = vadd.f32 %v2469_v52, %v1765_v48 }
 0x401   : > { %v2471_v34 = vpop.f32.mrf.mxu1 }
 0x402   : > { %6206 = vst [vmem:[#allocation47_spill] sm:$0xff] %v5661_v47  ;;  %v2590_v54 = vmax.f32 %v5661_v47, 0.0  ;;  %v1805_v47 = vadd.f32 %v5414_v28, %v5445_v21  ;;  %v1810_v28 = vadd.f32 %v5445_v21, %v5424_v45 }
 0x403   : > { %v2474_v6 = vpop.f32.mrf.mxu1 }
 0x404   : > { %v2631_v7 = vpack.c.bf16 %v2590_v54, %v2589_v16  ;;  %v5669_v36 = vadd.f32 %v2474_v6, %v1770_v57 }
 0x405   : > { %v2476_v33 = vpop.f32.mrf.mxu1 }
 0x406   : > { %6207 = vst [vmem:[#allocation48_spill] sm:$0xff] %v5669_v36  ;;  %4198 = vmatprep.mubr.bf16.mxu0 %v2631_v7  ;;  %v2591_v62 = vmax.f32 %v5669_v36, 0.0 }
 0x407   : > { %v2477_v43 = vpop.f32.mrf.mxu1 }
 0x408   : > { %v5671_v42 = vadd.f32 %v2477_v43, %v1773_v2 }
 0x409   : > { %v2479_v31 = vpop.f32.mrf.mxu1 }
 0x40a   : > { %6208 = vst [vmem:[#allocation49_spill] sm:$0xff] %v5671_v42  ;;  %v2592_v48 = vmax.f32 %v5671_v42, 0.0 }
 0x40b   : > { %v2482_v52 = vpop.f32.mrf.mxu1 }
 0x40c   : > { %v2632_v34 = vpack.c.bf16 %v2592_v48, %v2591_v62  ;;  %v5679_v54 = vadd.f32 %v2482_v52, %v1778_v55 }
 0x40d   : > { %v2484_v16 = vpop.f32.mrf.mxu1 }
 0x40e   : > { %4199 = vmatmul.mubr.bf16.gmra.mxu0 %v2632_v34  ;;  %v2593_v33 = vmax.f32 %v5679_v54, 0.0 }
 0x40f   : > { %v2485_v6 = vpop.f32.mrf.mxu1 }
 0x410   : > { %v5681_v57 = vadd.f32 %v2485_v6, %v1781_v1 }
 0x411   : > { %v2487_v7 = vpop.f32.mrf.mxu1 }
 0x412   : > { %v2594_v2 = vmax.f32 %v5681_v57, 0.0 }
 0x413   : > { %v2490_v43 = vpop.f32.mrf.mxu1 }
 0x414   : > { %v2633_v31 = vpack.c.bf16 %v2594_v2, %v2593_v33  ;;  %v5689_v48 = vadd.f32 %v2490_v43, %v1786_v9 }
 0x415   : > { %v2492_v62 = vpop.f32.mrf.mxu1 }
 0x416   : > { %4202 = vmatprep.mubr.bf16.mxu0 %v2633_v31  ;;  %v2595_v16 = vmax.f32 %v5689_v48, 0.0 }
 0x417   : > { %v2493_v52 = vpop.f32.mrf.mxu1 }
 0x418   : > { %v5691_v55 = vadd.f32 %v2493_v52, %v1789_v17  ;;  %v5706_v17 = vld [vmem:[%s6119_s8] ss:$0 sm:$0xff] }
 0x419   : > { %v2495_v34 = vpop.f32.mrf.mxu1 }
 0x41a   : > { %v2596_v1 = vmax.f32 %v5691_v55, 0.0 }
 0x41b   : > { %v2498_v6 = vpop.f32.mrf.mxu1 }
 0x41c   : > { %v2634_v7 = vpack.c.bf16 %v2596_v1, %v2595_v16  ;;  %v5699_v2 = vadd.f32 %v2498_v6, %v1794_v8  ;;  %v1802_v8 = vadd.f32 %v5408_v20, %v5445_v21 }
 0x41d   : > { %v2500_v33 = vpop.f32.mrf.mxu1 }
 0x41e   : > { %6209 = vst [vmem:[#allocation50_spill] sm:$0xff] %v5699_v2  ;;  %v4156_v43 = vpop.f32.mrf.mxu0  ;;  %4203 = vmatmul.mubr.bf16.gmra.mxu0 %v2634_v7  ;;  %v2597_v50 = vmax.f32 %v5699_v2, 0.0 }
 0x41f   : > { %v2501_v9 = vpop.f32.mrf.mxu1  ;;  %v2755_v7 = vadd.f32 %v4156_v43, %v5706_v17 }
 0x420   : > { %v5701_v31 = vadd.f32 %v2501_v9, %v1797_v3  ;;  %v2746_v62 = vpop.f32.mrf.mxu0 }
 0x421   : > { %v2503_v52 = vpop.f32.mrf.mxu1  ;;  %v2747_v37 = vadd.f32 %v5706_v17, %v2746_v62  ;;  %v3003_v25 = vmax.f32 %v2755_v7, 0.0 }
 0x422   : > { %6210 = vst [vmem:[#allocation51_spill] sm:$0xff] %v5701_v31  ;;  %v2598_v34 = vmax.f32 %v5701_v31, 0.0  ;;  %v4157_v16 = vpop.f32.mrf.mxu0 }
 0x423   : > { %v2758_v1 = vadd.f32 %v4157_v16, %v5706_v17  ;;  %v2506_v6 = vpop.f32.mrf.mxu1  ;;  %v3001_v62 = vmax.f32 %v2747_v37, 0.0 }
 0x424   : > { %v2749_v33 = vpop.f32.mrf.mxu0  ;;  %v2635_v3 = vpack.c.bf16 %v2598_v34, %v2597_v50  ;;  %v5718_v2 = vadd.f32 %v2506_v6, %v1802_v8  ;;  %v1813_v6 = vadd.f32 %v5445_v21, %v5430_v61  ;;  %v1818_v61 = vadd.f32 %v5420_v38, %v5445_v21 }
 0x425   : > { %v2750_v9 = vadd.f32 %v5706_v17, %v2749_v33  ;;  %v2508_v52 = vpop.f32.mrf.mxu1  ;;  %v3004_v31 = vmax.f32 %v2758_v1, 0.0 }
 0x426   : > { %6211 = vst [vmem:[#allocation52_spill] sm:$0xff] %v5718_v2  ;;  %4206 = vmatprep.mubr.bf16.mxu0 %v2635_v3  ;;  %v2599_v50 = vmax.f32 %v5718_v2, 0.0  ;;  %v6224_v2 = vld [vmem:[#allocation37_spill] sm:$0xff] }
 0x427   : > { %v3002_v16 = vmax.f32 %v2750_v9, 0.0  ;;  %v2509_v42 = vpop.f32.mrf.mxu1  ;;  %v3066_v24 = vpack.c.bf16 %v3004_v31, %v3003_v25 }
 0x428   : > { %v5720_v41 = vadd.f32 %v2509_v42, %v1805_v47 }
 0x429   : > { %v3065_v20 = vpack.c.bf16 %v3002_v16, %v3001_v62  ;;  %v2511_v43 = vpop.f32.mrf.mxu1 }
 0x42a   : > { %6212 = vst [vmem:[#allocation53_spill] sm:$0xff] %v5720_v41  ;;  %v2600_v34 = vmax.f32 %v5720_v41, 0.0 }
 0x42b   : > { %v2514_v33 = vpop.f32.mrf.mxu1  ;;  %4234 = vmatprep.mubr.bf16.mxu1 %v3065_v20 }
 0x42c   : > { %v2636_v1 = vpack.c.bf16 %v2600_v34, %v2599_v50  ;;  %4235 = vmatmul.mubr.bf16.vlgmr.msra.gmra.mxu1 %v3066_v24  ;;  %v5728_v47 = vadd.f32 %v2514_v33, %v1810_v28  ;;  %v1821_v33 = vadd.f32 %v5426_v46, %v5445_v21  ;;  %v1826_v46 = vadd.f32 %v5445_v21, %v5434_v4 }
 0x42d   : > { %v2516_v37 = vpop.f32.mrf.mxu1 }
 0x42e   : > { %v4160_v42 = vpop.f32.mrf.mxu0  ;;  %4207 = vmatmul.mubr.bf16.gmra.mxu0 %v2636_v1  ;;  %v2601_v3 = vmax.f32 %v5728_v47, 0.0 }
 0x42f   : > { %v2517_v25 = vpop.f32.mrf.mxu1  ;;  %v2771_v16 = vadd.f32 %v4160_v42, %v5706_v17 }
 0x430   : > { %v5730_v31 = vadd.f32 %v2517_v25, %v1813_v6  ;;  %v2762_v8 = vpop.f32.mrf.mxu0 }
 0x431   : > { %v2519_v7 = vpop.f32.mrf.mxu1  ;;  %v2763_v24 = vadd.f32 %v5706_v17, %v2762_v8  ;;  %v3007_v8 = vmax.f32 %v2771_v16, 0.0 }
 0x432   : > { %6213 = vst [vmem:[#allocation54_spill] sm:$0xff] %v5730_v31  ;;  %v2602_v9 = vmax.f32 %v5730_v31, 0.0  ;;  %v4161_v45 = vpop.f32.mrf.mxu0 }
 0x433   : > { %v2774_v52 = vadd.f32 %v4161_v45, %v5706_v17  ;;  %v2522_v62 = vpop.f32.mrf.mxu1  ;;  %v3005_v37 = vmax.f32 %v2763_v24, 0.0 }
 0x434   : > { %v2765_v20 = vpop.f32.mrf.mxu0  ;;  %v2637_v43 = vpack.c.bf16 %v2602_v9, %v2601_v3  ;;  %v5742_v1 = vadd.f32 %v2522_v62, %v1818_v61  ;;  %v1829_v62 = vadd.f32 %v5445_v21, %v5440_v19  ;;  %v1834_v19 = vadd.f32 %v5432_v63, %v5445_v21 }
 0x435   : > { %v2766_v50 = vadd.f32 %v5706_v17, %v2765_v20  ;;  %v2524_v34 = vpop.f32.mrf.mxu1  ;;  %v3008_v28 = vmax.f32 %v2774_v52, 0.0 }
 0x436   : > { %4210 = vmatprep.mubr.bf16.mxu0 %v2637_v43  ;;  %v2603_v3 = vmax.f32 %v5742_v1, 0.0 }
 0x437   : > { %v3006_v6 = vmax.f32 %v2766_v50, 0.0  ;;  %v2525_v25 = vpop.f32.mrf.mxu1  ;;  %v3068_v45 = vpack.c.bf16 %v3008_v28, %v3007_v8 }
 0x438   : > { %v5744_v7 = vadd.f32 %v2525_v25, %v1821_v33 }
 0x439   : > { %v3067_v38 = vpack.c.bf16 %v3006_v6, %v3005_v37  ;;  %v2527_v42 = vpop.f32.mrf.mxu1 }
 0x43a   : > { %6214 = vst [vmem:[#allocation55_spill] sm:$0xff] %v5744_v7  ;;  %v2604_v9 = vmax.f32 %v5744_v7, 0.0 }
 0x43b   : > { %v2530_v20 = vpop.f32.mrf.mxu1  ;;  %4238 = vmatprep.mubr.bf16.mxu1 %v3067_v38 }
 0x43c   : > { %v2638_v52 = vpack.c.bf16 %v2604_v9, %v2603_v3  ;;  %4239 = vmatmul.mubr.bf16.gmra.mxu1 %v3068_v45  ;;  %v5752_v61 = vadd.f32 %v2530_v20, %v1826_v46  ;;  %v6217_v20 = vld [vmem:[#allocation26_spill] sm:$0xff] }
 0x43d   : > { %v2532_v24 = vpop.f32.mrf.mxu1  ;;  %v1837_v46 = vadd.f32 %v6217_v20, %v5445_v21 }
 0x43e   : > { %6215 = vst [vmem:[#allocation56_spill] sm:$0xff] %v5752_v61  ;;  %v4164_v16 = vpop.f32.mrf.mxu0  ;;  %4211 = vmatmul.mubr.bf16.gmra.mxu0 %v2638_v52  ;;  %v2605_v28 = vmax.f32 %v5752_v61, 0.0 }
 0x43f   : > { %v2533_v43 = vpop.f32.mrf.mxu1  ;;  %v2787_v38 = vadd.f32 %v4164_v16, %v5706_v17 }
 0x440   : > { %v5754_v50 = vadd.f32 %v2533_v43, %v1829_v62  ;;  %v2778_v34 = vpop.f32.mrf.mxu0 }
 0x441   : > { %v2535_v33 = vpop.f32.mrf.mxu1  ;;  %v2779_v6 = vadd.f32 %v5706_v17, %v2778_v34 }
 0x442   : > { %6216 = vst [vmem:[#allocation57_spill] sm:$0xff] %v5754_v50  ;;  %v2606_v37 = vmax.f32 %v5754_v50, 0.0  ;;  %v4165_v4 = vpop.f32.mrf.mxu0  ;;  %v3011_v33 = vmax.f32 %v2787_v38, 0.0 }
 0x443   : > { %v2790_v25 = vadd.f32 %v4165_v4, %v5706_v17  ;;  %v2538_v8 = vpop.f32.mrf.mxu1  ;;  %v3009_v62 = vmax.f32 %v2779_v6, 0.0 }
 0x444   : > { %v2781_v42 = vpop.f32.mrf.mxu0  ;;  %v2639_v45 = vpack.c.bf16 %v2606_v37, %v2605_v28  ;;  %v5766_v24 = vadd.f32 %v2538_v8, %v1834_v19 }
 0x445   : > { %v2782_v3 = vadd.f32 %v5706_v17, %v2781_v42  ;;  %v2540_v9 = vpop.f32.mrf.mxu1  ;;  %v3012_v52 = vmax.f32 %v2790_v25, 0.0 }
 0x446   : > { %6218 = vst [vmem:[#allocation26_spill] sm:$0xff] %v5766_v24  ;;  %4214 = vmatprep.mubr.bf16.mxu0 %v2639_v45  ;;  %v2607_v28 = vmax.f32 %v5766_v24, 0.0 }
 0x447   : > { %v3010_v43 = vmax.f32 %v2782_v3, 0.0  ;;  %v2541_v34 = vpop.f32.mrf.mxu1  ;;  %v3070_v50 = vpack.c.bf16 %v3012_v52, %v3011_v33 }
 0x448   : > { %v5768_v4 = vadd.f32 %v2541_v34, %v1837_v46 }
 0x449   : > { %v3069_v63 = vpack.c.bf16 %v3010_v43, %v3009_v62  ;;  %v2543_v16 = vpop.f32.mrf.mxu1 }
 0x44a   : > { %6219 = vst [vmem:[#allocation58_spill] sm:$0xff] %v5768_v4  ;;  %v2608_v37 = vmax.f32 %v5768_v4, 0.0  ;;  %v6220_v4 = vld [vmem:[#allocation29_spill] sm:$0xff] }
 0x44b   : > { %4242 = vmatprep.mubr.bf16.mxu1 %v3069_v63 }
 0x44c   : > { %v2640_v42 = vpack.c.bf16 %v2608_v37, %v2607_v28  ;;  %4243 = vmatmul.mubr.bf16.gmra.mxu1 %v3070_v50 }
 0x44e   : > { %v4168_v21 = vpop.f32.mrf.mxu0  ;;  %4215 = vmatmul.mubr.bf16.gmra.mxu0 %v2640_v42 }
 0x44f   : > { %v2803_v38 = vadd.f32 %v4168_v21, %v5706_v17 }
 0x450   : > { %v2794_v25 = vpop.f32.mrf.mxu0 }
 0x451   : > { %v2795_v6 = vadd.f32 %v5706_v17, %v2794_v25  ;;  %v3015_v52 = vmax.f32 %v2803_v38, 0.0 }
 0x452   : > { %v4169_v8 = vpop.f32.mrf.mxu0 }
 0x453   : > { %v2806_v19 = vadd.f32 %v4169_v8, %v5706_v17  ;;  %v3013_v20 = vmax.f32 %v2795_v6, 0.0 }
 0x454   : > { %v2797_v45 = vpop.f32.mrf.mxu0 }
 0x455   : > { %v2798_v3 = vadd.f32 %v5706_v17, %v2797_v45  ;;  %v3016_v9 = vmax.f32 %v2806_v19, 0.0 }
 0x457   : > { %v3014_v46 = vmax.f32 %v2798_v3, 0.0  ;;  %v3072_v43 = vpack.c.bf16 %v3016_v9, %v3015_v52 }
 0x459   : > { %v3071_v62 = vpack.c.bf16 %v3014_v46, %v3013_v20 }
 0x45b   : > { %4246 = vmatprep.mubr.bf16.mxu1 %v3071_v62 }
 0x45c   : > { %4247 = vmatmul.mubr.bf16.gmra.mxu1 %v3072_v43 }
 0x45e   : > { %v4172_v50 = vpop.f32.mrf.mxu0 }
 0x45f   : > { %v2819_v28 = vadd.f32 %v4172_v50, %v5706_v17 }
 0x460   : > { %v2810_v34 = vpop.f32.mrf.mxu0 }
 0x461   : > { %v2811_v63 = vadd.f32 %v5706_v17, %v2810_v34  ;;  %v3019_v6 = vmax.f32 %v2819_v28, 0.0 }
 0x462   : > { %v4173_v33 = vpop.f32.mrf.mxu0 }
 0x463   : > { %v2822_v16 = vadd.f32 %v4173_v33, %v5706_v17  ;;  %v3017_v25 = vmax.f32 %v2811_v63, 0.0 }
 0x464   : > { %v2813_v37 = vpop.f32.mrf.mxu0 }
 0x465   : > { %v2814_v42 = vadd.f32 %v5706_v17, %v2813_v37  ;;  %v3020_v21 = vmax.f32 %v2822_v16, 0.0 }
 0x467   : > { %v3018_v8 = vmax.f32 %v2814_v42, 0.0  ;;  %v3074_v38 = vpack.c.bf16 %v3020_v21, %v3019_v6 }
 0x469   : > { %v3073_v19 = vpack.c.bf16 %v3018_v8, %v3017_v25 }
 0x46b   : > { %4250 = vmatprep.mubr.bf16.mxu1 %v3073_v19 }
 0x46c   : > { %4251 = vmatmul.mubr.bf16.gmra.mxu1 %v3074_v38 }
 0x46e   : > { %v4176_v45 = vpop.f32.mrf.mxu0 }
 0x46f   : > { %v2835_v52 = vadd.f32 %v4176_v45, %v5706_v17 }
 0x470   : > { %v2826_v3 = vpop.f32.mrf.mxu0 }
 0x471   : > { %v2827_v20 = vadd.f32 %v5706_v17, %v2826_v3  ;;  %v3023_v63 = vmax.f32 %v2835_v52, 0.0 }
 0x472   : > { %v4177_v9 = vpop.f32.mrf.mxu0 }
 0x473   : > { %v2838_v46 = vadd.f32 %v4177_v9, %v5706_v17  ;;  %v3021_v34 = vmax.f32 %v2827_v20, 0.0 }
 0x474   : > { %v2829_v62 = vpop.f32.mrf.mxu0 }
 0x475   : > { %v2830_v43 = vadd.f32 %v5706_v17, %v2829_v62  ;;  %v3024_v50 = vmax.f32 %v2838_v46, 0.0 }
 0x477   : > { %v3022_v33 = vmax.f32 %v2830_v43, 0.0  ;;  %v3076_v28 = vpack.c.bf16 %v3024_v50, %v3023_v63 }
 0x479   : > { %v3075_v16 = vpack.c.bf16 %v3022_v33, %v3021_v34 }
 0x47b   : > { %4254 = vmatprep.mubr.bf16.mxu1 %v3075_v16 }
 0x47c   : > { %4255 = vmatmul.mubr.bf16.gmra.mxu1 %v3076_v28 }
 0x47e   : > { %v4180_v37 = vpop.f32.mrf.mxu0 }
 0x47f   : > { %v2851_v6 = vadd.f32 %v4180_v37, %v5706_v17 }
 0x480   : > { %v2842_v42 = vpop.f32.mrf.mxu0 }
 0x481   : > { %v2843_v25 = vadd.f32 %v5706_v17, %v2842_v42  ;;  %v3027_v20 = vmax.f32 %v2851_v6, 0.0 }
 0x482   : > { %v4181_v21 = vpop.f32.mrf.mxu0 }
 0x483   : > { %v2854_v8 = vadd.f32 %v4181_v21, %v5706_v17  ;;  %v3025_v3 = vmax.f32 %v2843_v25, 0.0 }
 0x484   : > { %v2845_v19 = vpop.f32.mrf.mxu0 }
 0x485   : > { %v2846_v38 = vadd.f32 %v5706_v17, %v2845_v19  ;;  %v3028_v45 = vmax.f32 %v2854_v8, 0.0 }
 0x487   : > { %v3026_v9 = vmax.f32 %v2846_v38, 0.0  ;;  %v3078_v52 = vpack.c.bf16 %v3028_v45, %v3027_v20 }
 0x489   : > { %v3077_v46 = vpack.c.bf16 %v3026_v9, %v3025_v3 }
 0x48b   : > { %4258 = vmatprep.mubr.bf16.mxu1 %v3077_v46 }
 0x48c   : > { %4259 = vmatmul.mubr.bf16.gmra.mxu1 %v3078_v52 }
 0x48e   : > { %v4184_v62 = vpop.f32.mrf.mxu0 }
 0x48f   : > { %v2867_v63 = vadd.f32 %v4184_v62, %v5706_v17 }
 0x490   : > { %v2858_v43 = vpop.f32.mrf.mxu0 }
 0x491   : > { %v2859_v34 = vadd.f32 %v5706_v17, %v2858_v43  ;;  %v3031_v25 = vmax.f32 %v2867_v63, 0.0 }
 0x492   : > { %v4185_v50 = vpop.f32.mrf.mxu0 }
 0x493   : > { %v2870_v33 = vadd.f32 %v4185_v50, %v5706_v17  ;;  %v3029_v42 = vmax.f32 %v2859_v34, 0.0 }
 0x494   : > { %v2861_v16 = vpop.f32.mrf.mxu0 }
 0x495   : > { %v2862_v28 = vadd.f32 %v5706_v17, %v2861_v16  ;;  %v3032_v37 = vmax.f32 %v2870_v33, 0.0 }
 0x497   : > { %v3030_v21 = vmax.f32 %v2862_v28, 0.0  ;;  %v3080_v6 = vpack.c.bf16 %v3032_v37, %v3031_v25 }
 0x499   : > { %v3079_v8 = vpack.c.bf16 %v3030_v21, %v3029_v42 }
 0x49b   : > { %4262 = vmatprep.mubr.bf16.mxu1 %v3079_v8 }
 0x49c   : > { %4263 = vmatmul.mubr.bf16.gmra.mxu1 %v3080_v6 }
 0x49e   : > { %v4188_v19 = vpop.f32.mrf.mxu0 }
 0x49f   : > { %v2883_v20 = vadd.f32 %v4188_v19, %v5706_v17 }
 0x4a0   : > { %v2874_v38 = vpop.f32.mrf.mxu0 }
 0x4a1   : > { %v2875_v3 = vadd.f32 %v5706_v17, %v2874_v38  ;;  %v3035_v34 = vmax.f32 %v2883_v20, 0.0 }
 0x4a2   : > { %v4189_v45 = vpop.f32.mrf.mxu0 }
 0x4a3   : > { %v2886_v9 = vadd.f32 %v4189_v45, %v5706_v17  ;;  %v3033_v43 = vmax.f32 %v2875_v3, 0.0 }
 0x4a4   : > { %v2877_v46 = vpop.f32.mrf.mxu0 }
 0x4a5   : > { %v2878_v52 = vadd.f32 %v5706_v17, %v2877_v46  ;;  %v3036_v62 = vmax.f32 %v2886_v9, 0.0 }
 0x4a7   : > { %v3034_v50 = vmax.f32 %v2878_v52, 0.0  ;;  %v3082_v63 = vpack.c.bf16 %v3036_v62, %v3035_v34 }
 0x4a9   : > { %v3081_v33 = vpack.c.bf16 %v3034_v50, %v3033_v43 }
 0x4ab   : > { %4266 = vmatprep.mubr.bf16.mxu1 %v3081_v33 }
 0x4ac   : > { %4267 = vmatmul.mubr.bf16.gmra.mxu1 %v3082_v63 }
 0x4ae   : > { %v4192_v16 = vpop.f32.mrf.mxu0 }
 0x4af   : > { %v2899_v25 = vadd.f32 %v4192_v16, %v5706_v17 }
 0x4b0   : > { %v2890_v28 = vpop.f32.mrf.mxu0 }
 0x4b1   : > { %v2891_v42 = vadd.f32 %v5706_v17, %v2890_v28  ;;  %v3039_v3 = vmax.f32 %v2899_v25, 0.0 }
 0x4b2   : > { %v4193_v37 = vpop.f32.mrf.mxu0 }
 0x4b3   : > { %v2902_v21 = vadd.f32 %v4193_v37, %v5706_v17  ;;  %v3037_v38 = vmax.f32 %v2891_v42, 0.0 }
 0x4b4   : > { %v2893_v8 = vpop.f32.mrf.mxu0 }
 0x4b5   : > { %v2894_v6 = vadd.f32 %v5706_v17, %v2893_v8  ;;  %v3040_v19 = vmax.f32 %v2902_v21, 0.0 }
 0x4b7   : > { %v3038_v45 = vmax.f32 %v2894_v6, 0.0  ;;  %v3084_v20 = vpack.c.bf16 %v3040_v19, %v3039_v3 }
 0x4b9   : > { %v3083_v9 = vpack.c.bf16 %v3038_v45, %v3037_v38 }
 0x4bb   : > { %4270 = vmatprep.mubr.bf16.mxu1 %v3083_v9 }
 0x4bc   : > { %4271 = vmatmul.mubr.bf16.gmra.mxu1 %v3084_v20 }
 0x4be   : > { %v4196_v46 = vpop.f32.mrf.mxu0 }
 0x4bf   : > { %v2915_v34 = vadd.f32 %v4196_v46, %v5706_v17 }
 0x4c0   : > { %v2906_v52 = vpop.f32.mrf.mxu0 }
 0x4c1   : > { %v2907_v43 = vadd.f32 %v5706_v17, %v2906_v52  ;;  %v3043_v42 = vmax.f32 %v2915_v34, 0.0 }
 0x4c2   : > { %v4197_v62 = vpop.f32.mrf.mxu0 }
 0x4c3   : > { %v2918_v50 = vadd.f32 %v4197_v62, %v5706_v17  ;;  %v3041_v28 = vmax.f32 %v2907_v43, 0.0 }
 0x4c4   : > { %v2909_v33 = vpop.f32.mrf.mxu0 }
 0x4c5   : > { %v2910_v63 = vadd.f32 %v5706_v17, %v2909_v33  ;;  %v3044_v16 = vmax.f32 %v2918_v50, 0.0 }
 0x4c7   : > { %v3042_v37 = vmax.f32 %v2910_v63, 0.0  ;;  %v3086_v25 = vpack.c.bf16 %v3044_v16, %v3043_v42 }
 0x4c9   : > { %v3085_v21 = vpack.c.bf16 %v3042_v37, %v3041_v28 }
 0x4cb   : > { %4274 = vmatprep.mubr.bf16.mxu1 %v3085_v21 }
 0x4cc   : > { %4275 = vmatmul.mubr.bf16.gmra.mxu1 %v3086_v25 }
 0x4ce   : > { %v4200_v8 = vpop.f32.mrf.mxu0 }
 0x4cf   : > { %v2931_v3 = vadd.f32 %v4200_v8, %v5706_v17 }
 0x4d0   : > { %v2922_v6 = vpop.f32.mrf.mxu0 }
 0x4d1   : > { %v2923_v38 = vadd.f32 %v5706_v17, %v2922_v6  ;;  %v3047_v43 = vmax.f32 %v2931_v3, 0.0 }
 0x4d2   : > { %v4201_v19 = vpop.f32.mrf.mxu0 }
 0x4d3   : > { %v2934_v45 = vadd.f32 %v4201_v19, %v5706_v17  ;;  %v3045_v52 = vmax.f32 %v2923_v38, 0.0 }
 0x4d4   : > { %v2925_v9 = vpop.f32.mrf.mxu0 }
 0x4d5   : > { %v2926_v20 = vadd.f32 %v5706_v17, %v2925_v9  ;;  %v3048_v46 = vmax.f32 %v2934_v45, 0.0 }
 0x4d7   : > { %v3046_v62 = vmax.f32 %v2926_v20, 0.0  ;;  %v3088_v34 = vpack.c.bf16 %v3048_v46, %v3047_v43 }
 0x4d9   : > { %v3087_v50 = vpack.c.bf16 %v3046_v62, %v3045_v52 }
 0x4db   : > { %4278 = vmatprep.mubr.bf16.mxu1 %v3087_v50 }
 0x4dc   : > { %4279 = vmatmul.mubr.bf16.gmra.mxu1 %v3088_v34 }
 0x4de   : > { %v4204_v33 = vpop.f32.mrf.mxu0 }
 0x4df   : > { %v2947_v42 = vadd.f32 %v4204_v33, %v5706_v17 }
 0x4e0   : > { %v2938_v63 = vpop.f32.mrf.mxu0 }
 0x4e1   : > { %v2939_v28 = vadd.f32 %v5706_v17, %v2938_v63  ;;  %v3051_v38 = vmax.f32 %v2947_v42, 0.0 }
 0x4e2   : > { %v4205_v16 = vpop.f32.mrf.mxu0 }
 0x4e3   : > { %v2950_v37 = vadd.f32 %v4205_v16, %v5706_v17  ;;  %v3049_v6 = vmax.f32 %v2939_v28, 0.0 }
 0x4e4   : > { %v2941_v21 = vpop.f32.mrf.mxu0 }
 0x4e5   : > { %v2942_v25 = vadd.f32 %v5706_v17, %v2941_v21  ;;  %v3052_v8 = vmax.f32 %v2950_v37, 0.0 }
 0x4e7   : > { %v3050_v19 = vmax.f32 %v2942_v25, 0.0  ;;  %v3090_v3 = vpack.c.bf16 %v3052_v8, %v3051_v38 }
 0x4e9   : > { %v3089_v45 = vpack.c.bf16 %v3050_v19, %v3049_v6 }
 0x4eb   : > { %4282 = vmatprep.mubr.bf16.mxu1 %v3089_v45 }
 0x4ec   : > { %4283 = vmatmul.mubr.bf16.gmra.mxu1 %v3090_v3  ;;  %v4236_v20 = vpop.f32.mrf.mxu1 }
 0x4ee   : > { %v4208_v9 = vpop.f32.mrf.mxu0  ;;  %v3202_v34 = vpop.f32.mrf.mxu1 }
 0x4ef   : > { %v2963_v50 = vadd.f32 %v4208_v9, %v5706_v17 }
 0x4f0   : > { %v2954_v46 = vpop.f32.mrf.mxu0  ;;  %v4237_v21 = vpop.f32.mrf.mxu1 }
 0x4f1   : > { %v2955_v62 = vadd.f32 %v5706_v17, %v2954_v46  ;;  %v3055_v42 = vmax.f32 %v2963_v50, 0.0 }
 0x4f2   : > { %v4209_v52 = vpop.f32.mrf.mxu0  ;;  %v3205_v6 = vpop.f32.mrf.mxu1 }
 0x4f3   : > { %v2966_v43 = vadd.f32 %v4209_v52, %v5706_v17  ;;  %v3053_v28 = vmax.f32 %v2955_v62, 0.0 }
 0x4f4   : > { %v2957_v33 = vpop.f32.mrf.mxu0 }
 0x4f5   : > { %v2958_v63 = vadd.f32 %v5706_v17, %v2957_v33  ;;  %v3056_v16 = vmax.f32 %v2966_v43, 0.0 }
 0x4f7   : > { %v3054_v37 = vmax.f32 %v2958_v63, 0.0  ;;  %v3092_v8 = vpack.c.bf16 %v3056_v16, %v3055_v42 }
 0x4f9   : > { %v3091_v25 = vpack.c.bf16 %v3054_v37, %v3053_v28  ;;  %v5823_v37 = vld [vmem:[%s6120_s9] ss:$0 sm:$0xff] }
 0x4fb   : > { %4286 = vmatprep.mubr.bf16.mxu1 %v3091_v25 }
 0x4fc   : > { %4287 = vmatmul.mubr.bf16.gmra.mxu1 %v3092_v8  ;;  %v4240_v19 = vpop.f32.mrf.mxu1 }
 0x4fe   : > { %v4212_v38 = vpop.f32.mrf.mxu0  ;;  %v3218_v3 = vpop.f32.mrf.mxu1 }
 0x4ff   : > { %v2979_v43 = vadd.f32 %v4212_v38, %v5706_v17 }
 0x500   : > { %v2970_v45 = vpop.f32.mrf.mxu0  ;;  %v4241_v33 = vpop.f32.mrf.mxu1 }
 0x501   : > { %v2971_v9 = vadd.f32 %v5706_v17, %v2970_v45  ;;  %v3059_v42 = vmax.f32 %v2979_v43, 0.0 }
 0x502   : > { %v4213_v46 = vpop.f32.mrf.mxu0  ;;  %v3221_v45 = vpop.f32.mrf.mxu1 }
 0x503   : > { %v2982_v52 = vadd.f32 %v4213_v46, %v5706_v17  ;;  %v3057_v16 = vmax.f32 %v2971_v9, 0.0  ;;  %v3211_v46 = vadd.f32 %v4236_v20, %v5823_v37 }
 0x504   : > { %v2973_v62 = vpop.f32.mrf.mxu0 }
 0x505   : > { %v2974_v50 = vadd.f32 %v5706_v17, %v2973_v62  ;;  %v3060_v63 = vmax.f32 %v2982_v52, 0.0  ;;  %v3203_v62 = vadd.f32 %v5823_v37, %v3202_v34  ;;  %v5829_v61 = vadd.f32 %v3211_v46, %v6220_v4 }
 0x506   : > { %v3206_v34 = vadd.f32 %v5823_v37, %v3205_v6 }
 0x507   : > { %v3058_v28 = vmax.f32 %v2974_v50, 0.0  ;;  %v3094_v8 = vpack.c.bf16 %v3060_v63, %v3059_v42  ;;  %v3214_v63 = vadd.f32 %v4237_v21, %v5823_v37 }
 0x509   : > { %v3093_v25 = vpack.c.bf16 %v3058_v28, %v3057_v16  ;;  %v6221_v28 = vld [vmem:[#allocation27_spill] sm:$0xff] }
 0x50a   : > { %v5837_v42 = vadd.f32 %v3203_v62, %v6221_v28  ;;  %v6223_v28 = vld [vmem:[#allocation30_spill] sm:$0xff] }
 0x50b   : > { %4290 = vmatprep.mubr.bf16.mxu1 %v3093_v25  ;;  %v3460_v41 = vadd.f32 %v3214_v63, %v6223_v28  ;;  %v3227_v63 = vadd.f32 %v4240_v19, %v5823_v37  ;;  %v3222_v19 = vadd.f32 %v5823_v37, %v3221_v45 }
 0x50c   : > { %v4244_v38 = vpop.f32.mrf.mxu1  ;;  %4291 = vmatmul.mubr.bf16.gmra.mxu1 %v3094_v8  ;;  %v6222_v8 = vld [vmem:[#allocation35_spill] sm:$0xff] }
 0x50d   : > { %v3243_v52 = vadd.f32 %v4244_v38, %v5823_v37 }
 0x50e   : > { %v4216_v9 = vpop.f32.mrf.mxu0  ;;  %v3234_v50 = vpop.f32.mrf.mxu1 }
 0x50f   : > { %v5832_v24 = vadd.f32 %v3243_v52, %v5499_v32  ;;  %v3235_v43 = vadd.f32 %v5823_v37, %v3234_v50  ;;  %v2995_v6 = vadd.f32 %v4216_v9, %v5706_v17 }
 0x510   : > { %v2986_v20 = vpop.f32.mrf.mxu0  ;;  %v4245_v16 = vpop.f32.mrf.mxu1 }
 0x511   : > { %v3523_v25 = vmax.f32 %v5829_v61, %v5832_v24  ;;  %v3465_v4 = vadd.f32 %v3235_v43, %v6222_v8  ;;  %v3246_v46 = vadd.f32 %v4245_v16, %v5823_v37  ;;  %v2987_v21 = vadd.f32 %v5706_v17, %v2986_v20  ;;  %v6225_v43 = vld [vmem:[#allocation28_spill] sm:$0xff] }
 0x512   : > { %v4217_v32 = vpop.f32.mrf.mxu0  ;;  %v3237_v38 = vpop.f32.mrf.mxu1  ;;  %v3458_v8 = vadd.f32 %v3206_v34, %v6225_v43  ;;  %v6226_v16 = vld [vmem:[#allocation36_spill] sm:$0xff]  ;;  %v3063_v31 = vmax.f32 %v2995_v6, 0.0 }
 0x513   : > { %v3521_v52 = vmax.f32 %v5837_v42, %v3465_v4  ;;  %v2998_v50 = vadd.f32 %v4217_v32, %v5706_v17  ;;  %v3238_v62 = vadd.f32 %v5823_v37, %v3237_v38  ;;  %v3468_v61 = vadd.f32 %v3246_v46, %v6224_v2 }
 0x514   : > { %v2989_v24 = vpop.f32.mrf.mxu0  ;;  %v3061_v20 = vmax.f32 %v2987_v21, 0.0  ;;  %v3219_v2 = vadd.f32 %v5823_v37, %v3218_v3  ;;  %v6228_v21 = vld [vmem:[#allocation31_spill] sm:$0xff] }
 0x515   : > { %v3466_v36 = vadd.f32 %v3238_v62, %v6226_v16  ;;  %v2990_v18 = vadd.f32 %v5706_v17, %v2989_v24  ;;  %v3524_v42 = vmax.f32 %v3460_v41, %v3468_v61  ;;  %v3064_v4 = vmax.f32 %v2998_v50, 0.0  ;;  %v6227_v62 = vld [vmem:[#allocation33_spill] sm:$0xff]  ;;  %v6229_v61 = vld [vmem:[#allocation34_spill] sm:$0xff]  ;;  %v6231_v16 = vld [vmem:[#allocation32_spill] sm:$0xff] }
 0x516   : > { %v3463_v17 = vadd.f32 %v3227_v63, %v6227_v62  ;;  %v3230_v41 = vadd.f32 %v4241_v33, %v5823_v37 }
 0x517   : > { %v3522_v13 = vmax.f32 %v3458_v8, %v3466_v36  ;;  %v3062_v32 = vmax.f32 %v2990_v18, 0.0  ;;  %v3096_v7 = vpack.c.bf16 %v3064_v4, %v3063_v31  ;;  %v3461_v31 = vadd.f32 %v3219_v2, %v6228_v21  ;;  %v6230_v8 = vld [vmem:[#allocation39_spill] sm:$0xff] }
 0x518   : > { %v3464_v24 = vadd.f32 %v3230_v41, %v6229_v61  ;;  %v3462_v4 = vadd.f32 %v3222_v19, %v6231_v16 }
 0x519   : > { %v3095_v38 = vpack.c.bf16 %v3062_v32, %v3061_v20  ;;  %v6232_v32 = vld [vmem:[#allocation38_spill] sm:$0xff] }
 0x51b   : > { %4294 = vmatprep.mubr.bf16.mxu1 %v3095_v38 }
 0x51c   : > { %v4248_v9 = vpop.f32.mrf.mxu1  ;;  %4295 = vmatmul.mubr.bf16.gmra.mxu1 %v3096_v7 }
 0x51d   : > { %v3259_v34 = vadd.f32 %v4248_v9, %v5823_v37 }
 0x51e   : > { %v3250_v46 = vpop.f32.mrf.mxu1 }
 0x51f   : > { %v3471_v36 = vadd.f32 %v3259_v34, %v5517_v44  ;;  %v3251_v18 = vadd.f32 %v5823_v37, %v3250_v46 }
 0x520   : > { %v4249_v50 = vpop.f32.mrf.mxu1 }
 0x521   : > { %v3527_v28 = vmax.f32 %v3463_v17, %v3471_v36  ;;  %v3469_v3 = vadd.f32 %v3251_v18, %v5509_v22  ;;  %v3262_v7 = vadd.f32 %v4249_v50, %v5823_v37  ;;  %v6233_v17 = vld [vmem:[#allocation40_spill] sm:$0xff] }
 0x522   : > { %v3253_v6 = vpop.f32.mrf.mxu1 }
 0x523   : > { %v3525_v43 = vmax.f32 %v3461_v31, %v3469_v3  ;;  %v3472_v33 = vadd.f32 %v3262_v7, %v6230_v8  ;;  %v3254_v44 = vadd.f32 %v5823_v37, %v3253_v6  ;;  %v6234_v3 = vld [vmem:[#allocation41_spill] sm:$0xff] }
 0x525   : > { %v3528_v20 = vmax.f32 %v3464_v24, %v3472_v33  ;;  %v3470_v38 = vadd.f32 %v3254_v44, %v6232_v32 }
 0x527   : > { %v3526_v63 = vmax.f32 %v3462_v4, %v3470_v38 }
 0x52c   : > { %v4252_v45 = vpop.f32.mrf.mxu1 }
 0x52d   : > { %v3275_v2 = vadd.f32 %v4252_v45, %v5823_v37 }
 0x52e   : > { %v3266_v22 = vpop.f32.mrf.mxu1 }
 0x52f   : > { %v3475_v9 = vadd.f32 %v3275_v2, %v5533_v49  ;;  %v3267_v34 = vadd.f32 %v5823_v37, %v3266_v22 }
 0x530   : > { %v4253_v46 = vpop.f32.mrf.mxu1 }
 0x531   : > { %v5873_v62 = vmax.f32 %v3523_v25, %v3475_v9  ;;  %v3473_v41 = vadd.f32 %v3267_v34, %v6233_v17  ;;  %v3278_v36 = vadd.f32 %v4253_v46, %v5823_v37 }
 0x532   : > { %v3269_v18 = vpop.f32.mrf.mxu1 }
 0x533   : > { %v5877_v21 = vmax.f32 %v3521_v52, %v3473_v41  ;;  %v3476_v31 = vadd.f32 %v3278_v36, %v5535_v5  ;;  %v3270_v50 = vadd.f32 %v5823_v37, %v3269_v18 }
 0x535   : > { %v5881_v19 = vmax.f32 %v3524_v42, %v3476_v31  ;;  %v3474_v49 = vadd.f32 %v3270_v50, %v6234_v3 }
 0x537   : > { %v5884_v7 = vmax.f32 %v3522_v13, %v3474_v49 }
 0x53c   : > { %v4256_v6 = vpop.f32.mrf.mxu1 }
 0x53d   : > { %v3291_v25 = vadd.f32 %v4256_v6, %v5823_v37 }
 0x53e   : > { %v3282_v61 = vpop.f32.mrf.mxu1 }
 0x53f   : > { %v3479_v24 = vadd.f32 %v3291_v25, %v5549_v27  ;;  %v3283_v8 = vadd.f32 %v5823_v37, %v3282_v61 }
 0x540   : > { %v4257_v52 = vpop.f32.mrf.mxu1 }
 0x541   : > { %v5889_v33 = vmax.f32 %v3527_v28, %v3479_v24  ;;  %v3477_v5 = vadd.f32 %v3283_v8, %v5541_v58  ;;  %v3294_v42 = vadd.f32 %v4257_v52, %v5823_v37 }
 0x542   : > { %v3285_v44 = vpop.f32.mrf.mxu1 }
 0x543   : > { %v5893_v16 = vmax.f32 %v3525_v43, %v3477_v5  ;;  %v3480_v13 = vadd.f32 %v3294_v42, %v5551_v14  ;;  %v3286_v4 = vadd.f32 %v5823_v37, %v3285_v44 }
 0x545   : > { %v5897_v32 = vmax.f32 %v3528_v20, %v3480_v13  ;;  %v3478_v27 = vadd.f32 %v3286_v4, %v5543_v39 }
 0x547   : > { %v5900_v38 = vmax.f32 %v3526_v63, %v3478_v27 }
 0x549   : > { %6235 = vst [vmem:[#allocation29_spill] sm:$0xff] %v5900_v38 }
 0x54c   : > { %v4260_v45 = vpop.f32.mrf.mxu1 }
 0x54e   : > { %v3298_v28 = vpop.f32.mrf.mxu1 }
 0x550   : > { %v4261_v2 = vpop.f32.mrf.mxu1 }
 0x552   : > { %v3301_v22 = vpop.f32.mrf.mxu1 }
 0x553   : > { %v3302_v38 = vadd.f32 %v5823_v37, %v3301_v22 }
 0x55c   : > { %v4264_v58 = vpop.f32.mrf.mxu1 }
 0x55d   : > { %v3323_v9 = vadd.f32 %v4264_v58, %v5823_v37 }
 0x55e   : > { %v3314_v34 = vpop.f32.mrf.mxu1 }
 0x55f   : > { %v5904_v43 = vadd.f32 %v3323_v9, %v5589_v15  ;;  %v3315_v14 = vadd.f32 %v5823_v37, %v3314_v34 }
 0x560   : > { %v4265_v46 = vpop.f32.mrf.mxu1 }
 0x561   : > { %v5910_v39 = vadd.f32 %v3315_v14, %v5579_v40  ;;  %v3326_v63 = vadd.f32 %v4265_v46, %v5823_v37  ;;  %v3307_v46 = vadd.f32 %v4260_v45, %v5823_v37 }
 0x562   : > { %v3317_v17 = vpop.f32.mrf.mxu1 }
 0x563   : > { %v5916_v36 = vadd.f32 %v3326_v63, %v5591_v59  ;;  %v3318_v15 = vadd.f32 %v5823_v37, %v3317_v17  ;;  %v3299_v63 = vadd.f32 %v5823_v37, %v3298_v28  ;;  %v3483_v41 = vadd.f32 %v3307_v46, %v5569_v26 }
 0x565   : > { %6236 = vst [vmem:[#allocation27_spill] sm:$0xff] %v5916_v36  ;;  %v5922_v31 = vadd.f32 %v3318_v15, %v5581_v60  ;;  %v3310_v15 = vadd.f32 %v4261_v2, %v5823_v37  ;;  %v3481_v20 = vadd.f32 %v3299_v63, %v5559_v53 }
 0x567   : > { %6237 = vst [vmem:[#allocation35_spill] sm:$0xff] %v5922_v31  ;;  %v3484_v2 = vadd.f32 %v3310_v15, %v5571_v0  ;;  %v3482_v0 = vadd.f32 %v3302_v38, %v5561_v51 }
 0x56c   : > { %v4268_v50 = vpop.f32.mrf.mxu1 }
 0x56d   : > { %v3339_v40 = vadd.f32 %v4268_v50, %v5823_v37 }
 0x56e   : > { %v3330_v3 = vpop.f32.mrf.mxu1 }
 0x56f   : > { %v3331_v18 = vadd.f32 %v5823_v37, %v3330_v3  ;;  %v3491_v50 = vadd.f32 %v3339_v40, %v5609_v56 }
 0x570   : > { %v4269_v49 = vpop.f32.mrf.mxu1 }
 0x571   : > { %v3342_v45 = vadd.f32 %v4269_v49, %v5823_v37  ;;  %v3489_v26 = vadd.f32 %v3331_v18, %v5599_v10  ;;  %v3539_v49 = vmax.f32 %v5873_v62, %v3483_v41 }
 0x572   : > { %v3333_v6 = vpop.f32.mrf.mxu1 }
 0x573   : > { %v3334_v53 = vadd.f32 %v5823_v37, %v3333_v6  ;;  %v3492_v56 = vadd.f32 %v3342_v45, %v5611_v11  ;;  %v3540_v6 = vmax.f32 %v5881_v19, %v3484_v2  ;;  %v3538_v19 = vmax.f32 %v5884_v7, %v3482_v0 }
 0x57c   : > { %v5926_v25 = vpop.f32.mrf.mxu1 }
 0x57e   : > { %v5928_v61 = vpop.f32.mrf.mxu1 }
 0x580   : > { %v5930_v59 = vpop.f32.mrf.mxu1 }
 0x581   : > { %v3358_v0 = vadd.f32 %v5930_v59, %v5823_v37 }
 0x582   : > { %v5932_v24 = vpop.f32.mrf.mxu1 }
 0x58c   : > { %v4276_v8 = vpop.f32.mrf.mxu1 }
 0x58d   : > { %v3371_v31 = vadd.f32 %v4276_v8, %v5823_v37 }
 0x58e   : > { %v3362_v52 = vpop.f32.mrf.mxu1 }
 0x58f   : > { %v3363_v28 = vadd.f32 %v5823_v37, %v3362_v52  ;;  %v3537_v52 = vmax.f32 %v5877_v21, %v3481_v20  ;;  %v3499_v46 = vadd.f32 %v3371_v31, %v5649_v29  ;;  %v3490_v29 = vadd.f32 %v3334_v53, %v5601_v12  ;;  %v6238_v53 = vld [vmem:[#allocation55_spill] sm:$0xff] }
 0x590   : > { %v4277_v5 = vpop.f32.mrf.mxu1 }
 0x591   : > { %v3374_v8 = vadd.f32 %v4277_v5, %v5823_v37  ;;  %v3497_v40 = vadd.f32 %v3363_v28, %v5639_v23  ;;  %v3547_v5 = vmax.f32 %v3539_v49, %v3491_v50  ;;  %v3545_v20 = vmax.f32 %v3537_v52, %v3489_v26  ;;  %v6239_v52 = vld [vmem:[#allocation54_spill] sm:$0xff] }
 0x592   : > { %v3365_v60 = vpop.f32.mrf.mxu1  ;;  %v3546_v63 = vmax.f32 %v3538_v19, %v3490_v29  ;;  %v6243_v29 = vld [vmem:[#allocation45_spill] sm:$0xff] }
 0x593   : > { %v3366_v10 = vadd.f32 %v5823_v37, %v3365_v60  ;;  %v3500_v51 = vadd.f32 %v3374_v8, %v5651_v30  ;;  %v3555_v23 = vmax.f32 %v3547_v5, %v3499_v46  ;;  %v3548_v60 = vmax.f32 %v3540_v6, %v3492_v56 }
 0x595   : > { %v3556_v15 = vmax.f32 %v3548_v60, %v3500_v51  ;;  %v3496_v51 = vadd.f32 %v3358_v0, %v6243_v29  ;;  %v6248_v60 = vld [vmem:[#allocation43_spill] sm:$0xff] }
 0x59c   : > { %v5934_v42 = vpop.f32.mrf.mxu1 }
 0x59e   : > { %v5936_v44 = vpop.f32.mrf.mxu1 }
 0x59f   : > { %v3379_v56 = vadd.f32 %v5823_v37, %v5936_v44 }
 0x5a0   : > { %v5938_v13 = vpop.f32.mrf.mxu1 }
 0x5a2   : > { %v5940_v4 = vpop.f32.mrf.mxu1 }
 0x5ac   : > { %v4284_v27 = vpop.f32.mrf.mxu1 }
 0x5ad   : > { %v3403_v3 = vadd.f32 %v4284_v27, %v5823_v37  ;;  %v3498_v27 = vadd.f32 %v3366_v10, %v5641_v35  ;;  %v3355_v35 = vadd.f32 %v5926_v25, %v5823_v37  ;;  %v3387_v25 = vadd.f32 %v5934_v42, %v5823_v37  ;;  %v6241_v42 = vld [vmem:[#allocation42_spill] sm:$0xff] }
 0x5ae   : > { %v3394_v58 = vpop.f32.mrf.mxu1 }
 0x5af   : > { %v3395_v22 = vadd.f32 %v5823_v37, %v3394_v58  ;;  %v3507_v62 = vadd.f32 %v3403_v3, %v5689_v48  ;;  %v3553_v48 = vmax.f32 %v3545_v20, %v3497_v40  ;;  %v3554_v3 = vmax.f32 %v3546_v63, %v3498_v27  ;;  %v6240_v40 = vld [vmem:[#allocation44_spill] sm:$0xff]  ;;  %v6249_v27 = vld [vmem:[#allocation49_spill] sm:$0xff] }
 0x5b0   : > { %v4285_v9 = vpop.f32.mrf.mxu1  ;;  %v3495_v10 = vadd.f32 %v3355_v35, %v6240_v40  ;;  %v6242_v20 = vld [vmem:[#allocation48_spill] sm:$0xff]  ;;  %v6261_v40 = vld [vmem:[#allocation58_spill] sm:$0xff] }
 0x5b1   : > { %v3406_v21 = vadd.f32 %v4285_v9, %v5823_v37  ;;  %v3505_v11 = vadd.f32 %v3395_v22, %v5679_v54  ;;  %v3563_v9 = vmax.f32 %v3555_v23, %v3507_v62  ;;  %v3350_v62 = vadd.f32 %v5823_v37, %v5932_v24 }
 0x5b2   : > { %v3397_v34 = vpop.f32.mrf.mxu1  ;;  %v3503_v44 = vadd.f32 %v3387_v25, %v6242_v20  ;;  %v6245_v23 = vmax.f32 %v5889_v33, %v5904_v43  ;;  %v6260_v25 = vld [vmem:[#allocation56_spill] sm:$0xff] }
 0x5b3   : > { %v3398_v41 = vadd.f32 %v5823_v37, %v3397_v34  ;;  %v3508_v12 = vadd.f32 %v3406_v21, %v5691_v55  ;;  %v3561_v34 = vmax.f32 %v3553_v48, %v3505_v11  ;;  %v3390_v21 = vadd.f32 %v5938_v13, %v5823_v37  ;;  %v6244_v11 = vld [vmem:[#allocation46_spill] sm:$0xff] }
 0x5b4   : > { %v3551_v24 = vmax.f32 %v6245_v23, %v3495_v10  ;;  %v3494_v48 = vadd.f32 %v3350_v62, %v6248_v60 }
 0x5b5   : > { %v3506_v28 = vadd.f32 %v3398_v41, %v5681_v57  ;;  %v3564_v26 = vmax.f32 %v3556_v15, %v3508_v12  ;;  %v6246_v41 = vld [vmem:[#allocation52_spill] sm:$0xff] }
 0x5b7   : > { %v3562_v22 = vmax.f32 %v3554_v3, %v3506_v28  ;;  %v6254_v28 = vld [vmem:[#allocation53_spill] sm:$0xff] }
 0x5b8   : > { %v6256_v3 = vld [vmem:[#allocation29_spill] sm:$0xff] }
 0x5bc   : > { %v5942_v14 = vpop.f32.mrf.mxu1 }
 0x5be   : > { %v5946_v17 = vpop.f32.mrf.mxu1 }
 0x5bf   : > { %v3411_v59 = vadd.f32 %v5823_v37, %v5946_v17  ;;  %v6247_v17 = vmax.f32 %v5893_v16, %v5910_v39  ;;  %v6253_v16 = vld [vmem:[#allocation47_spill] sm:$0xff] }
 0x5c0   : > { %v5957_v36 = vpop.f32.mrf.mxu1 }
 0x5c1   : > { %v3422_v13 = vadd.f32 %v5957_v36, %v5823_v37 }
 0x5c2   : > { %v5973_v18 = vpop.f32.mrf.mxu1 }
 0x5c3   : > { %v3414_v33 = vadd.f32 %v5823_v37, %v5973_v18  ;;  %v6257_v18 = vld [vmem:[#allocation35_spill] sm:$0xff] }
 0x5cc   : > { %v4292_v38 = vpop.f32.mrf.mxu1 }
 0x5cd   : > { %v3435_v31 = vadd.f32 %v4292_v38, %v5823_v37  ;;  %v3382_v38 = vadd.f32 %v5823_v37, %v5940_v4 }
 0x5ce   : > { %v3426_v58 = vpop.f32.mrf.mxu1 }
 0x5cf   : > { %v3515_v30 = vadd.f32 %v3435_v31, %v5742_v1  ;;  %v3427_v54 = vadd.f32 %v5823_v37, %v3426_v58  ;;  %v3504_v58 = vadd.f32 %v3390_v21, %v6249_v27  ;;  %v3502_v39 = vadd.f32 %v3382_v38, %v6253_v16 }
 0x5d0   : > { %v4293_v45 = vpop.f32.mrf.mxu1 }
 0x5d1   : > { %v3571_v2 = vmax.f32 %v3563_v9, %v3515_v30  ;;  %v3513_v7 = vadd.f32 %v3427_v54, %v5728_v47  ;;  %v3438_v50 = vadd.f32 %v4293_v45, %v5823_v37  ;;  %v3347_v47 = vadd.f32 %v5823_v37, %v5928_v61  ;;  %v6250_v9 = vld [vmem:[#allocation50_spill] sm:$0xff]  ;;  %v6251_v54 = vld [vmem:[#allocation27_spill] sm:$0xff] }
 0x5d2   : > { %v3429_v55 = vpop.f32.mrf.mxu1  ;;  %v3419_v61 = vadd.f32 %v5942_v14, %v5823_v37  ;;  %v3501_v14 = vadd.f32 %v3379_v56, %v6244_v11  ;;  %v3509_v12 = vadd.f32 %v3411_v59, %v6250_v9  ;;  %v3559_v30 = vmax.f32 %v3551_v24, %v3503_v44 }
 0x5d3   : > { %3579 = vst [vmem:[%s5994_s26 + $0x10] sm:$0xff] %v3571_v2  ;;  %v3569_v1 = vmax.f32 %v3561_v34, %v3513_v7  ;;  %v3516_v57 = vadd.f32 %v3438_v50, %v6238_v53  ;;  %v3430_v8 = vadd.f32 %v5823_v37, %v3429_v55  ;;  %v3493_v5 = vadd.f32 %v3347_v47, %v6241_v42  ;;  %v6255_v7 = vld [vmem:[#allocation26_spill] sm:$0xff] }
 0x5d4   : > { %v3511_v31 = vadd.f32 %v3419_v61, %v6246_v41  ;;  %v6252_v36 = vmax.f32 %v5897_v32, %v6251_v54  ;;  %v3512_v2 = vadd.f32 %v3422_v13, %v6254_v28  ;;  %v6258_v55 = vmax.f32 %v6256_v3, %v6257_v18 }
 0x5d5   : > { %3577 = vst [vmem:[%s5994_s26] sm:$0xff] %v3569_v1  ;;  %v3572_v49 = vmax.f32 %v3564_v26, %v3516_v57  ;;  %v3514_v46 = vadd.f32 %v3430_v8, %v6239_v52  ;;  %v3549_v19 = vmax.f32 %v6247_v17, %v3493_v5  ;;  %v6259_v57 = vld [vmem:[#allocation51_spill] sm:$0xff]  ;;  %v6262_v5 = vld [vmem:[#allocation57_spill] sm:$0xff] }
 0x5d6   : > { %v3552_v63 = vmax.f32 %v6252_v36, %v3496_v51  ;;  %v3567_v45 = vmax.f32 %v3559_v30, %v3511_v31  ;;  %v3550_v26 = vmax.f32 %v6258_v55, %v3494_v48  ;;  %v3510_v8 = vadd.f32 %v3414_v33, %v6259_v57 }
 0x5d7   : > { %3580 = vst [vmem:[%s5994_s26 + $0x18] sm:$0xff] %v3572_v49  ;;  %v3570_v6 = vmax.f32 %v3562_v22, %v3514_v46  ;;  %v3557_v15 = vmax.f32 %v3549_v19, %v3501_v14 }
 0x5d8   : > { %v3560_v32 = vmax.f32 %v3552_v63, %v3504_v58  ;;  %v3558_v52 = vmax.f32 %v3550_v26, %v3502_v39 }
 0x5d9   : > { %3578 = vst [vmem:[%s5994_s26 + $0x8] sm:$0xff] %v3570_v6  ;;  %v3565_v1 = vmax.f32 %v3557_v15, %v3509_v12 }
 0x5da   : > { %v3568_v0 = vmax.f32 %v3560_v32, %v3512_v2  ;;  %v3566_v6 = vmax.f32 %v3558_v52, %v3510_v8 }
 0x5dc   : > { %v4296_v4 = vpop.f32.mrf.mxu1 }
 0x5dd   : > { %v3451_v43 = vadd.f32 %v4296_v4, %v5823_v37 }
 0x5de   : > { %v3442_v34 = vpop.f32.mrf.mxu1 }
 0x5df   : > { %v3519_v50 = vadd.f32 %v3451_v43, %v6255_v7  ;;  %v3443_v35 = vadd.f32 %v5823_v37, %v3442_v34 }
 0x5e0   : > { %v4297_v53 = vpop.f32.mrf.mxu1 }
 0x5e1   : > { %v3575_v47 = vmax.f32 %v3567_v45, %v3519_v50  ;;  %v3517_v22 = vadd.f32 %v3443_v35, %v6260_v25  ;;  %v3454_v49 = vadd.f32 %v4297_v53, %v5823_v37 }
 0x5e2   : > { %v3445_v46 = vpop.f32.mrf.mxu1 }
 0x5e3   : > { %3583 = vst [vmem:[%s5994_s26 + $0x30] sm:$0xff] %v3575_v47  ;;  %v3573_v56 = vmax.f32 %v3565_v1, %v3517_v22  ;;  %v3520_v10 = vadd.f32 %v3454_v49, %v6261_v40  ;;  %v3446_v61 = vadd.f32 %v5823_v37, %v3445_v46 }
 0x5e5   : > { %3581 = vst [vmem:[%s5994_s26 + $0x20] sm:$0xff] %v3573_v56  ;;  %v3576_v42 = vmax.f32 %v3568_v0, %v3520_v10  ;;  %v3518_v62 = vadd.f32 %v3446_v61, %v6262_v5 }
 0x5e7   : > { %3584 = vst [vmem:[%s5994_s26 + $0x38] sm:$0xff] %v3576_v42  ;;  %v3574_v21 = vmax.f32 %v3566_v6, %v3518_v62 }
 0x5e9   : > { %3582 = vst [vmem:[%s5994_s26 + $0x28] sm:$0xff] %v3574_v21 }
 0x5ea   : > { %4750 = shalt.err (!%p4747_p5)
}
 0x5eb   : > { %s4751_s18 = scalar_lea.hbm %s6064_s2, 1024  ;;  %s4755_s11 = scalar_lea.hbm %s6121_s10, 2048 }
 0x5ec   : > { %p4752_p13 = scmp.ne.s32.totalorder %s6064_s2, %s4751_s18  ;;  %p4756_p9 = scmp.lt.s32.totalorder %s6064_s2, %s6121_s10 }
 0x5ed   : > { %p4757_p8 = scmp.lt.s32.totalorder %s4755_s11, %s4751_s18 }
 0x5ee   : > { %p4753_p2 = pnand %p4752_p13, %p6263_p4 }
 0x5ef   : > { %p4758_p6 = por %p4757_p8, %p4756_p9 }
 0x5f0   : > { %p4754_p0 = pneg %p4753_p2 }
 0x5f2   : > { %p4759_p11 = pnand %p4758_p6, %p4754_p0 }
 0x5f4   : > { %4762 = shalt.err (!%p4759_p11)
}
 0x5f5   : > { %s4829_s26 = smov 128   ;;  %s4830_s30 = smov 8  }
 0x5f6   : > { %4343 = dma.vmem_to_hbm [thread:$0]  (%p6263_p4), %s6066_s12, 1024, %s6064_s2, %s3586_s17, %s4829_s26, %s4829_s26, %s4830_s30  }
 0x5f7 PF: > { %s6264_s13 = sld [smem:[#allocation22_spill]] }
 0x5f8   : > { %s6265_s22 = sld [smem:[#allocation25_spill]] }
 0x5fd   : > { %s3614_s20 = sand.u32 1, %s6264_s13  }
 0x5fe   : > { %p6266_p10 = scmp.ne.s32.totalorder %s6265_s22, 0  ;;  %s3615_s23 = scalar_lea.sflag [#allocation4], %s3614_s20 }
 0x600   : > { %p4362_p1 = pnand %p3727_p3, %p6266_p10 }
 0x602   : > { %p4363_p12 = pneg %p4362_p1 }
 0x604   : > { %4796 = dma.done.wait (%p4363_p12), %s3615_s23, 1024  }
 0x605   : > { %4798 = vsyncadd (%p4363_p12), %s3615_s23, 4294966272  ;;  %s6267_s16 = sld [smem:[#allocation23_spill]]  ;;  %s6269_s13 = smov %s4805_s14 }
 0x606   : > { %s6268_s24 = sld [smem:[#allocation24_spill]]  ;;  %s6270_s14 = smov %s4809_s15 }
 0x60b   : > { %p26_p7 = scmp.ge.s32.totalorder %s6267_s16, 4  }
 0x60c   : > { %s6271_s15 = smov %s6268_s24 }
 0x60d   :  { %28 = sbr.rel (!%p26_p7) target bundleno = 11 (0xb), region = 130 }
 0x612   :  { %3620 = vsyncpa [#allocation3], 1 }
 0x613   :  { %3622 = vsyncpa [#allocation3 + $0x1], 1 }
 0x614   :  { %3623 = vsyncpa [#allocation6], 1 }
 0x615   :  { %3624 = vsyncpa [#allocation9], 1 }
 0x616   :  { %3625 = vsyncpa [#allocation12], 1 }
 0x617   :  { %3626 = vsyncpa [#allocation4], 1 }
 0x618   :  { %3628 = vsyncpa [#allocation4 + $0x1], 1 }

</bundles_post_ra>
